<compile_context>
chip_gen: v5e
topology: v5e:2x2
jax: 0.10.0
libtpu: 0.0.40
codegen_flags: <defaults>
</compile_context>

<pallas_src>
import jax
import jax.numpy as jnp
from jax import lax
from jax.experimental import pallas as pl
from jax.experimental.pallas import tpu as pltpu

HIDDEN = 64
FC_MID = 32


def lstm_kernel(x_ref,                     # (T, B, 1)  f32
                wih08_ref,                 # (1, 8H)    f32  (W_ih0 scattered into layer-0 cols)
                bias8_ref,                 # (1, 8H)    f32  (b0 in layer-0 cols, b1 in layer-1 cols)
                w8_ref,                    # (2H, 8H)   bf16 fused recurrent weights
                wfc1_ref, bfc1_ref,        # (H, 32), (1, 32)  f32
                wfc2_ref, bfc2_ref,        # (32, 1), (1, 1)   f32
                out_ref,                   # (B, 1)     f32
                xw_ref):                   # scratch (T, B, 8H) bf16
    T, B, _ = x_ref.shape
    H = HIDDEN
    H2, H4, H6 = 2 * H, 4 * H, 6 * H

    # Hoisted input projection + all biases: one vectorized prologue op.
    # xw[t] columns: layer-0 blocks = x(t)*W_ih0 + b0 ; layer-1 blocks = b1.
    xw_ref[...] = (x_ref[...] * wih08_ref[...] + bias8_ref[...]).astype(jnp.bfloat16)

    def packed_activate(G, c_pack, mask=None):
        # G columns: [i0 i1 f0 f1 o0 o1 | g0 g1]; packs are lane-concats [layer0 | layer1].
        s = jax.nn.sigmoid(G[:, :H6])                  # one EUP slab: i/f/o for both layers
        g = jnp.tanh(G[:, H6:])                        # one EUP slab: g for both layers
        i_p, f_p, o_p = s[:, :H2], s[:, H2:H4], s[:, H4:H6]
        c_new = f_p * c_pack + i_p * g
        if mask is not None:                           # init only: force layer-1 half to zero
            c_new = jnp.where(mask, c_new, 0.0)        # (h follows: o * tanh(0) == 0)
        h_new = (o_p * jnp.tanh(c_new)).astype(jnp.bfloat16)
        return h_new, c_new

    # t = 0 bootstrap: g0(0) = x(0)*W_ih0 + b0 (no recurrent term); layer-1 half masked to zero
    # so the loop carry starts as h_pack=[h0(0)|0], c_pack=[c0(0)|0].
    lane = lax.broadcasted_iota(jnp.int32, (B, H2), 1)
    h_pack, c_pack = packed_activate(xw_ref[0].astype(jnp.float32),
                                     jnp.zeros((B, H2), jnp.float32),
                                     mask=lane < H)

    def step(t, carry):
        # carry in: h_pack = [h0(t) | h1(t-1)] bf16, c_pack = [c0(t) | c1(t-1)] f32
        h_pack, c_pack = carry
        t1 = jnp.minimum(t + 1, T - 1)   # last iteration's layer-0 half is discarded; stay in-bounds
        G = (jnp.dot(h_pack, w8_ref[...], preferred_element_type=jnp.float32)
             + xw_ref[t1])               # [g0(t+1) | g1(t)] interleaved per gate
        # carry out: h_pack = [h0(t+1) | h1(t)], c_pack = [c0(t+1) | c1(t)]
        return packed_activate(G, c_pack)

    unroll = True if T <= 64 else 8
    h_pack, _ = lax.fori_loop(0, T, step, (h_pack, c_pack), unroll=unroll)

    # dropout(p=0.3) is identity in eval mode.
    h1 = h_pack[:, H:H2].astype(jnp.float32)           # h1(T-1)
    fc1 = jnp.maximum(
        jnp.dot(h1, wfc1_ref[...], preferred_element_type=jnp.float32) + bfc1_ref[...], 0.0)
    out_ref[...] = (jnp.dot(fc1, wfc2_ref[...], preferred_element_type=jnp.float32)
                    + bfc2_ref[...])


def _gate_blocks(w):
    """Split a (in, 4H) PyTorch-gate-order (i, f, g, o) matrix into per-gate blocks."""
    H = HIDDEN
    return w[:, 0:H], w[:, H:2 * H], w[:, 2 * H:3 * H], w[:, 3 * H:4 * H]


def _pack_fused_weights(p):
    """Build the fused (2H, 8H) recurrent RHS plus the 8H-wide input/bias rows.

    Column blocks (each H wide): [i0 i1 f0 f1 o0 o1 g0 g1].
    RHS rows 0:H are driven by h0(t), rows H:2H by h1(t-1).
    """
    H = HIDDEN
    i0, f0, g0, o0 = _gate_blocks(p["whh0"])   # layer-0 recurrence (rows for h0)
    ia, fa, ga, oa = _gate_blocks(p["wih1"])   # layer-1 input path  (rows for h0)
    ib, fb, gb, ob = _gate_blocks(p["whh1"])   # layer-1 recurrence  (rows for h1)
    z = jnp.zeros((H, H), jnp.float32)
    top = jnp.concatenate([i0, ia, f0, fa, o0, oa, g0, ga], axis=1)     # (H, 8H)
    bot = jnp.concatenate([z, ib, z, fb, z, ob, z, gb], axis=1)         # (H, 8H)
    w8 = jnp.concatenate([top, bot], axis=0).astype(jnp.bfloat16)       # (2H, 8H)

    xi, xf, xg, xo = _gate_blocks(p["wih0"])                            # (1, H) each
    z1 = jnp.zeros((1, H), jnp.float32)
    wih08 = jnp.concatenate([xi, z1, xf, z1, xo, z1, xg, z1], axis=1)   # (1, 8H)

    b0i, b0f, b0g, b0o = _gate_blocks(p["b0"])
    b1i, b1f, b1g, b1o = _gate_blocks(p["b1"])
    bias8 = jnp.concatenate([b0i, b1i, b0f, b1f, b0o, b1o, b0g, b1g], axis=1)  # (1, 8H)
    return w8, wih08, bias8


def lstm_model_forward(x, params):
    """x: (B, T, 1) float32, batch_first like the PyTorch module."""
    B, T, _ = x.shape
    x_tb = jnp.transpose(x, (1, 0, 2))                    # (T, B, 1) time-major

    w8, wih08, bias8 = _pack_fused_weights(params)

    vmem = lambda: pl.BlockSpec(memory_space=pltpu.MemorySpace.VMEM)
    args = (x_tb, wih08, bias8, w8,
            params["wfc1"], params["bfc1"], params["wfc2"], params["bfc2"])

    # Only T-scaling buffer: (T, B, 8H) bf16 scratch. Guard the scoped-VMEM limit so long
    # sequences don't hit the default cap (and stay well under v7x's 64 MiB physical VMEM).
    scratch_bytes = T * B * 8 * HIDDEN * 2
    vmem_limit = int(min(96 * 1024 * 1024,
                         max(32 * 1024 * 1024, 4 * scratch_bytes + (4 << 20))))

    return pl.pallas_call(
        lstm_kernel,
        out_shape=jax.ShapeDtypeStruct((B, 1), jnp.float32),
        in_specs=[vmem() for _ in args],
        out_specs=vmem(),
        scratch_shapes=[pltpu.VMEM((T, B, 8 * HIDDEN), jnp.bfloat16)],
        compiler_params=pltpu.CompilerParams(vmem_limit_bytes=vmem_limit),
    )(*args)


def init_params(key):
    """PyTorch-layout params (gate order i,f,g,o; weights transposed to (in, out))."""
    ks = jax.random.split(key, 16)
    H = HIDDEN
    k_lstm = 1.0 / jnp.sqrt(H)

    def u(k, shape, bound):
        return jax.random.uniform(k, shape, jnp.float32, -bound, bound)

    params = {
        # layer 0: W_ih (4H,1) -> (1,4H); W_hh (4H,H) -> (H,4H)
        "wih0": u(ks[0], (1, 4 * H), k_lstm),
        "whh0": u(ks[1], (H, 4 * H), k_lstm),
        "b0":   u(ks[2], (1, 4 * H), k_lstm) + u(ks[3], (1, 4 * H), k_lstm),  # b_ih + b_hh
        # layer 1: W_ih (4H,H) -> (H,4H); W_hh (4H,H) -> (H,4H)
        "wih1": u(ks[4], (H, 4 * H), k_lstm),
        "whh1": u(ks[5], (H, 4 * H), k_lstm),
        "b1":   u(ks[6], (1, 4 * H), k_lstm) + u(ks[7], (1, 4 * H), k_lstm),
        # fc: Linear(64,32) and Linear(32,1), transposed
        "wfc1": u(ks[8], (H, FC_MID), 1.0 / jnp.sqrt(H)),
        "bfc1": u(ks[9], (1, FC_MID), 1.0 / jnp.sqrt(H)),
        "wfc2": u(ks[10], (FC_MID, 1), 1.0 / jnp.sqrt(FC_MID)),
        "bfc2": u(ks[11], (1, 1), 1.0 / jnp.sqrt(FC_MID)),
    }
    return params


def ref_forward(x, p):
    """Pure-JAX f32 reference of the PyTorch forward (eval mode, gate order i,f,g,o)."""
    B, T, _ = x.shape
    H = HIDDEN
    h0 = jnp.zeros((B, H)); c0 = jnp.zeros((B, H))
    h1 = jnp.zeros((B, H)); c1 = jnp.zeros((B, H))

    def upd(gates, h, c):
        i = jax.nn.sigmoid(gates[:, 0:H]); f = jax.nn.sigmoid(gates[:, H:2 * H])
        g = jnp.tanh(gates[:, 2 * H:3 * H]); o = jax.nn.sigmoid(gates[:, 3 * H:4 * H])
        c = f * c + i * g
        return o * jnp.tanh(c), c

    for t in range(T):
        x_t = x[:, t, :]  # (B, 1)
        h0, c0 = upd(x_t @ p["wih0"] + h0 @ p["whh0"] + p["b0"], h0, c0)
        h1, c1 = upd(h0 @ p["wih1"] + h1 @ p["whh1"] + p["b1"], h1, c1)

    z = jnp.maximum(h1 @ p["wfc1"] + p["bfc1"], 0.0)
    return z @ p["wfc2"] + p["bfc2"]


if __name__ == "__main__":
    key = jax.random.PRNGKey(0)
    k_x, k_p = jax.random.split(key)

    B, T = 8, 16
    x = jax.random.normal(k_x, (B, T, 1), jnp.float32)   # (batch, seq, input=1), batch_first
    params = init_params(k_p)

    out = lstm_model_forward(x, params)
    out = jax.block_until_ready(out)

    ref = ref_forward(x, params)
    assert out.shape == (B, 1), out.shape
    # bf16 recurrent weights / hidden states / hoisted input projection -> looser tolerance
    # vs. the f32 reference (cell states and gate math stay f32).
    assert jnp.allclose(out, ref, rtol=2e-2, atol=3e-2), (out, ref)

    print("KERNEL_OK")
</pallas_src>

<mosaic_0001>
module attributes {stable_mosaic.version = 11 : i64} {
  func.func @lstm_kernel(%arg0: memref<16x8x1xf32, #tpu.memory_space<vmem>>, %arg1: memref<1x512xf32, #tpu.memory_space<vmem>>, %arg2: memref<1x512xf32, #tpu.memory_space<vmem>>, %arg3: memref<128x512xbf16, #tpu.memory_space<vmem>>, %arg4: memref<64x32xf32, #tpu.memory_space<vmem>>, %arg5: memref<1x32xf32, #tpu.memory_space<vmem>>, %arg6: memref<32x1xf32, #tpu.memory_space<vmem>>, %arg7: memref<1x1xf32, #tpu.memory_space<vmem>>, %arg8: memref<8x1xf32, #tpu.memory_space<vmem>>, %arg9: memref<16x8x512xbf16, #tpu.memory_space<vmem>>) attributes {dimension_semantics = [], scalar_prefetch = 0 : i64, scratch_operands = 1 : i64, tpu.core_type = #tpu.core_type<tc>} {
    %c0 = arith.constant 0 : index
    %c0_0 = arith.constant 0 : index
    %c0_1 = arith.constant 0 : index
    %0 = vector.load %arg0[%c0, %c0_0, %c0_1] : memref<16x8x1xf32, #tpu.memory_space<vmem>>, vector<16x8x1xf32>
    %c0_2 = arith.constant 0 : index
    %c0_3 = arith.constant 0 : index
    %1 = vector.load %arg1[%c0_2, %c0_3] : memref<1x512xf32, #tpu.memory_space<vmem>>, vector<1x512xf32>
    %2 = vector.shape_cast %1 : vector<1x512xf32> to vector<1x1x512xf32>
    %3 = vector.broadcast %0 : vector<16x8x1xf32> to vector<16x8x512xf32>
    %4 = vector.broadcast %2 : vector<1x1x512xf32> to vector<16x8x512xf32>
    %5 = arith.mulf %3, %4 : vector<16x8x512xf32>
    %c0_4 = arith.constant 0 : index
    %c0_5 = arith.constant 0 : index
    %6 = vector.load %arg2[%c0_4, %c0_5] : memref<1x512xf32, #tpu.memory_space<vmem>>, vector<1x512xf32>
    %7 = vector.shape_cast %6 : vector<1x512xf32> to vector<1x1x512xf32>
    %8 = vector.broadcast %7 : vector<1x1x512xf32> to vector<16x8x512xf32>
    %9 = arith.addf %5, %8 : vector<16x8x512xf32>
    %10 = arith.truncf %9 : vector<16x8x512xf32> to vector<16x8x512xbf16>
    %c0_6 = arith.constant 0 : index
    %c0_7 = arith.constant 0 : index
    %c0_8 = arith.constant 0 : index
    %11 = vector.load %arg9[%c0_6, %c0_7, %c0_8] : memref<16x8x512xbf16, #tpu.memory_space<vmem>>, vector<16x8x512xbf16>
    tpu.vector_store %arg9[%c0_6, %c0_7, %c0_8], %10 {strides = array<i32>} : memref<16x8x512xbf16, #tpu.memory_space<vmem>>, vector<16x8x512xbf16>,
    %12 = tpu.iota {dimensions = array<i32: 1>} : vector<8x128xi32>
    %c0_9 = arith.constant 0 : index
    %c0_10 = arith.constant 0 : index
    %c0_11 = arith.constant 0 : index
    %13 = vector.load %arg9[%c0_9, %c0_10, %c0_11] : memref<16x8x512xbf16, #tpu.memory_space<vmem>>, vector<1x8x512xbf16>
    %14 = vector.shape_cast %13 : vector<1x8x512xbf16> to vector<8x512xbf16>
    %15 = arith.extf %14 : vector<8x512xbf16> to vector<8x512xf32>
    %cst = arith.constant 0.000000e+00 : f32
    %16 = vector.broadcast %cst : f32 to vector<8x128xf32>
    %c64_i32 = arith.constant 64 : i32
    %17 = vector.broadcast %c64_i32 : i32 to vector<8x128xi32>
    %18 = arith.cmpi slt, %12, %17 : vector<8x128xi32>
    %19 = vector.extract_strided_slice %15 {offsets = [0, 0], sizes = [8, 384], strides = [1, 1]} : vector<8x512xf32> to vector<8x384xf32>
    %20 = arith.negf %19 : vector<8x384xf32>
    %21 = math.exp %20 : vector<8x384xf32>
    %cst_12 = arith.constant 1.000000e+00 : f32
    %22 = vector.broadcast %cst_12 : f32 to vector<8x384xf32>
    %23 = arith.addf %22, %21 : vector<8x384xf32>
    %24 = arith.divf %22, %23 : vector<8x384xf32>
    %25 = vector.extract_strided_slice %15 {offsets = [0, 384], sizes = [8, 128], strides = [1, 1]} : vector<8x512xf32> to vector<8x128xf32>
    %26 = math.tanh %25 : vector<8x128xf32>
    %27 = vector.extract_strided_slice %24 {offsets = [0, 0], sizes = [8, 128], strides = [1, 1]} : vector<8x384xf32> to vector<8x128xf32>
    %28 = vector.extract_strided_slice %24 {offsets = [0, 128], sizes = [8, 128], strides = [1, 1]} : vector<8x384xf32> to vector<8x128xf32>
    %29 = vector.extract_strided_slice %24 {offsets = [0, 256], sizes = [8, 128], strides = [1, 1]} : vector<8x384xf32> to vector<8x128xf32>
    %30 = arith.mulf %28, %16 : vector<8x128xf32>
    %31 = arith.mulf %27, %26 : vector<8x128xf32>
    %32 = arith.addf %30, %31 : vector<8x128xf32>
    %cst_13 = arith.constant 0.000000e+00 : f32
    %33 = vector.broadcast %cst_13 : f32 to vector<8x128xf32>
    %34 = arith.select %18, %32, %33 : vector<8x128xi1>, vector<8x128xf32>
    %35 = math.tanh %34 : vector<8x128xf32>
    %36 = arith.mulf %29, %35 : vector<8x128xf32>
    %37 = arith.truncf %36 : vector<8x128xf32> to vector<8x128xbf16>
    %c0_i32 = arith.constant 0 : i32
    %c1_i32 = arith.constant 1 : i32
    %38 = arith.addi %c0_i32, %c1_i32 : i32
    %c15_i32 = arith.constant 15 : i32
    %39 = arith.minsi %38, %c15_i32 : i32
    %c0_14 = arith.constant 0 : index
    %c0_15 = arith.constant 0 : index
    %40 = vector.load %arg3[%c0_14, %c0_15] : memref<128x512xbf16, #tpu.memory_space<vmem>>, vector<128x512xbf16>
    %cst_16 = arith.constant dense<0.000000e+00> : vector<8x512xf32>
    %41 = tpu.matmul %37, %40, %cst_16 {dimension_numbers = #tpu.dot_dimension_numbers<[1], [0], [0], [1], [0, 0, 1, 1], [], []>} : vector<8x128xbf16>, vector<128x512xbf16>, vector<8x512xf32> -> vector<8x512xf32>
    %42 = arith.index_cast %39 : i32 to index
    %c0_17 = arith.constant 0 : index
    %c0_18 = arith.constant 0 : index
    %43 = vector.load %arg9[%42, %c0_17, %c0_18] : memref<16x8x512xbf16, #tpu.memory_space<vmem>>, vector<1x8x512xbf16>
    %44 = vector.shape_cast %43 : vector<1x8x512xbf16> to vector<8x512xbf16>
    %45 = arith.extf %44 : vector<8x512xbf16> to vector<8x512xf32>
    %46 = arith.addf %41, %45 : vector<8x512xf32>
    %47 = vector.extract_strided_slice %46 {offsets = [0, 0], sizes = [8, 384], strides = [1, 1]} : vector<8x512xf32> to vector<8x384xf32>
    %48 = arith.negf %47 : vector<8x384xf32>
    %49 = math.exp %48 : vector<8x384xf32>
    %cst_19 = arith.constant 1.000000e+00 : f32
    %50 = vector.broadcast %cst_19 : f32 to vector<8x384xf32>
    %51 = arith.addf %50, %49 : vector<8x384xf32>
    %52 = arith.divf %50, %51 : vector<8x384xf32>
    %53 = vector.extract_strided_slice %46 {offsets = [0, 384], sizes = [8, 128], strides = [1, 1]} : vector<8x512xf32> to vector<8x128xf32>
    %54 = math.tanh %53 : vector<8x128xf32>
    %55 = vector.extract_strided_slice %52 {offsets = [0, 0], sizes = [8, 128], strides = [1, 1]} : vector<8x384xf32> to vector<8x128xf32>
    %56 = vector.extract_strided_slice %52 {offsets = [0, 128], sizes = [8, 128], strides = [1, 1]} : vector<8x384xf32> to vector<8x128xf32>
    %57 = vector.extract_strided_slice %52 {offsets = [0, 256], sizes = [8, 128], strides = [1, 1]} : vector<8x384xf32> to vector<8x128xf32>
    %58 = arith.mulf %56, %34 : vector<8x128xf32>
    %59 = arith.mulf %55, %54 : vector<8x128xf32>
    %60 = arith.addf %58, %59 : vector<8x128xf32>
    %61 = math.tanh %60 : vector<8x128xf32>
    %62 = arith.mulf %57, %61 : vector<8x128xf32>
    %63 = arith.truncf %62 : vector<8x128xf32> to vector<8x128xbf16>
    %c1_i32_20 = arith.constant 1 : i32
    %c1_i32_21 = arith.constant 1 : i32
    %64 = arith.addi %c1_i32_20, %c1_i32_21 : i32
    %c15_i32_22 = arith.constant 15 : i32
    %65 = arith.minsi %64, %c15_i32_22 : i32
    %c0_23 = arith.constant 0 : index
    %c0_24 = arith.constant 0 : index
    %66 = vector.load %arg3[%c0_23, %c0_24] : memref<128x512xbf16, #tpu.memory_space<vmem>>, vector<128x512xbf16>
    %cst_25 = arith.constant dense<0.000000e+00> : vector<8x512xf32>
    %67 = tpu.matmul %63, %66, %cst_25 {dimension_numbers = #tpu.dot_dimension_numbers<[1], [0], [0], [1], [0, 0, 1, 1], [], []>} : vector<8x128xbf16>, vector<128x512xbf16>, vector<8x512xf32> -> vector<8x512xf32>
    %68 = arith.index_cast %65 : i32 to index
    %c0_26 = arith.constant 0 : index
    %c0_27 = arith.constant 0 : index
    %69 = vector.load %arg9[%68, %c0_26, %c0_27] : memref<16x8x512xbf16, #tpu.memory_space<vmem>>, vector<1x8x512xbf16>
    %70 = vector.shape_cast %69 : vector<1x8x512xbf16> to vector<8x512xbf16>
    %71 = arith.extf %70 : vector<8x512xbf16> to vector<8x512xf32>
    %72 = arith.addf %67, %71 : vector<8x512xf32>
    %73 = vector.extract_strided_slice %72 {offsets = [0, 0], sizes = [8, 384], strides = [1, 1]} : vector<8x512xf32> to vector<8x384xf32>
    %74 = arith.negf %73 : vector<8x384xf32>
    %75 = math.exp %74 : vector<8x384xf32>
    %cst_28 = arith.constant 1.000000e+00 : f32
    %76 = vector.broadcast %cst_28 : f32 to vector<8x384xf32>
    %77 = arith.addf %76, %75 : vector<8x384xf32>
    %78 = arith.divf %76, %77 : vector<8x384xf32>
    %79 = vector.extract_strided_slice %72 {offsets = [0, 384], sizes = [8, 128], strides = [1, 1]} : vector<8x512xf32> to vector<8x128xf32>
    %80 = math.tanh %79 : vector<8x128xf32>
    %81 = vector.extract_strided_slice %78 {offsets = [0, 0], sizes = [8, 128], strides = [1, 1]} : vector<8x384xf32> to vector<8x128xf32>
    %82 = vector.extract_strided_slice %78 {offsets = [0, 128], sizes = [8, 128], strides = [1, 1]} : vector<8x384xf32> to vector<8x128xf32>
    %83 = vector.extract_strided_slice %78 {offsets = [0, 256], sizes = [8, 128], strides = [1, 1]} : vector<8x384xf32> to vector<8x128xf32>
    %84 = arith.mulf %82, %60 : vector<8x128xf32>
    %85 = arith.mulf %81, %80 : vector<8x128xf32>
    %86 = arith.addf %84, %85 : vector<8x128xf32>
    %87 = math.tanh %86 : vector<8x128xf32>
    %88 = arith.mulf %83, %87 : vector<8x128xf32>
    %89 = arith.truncf %88 : vector<8x128xf32> to vector<8x128xbf16>
    %c2_i32 = arith.constant 2 : i32
    %c1_i32_29 = arith.constant 1 : i32
    %90 = arith.addi %c2_i32, %c1_i32_29 : i32
    %c15_i32_30 = arith.constant 15 : i32
    %91 = arith.minsi %90, %c15_i32_30 : i32
    %c0_31 = arith.constant 0 : index
    %c0_32 = arith.constant 0 : index
    %92 = vector.load %arg3[%c0_31, %c0_32] : memref<128x512xbf16, #tpu.memory_space<vmem>>, vector<128x512xbf16>
    %cst_33 = arith.constant dense<0.000000e+00> : vector<8x512xf32>
    %93 = tpu.matmul %89, %92, %cst_33 {dimension_numbers = #tpu.dot_dimension_numbers<[1], [0], [0], [1], [0, 0, 1, 1], [], []>} : vector<8x128xbf16>, vector<128x512xbf16>, vector<8x512xf32> -> vector<8x512xf32>
    %94 = arith.index_cast %91 : i32 to index
    %c0_34 = arith.constant 0 : index
    %c0_35 = arith.constant 0 : index
    %95 = vector.load %arg9[%94, %c0_34, %c0_35] : memref<16x8x512xbf16, #tpu.memory_space<vmem>>, vector<1x8x512xbf16>
    %96 = vector.shape_cast %95 : vector<1x8x512xbf16> to vector<8x512xbf16>
    %97 = arith.extf %96 : vector<8x512xbf16> to vector<8x512xf32>
    %98 = arith.addf %93, %97 : vector<8x512xf32>
    %99 = vector.extract_strided_slice %98 {offsets = [0, 0], sizes = [8, 384], strides = [1, 1]} : vector<8x512xf32> to vector<8x384xf32>
    %100 = arith.negf %99 : vector<8x384xf32>
    %101 = math.exp %100 : vector<8x384xf32>
    %cst_36 = arith.constant 1.000000e+00 : f32
    %102 = vector.broadcast %cst_36 : f32 to vector<8x384xf32>
    %103 = arith.addf %102, %101 : vector<8x384xf32>
    %104 = arith.divf %102, %103 : vector<8x384xf32>
    %105 = vector.extract_strided_slice %98 {offsets = [0, 384], sizes = [8, 128], strides = [1, 1]} : vector<8x512xf32> to vector<8x128xf32>
    %106 = math.tanh %105 : vector<8x128xf32>
    %107 = vector.extract_strided_slice %104 {offsets = [0, 0], sizes = [8, 128], strides = [1, 1]} : vector<8x384xf32> to vector<8x128xf32>
    %108 = vector.extract_strided_slice %104 {offsets = [0, 128], sizes = [8, 128], strides = [1, 1]} : vector<8x384xf32> to vector<8x128xf32>
    %109 = vector.extract_strided_slice %104 {offsets = [0, 256], sizes = [8, 128], strides = [1, 1]} : vector<8x384xf32> to vector<8x128xf32>
    %110 = arith.mulf %108, %86 : vector<8x128xf32>
    %111 = arith.mulf %107, %106 : vector<8x128xf32>
    %112 = arith.addf %110, %111 : vector<8x128xf32>
    %113 = math.tanh %112 : vector<8x128xf32>
    %114 = arith.mulf %109, %113 : vector<8x128xf32>
    %115 = arith.truncf %114 : vector<8x128xf32> to vector<8x128xbf16>
    %c3_i32 = arith.constant 3 : i32
    %c1_i32_37 = arith.constant 1 : i32
    %116 = arith.addi %c3_i32, %c1_i32_37 : i32
    %c15_i32_38 = arith.constant 15 : i32
    %117 = arith.minsi %116, %c15_i32_38 : i32
    %c0_39 = arith.constant 0 : index
    %c0_40 = arith.constant 0 : index
    %118 = vector.load %arg3[%c0_39, %c0_40] : memref<128x512xbf16, #tpu.memory_space<vmem>>, vector<128x512xbf16>
    %cst_41 = arith.constant dense<0.000000e+00> : vector<8x512xf32>
    %119 = tpu.matmul %115, %118, %cst_41 {dimension_numbers = #tpu.dot_dimension_numbers<[1], [0], [0], [1], [0, 0, 1, 1], [], []>} : vector<8x128xbf16>, vector<128x512xbf16>, vector<8x512xf32> -> vector<8x512xf32>
    %120 = arith.index_cast %117 : i32 to index
    %c0_42 = arith.constant 0 : index
    %c0_43 = arith.constant 0 : index
    %121 = vector.load %arg9[%120, %c0_42, %c0_43] : memref<16x8x512xbf16, #tpu.memory_space<vmem>>, vector<1x8x512xbf16>
    %122 = vector.shape_cast %121 : vector<1x8x512xbf16> to vector<8x512xbf16>
    %123 = arith.extf %122 : vector<8x512xbf16> to vector<8x512xf32>
    %124 = arith.addf %119, %123 : vector<8x512xf32>
    %125 = vector.extract_strided_slice %124 {offsets = [0, 0], sizes = [8, 384], strides = [1, 1]} : vector<8x512xf32> to vector<8x384xf32>
    %126 = arith.negf %125 : vector<8x384xf32>
    %127 = math.exp %126 : vector<8x384xf32>
    %cst_44 = arith.constant 1.000000e+00 : f32
    %128 = vector.broadcast %cst_44 : f32 to vector<8x384xf32>
    %129 = arith.addf %128, %127 : vector<8x384xf32>
    %130 = arith.divf %128, %129 : vector<8x384xf32>
    %131 = vector.extract_strided_slice %124 {offsets = [0, 384], sizes = [8, 128], strides = [1, 1]} : vector<8x512xf32> to vector<8x128xf32>
    %132 = math.tanh %131 : vector<8x128xf32>
    %133 = vector.extract_strided_slice %130 {offsets = [0, 0], sizes = [8, 128], strides = [1, 1]} : vector<8x384xf32> to vector<8x128xf32>
    %134 = vector.extract_strided_slice %130 {offsets = [0, 128], sizes = [8, 128], strides = [1, 1]} : vector<8x384xf32> to vector<8x128xf32>
    %135 = vector.extract_strided_slice %130 {offsets = [0, 256], sizes = [8, 128], strides = [1, 1]} : vector<8x384xf32> to vector<8x128xf32>
    %136 = arith.mulf %134, %112 : vector<8x128xf32>
    %137 = arith.mulf %133, %132 : vector<8x128xf32>
    %138 = arith.addf %136, %137 : vector<8x128xf32>
    %139 = math.tanh %138 : vector<8x128xf32>
    %140 = arith.mulf %135, %139 : vector<8x128xf32>
    %141 = arith.truncf %140 : vector<8x128xf32> to vector<8x128xbf16>
    %c4_i32 = arith.constant 4 : i32
    %c1_i32_45 = arith.constant 1 : i32
    %142 = arith.addi %c4_i32, %c1_i32_45 : i32
    %c15_i32_46 = arith.constant 15 : i32
    %143 = arith.minsi %142, %c15_i32_46 : i32
    %c0_47 = arith.constant 0 : index
    %c0_48 = arith.constant 0 : index
    %144 = vector.load %arg3[%c0_47, %c0_48] : memref<128x512xbf16, #tpu.memory_space<vmem>>, vector<128x512xbf16>
    %cst_49 = arith.constant dense<0.000000e+00> : vector<8x512xf32>
    %145 = tpu.matmul %141, %144, %cst_49 {dimension_numbers = #tpu.dot_dimension_numbers<[1], [0], [0], [1], [0, 0, 1, 1], [], []>} : vector<8x128xbf16>, vector<128x512xbf16>, vector<8x512xf32> -> vector<8x512xf32>
    %146 = arith.index_cast %143 : i32 to index
    %c0_50 = arith.constant 0 : index
    %c0_51 = arith.constant 0 : index
    %147 = vector.load %arg9[%146, %c0_50, %c0_51] : memref<16x8x512xbf16, #tpu.memory_space<vmem>>, vector<1x8x512xbf16>
    %148 = vector.shape_cast %147 : vector<1x8x512xbf16> to vector<8x512xbf16>
    %149 = arith.extf %148 : vector<8x512xbf16> to vector<8x512xf32>
    %150 = arith.addf %145, %149 : vector<8x512xf32>
    %151 = vector.extract_strided_slice %150 {offsets = [0, 0], sizes = [8, 384], strides = [1, 1]} : vector<8x512xf32> to vector<8x384xf32>
    %152 = arith.negf %151 : vector<8x384xf32>
    %153 = math.exp %152 : vector<8x384xf32>
    %cst_52 = arith.constant 1.000000e+00 : f32
    %154 = vector.broadcast %cst_52 : f32 to vector<8x384xf32>
    %155 = arith.addf %154, %153 : vector<8x384xf32>
    %156 = arith.divf %154, %155 : vector<8x384xf32>
    %157 = vector.extract_strided_slice %150 {offsets = [0, 384], sizes = [8, 128], strides = [1, 1]} : vector<8x512xf32> to vector<8x128xf32>
    %158 = math.tanh %157 : vector<8x128xf32>
    %159 = vector.extract_strided_slice %156 {offsets = [0, 0], sizes = [8, 128], strides = [1, 1]} : vector<8x384xf32> to vector<8x128xf32>
    %160 = vector.extract_strided_slice %156 {offsets = [0, 128], sizes = [8, 128], strides = [1, 1]} : vector<8x384xf32> to vector<8x128xf32>
    %161 = vector.extract_strided_slice %156 {offsets = [0, 256], sizes = [8, 128], strides = [1, 1]} : vector<8x384xf32> to vector<8x128xf32>
    %162 = arith.mulf %160, %138 : vector<8x128xf32>
    %163 = arith.mulf %159, %158 : vector<8x128xf32>
    %164 = arith.addf %162, %163 : vector<8x128xf32>
    %165 = math.tanh %164 : vector<8x128xf32>
    %166 = arith.mulf %161, %165 : vector<8x128xf32>
    %167 = arith.truncf %166 : vector<8x128xf32> to vector<8x128xbf16>
    %c5_i32 = arith.constant 5 : i32
    %c1_i32_53 = arith.constant 1 : i32
    %168 = arith.addi %c5_i32, %c1_i32_53 : i32
    %c15_i32_54 = arith.constant 15 : i32
    %169 = arith.minsi %168, %c15_i32_54 : i32
    %c0_55 = arith.constant 0 : index
    %c0_56 = arith.constant 0 : index
    %170 = vector.load %arg3[%c0_55, %c0_56] : memref<128x512xbf16, #tpu.memory_space<vmem>>, vector<128x512xbf16>
    %cst_57 = arith.constant dense<0.000000e+00> : vector<8x512xf32>
    %171 = tpu.matmul %167, %170, %cst_57 {dimension_numbers = #tpu.dot_dimension_numbers<[1], [0], [0], [1], [0, 0, 1, 1], [], []>} : vector<8x128xbf16>, vector<128x512xbf16>, vector<8x512xf32> -> vector<8x512xf32>
    %172 = arith.index_cast %169 : i32 to index
    %c0_58 = arith.constant 0 : index
    %c0_59 = arith.constant 0 : index
    %173 = vector.load %arg9[%172, %c0_58, %c0_59] : memref<16x8x512xbf16, #tpu.memory_space<vmem>>, vector<1x8x512xbf16>
    %174 = vector.shape_cast %173 : vector<1x8x512xbf16> to vector<8x512xbf16>
    %175 = arith.extf %174 : vector<8x512xbf16> to vector<8x512xf32>
    %176 = arith.addf %171, %175 : vector<8x512xf32>
    %177 = vector.extract_strided_slice %176 {offsets = [0, 0], sizes = [8, 384], strides = [1, 1]} : vector<8x512xf32> to vector<8x384xf32>
    %178 = arith.negf %177 : vector<8x384xf32>
    %179 = math.exp %178 : vector<8x384xf32>
    %cst_60 = arith.constant 1.000000e+00 : f32
    %180 = vector.broadcast %cst_60 : f32 to vector<8x384xf32>
    %181 = arith.addf %180, %179 : vector<8x384xf32>
    %182 = arith.divf %180, %181 : vector<8x384xf32>
    %183 = vector.extract_strided_slice %176 {offsets = [0, 384], sizes = [8, 128], strides = [1, 1]} : vector<8x512xf32> to vector<8x128xf32>
    %184 = math.tanh %183 : vector<8x128xf32>
    %185 = vector.extract_strided_slice %182 {offsets = [0, 0], sizes = [8, 128], strides = [1, 1]} : vector<8x384xf32> to vector<8x128xf32>
    %186 = vector.extract_strided_slice %182 {offsets = [0, 128], sizes = [8, 128], strides = [1, 1]} : vector<8x384xf32> to vector<8x128xf32>
    %187 = vector.extract_strided_slice %182 {offsets = [0, 256], sizes = [8, 128], strides = [1, 1]} : vector<8x384xf32> to vector<8x128xf32>
    %188 = arith.mulf %186, %164 : vector<8x128xf32>
    %189 = arith.mulf %185, %184 : vector<8x128xf32>
    %190 = arith.addf %188, %189 : vector<8x128xf32>
    %191 = math.tanh %190 : vector<8x128xf32>
    %192 = arith.mulf %187, %191 : vector<8x128xf32>
    %193 = arith.truncf %192 : vector<8x128xf32> to vector<8x128xbf16>
    %c6_i32 = arith.constant 6 : i32
    %c1_i32_61 = arith.constant 1 : i32
    %194 = arith.addi %c6_i32, %c1_i32_61 : i32
    %c15_i32_62 = arith.constant 15 : i32
    %195 = arith.minsi %194, %c15_i32_62 : i32
    %c0_63 = arith.constant 0 : index
    %c0_64 = arith.constant 0 : index
    %196 = vector.load %arg3[%c0_63, %c0_64] : memref<128x512xbf16, #tpu.memory_space<vmem>>, vector<128x512xbf16>
    %cst_65 = arith.constant dense<0.000000e+00> : vector<8x512xf32>
    %197 = tpu.matmul %193, %196, %cst_65 {dimension_numbers = #tpu.dot_dimension_numbers<[1], [0], [0], [1], [0, 0, 1, 1], [], []>} : vector<8x128xbf16>, vector<128x512xbf16>, vector<8x512xf32> -> vector<8x512xf32>
    %198 = arith.index_cast %195 : i32 to index
    %c0_66 = arith.constant 0 : index
    %c0_67 = arith.constant 0 : index
    %199 = vector.load %arg9[%198, %c0_66, %c0_67] : memref<16x8x512xbf16, #tpu.memory_space<vmem>>, vector<1x8x512xbf16>
    %200 = vector.shape_cast %199 : vector<1x8x512xbf16> to vector<8x512xbf16>
    %201 = arith.extf %200 : vector<8x512xbf16> to vector<8x512xf32>
    %202 = arith.addf %197, %201 : vector<8x512xf32>
    %203 = vector.extract_strided_slice %202 {offsets = [0, 0], sizes = [8, 384], strides = [1, 1]} : vector<8x512xf32> to vector<8x384xf32>
    %204 = arith.negf %203 : vector<8x384xf32>
    %205 = math.exp %204 : vector<8x384xf32>
    %cst_68 = arith.constant 1.000000e+00 : f32
    %206 = vector.broadcast %cst_68 : f32 to vector<8x384xf32>
    %207 = arith.addf %206, %205 : vector<8x384xf32>
    %208 = arith.divf %206, %207 : vector<8x384xf32>
    %209 = vector.extract_strided_slice %202 {offsets = [0, 384], sizes = [8, 128], strides = [1, 1]} : vector<8x512xf32> to vector<8x128xf32>
    %210 = math.tanh %209 : vector<8x128xf32>
    %211 = vector.extract_strided_slice %208 {offsets = [0, 0], sizes = [8, 128], strides = [1, 1]} : vector<8x384xf32> to vector<8x128xf32>
    %212 = vector.extract_strided_slice %208 {offsets = [0, 128], sizes = [8, 128], strides = [1, 1]} : vector<8x384xf32> to vector<8x128xf32>
    %213 = vector.extract_strided_slice %208 {offsets = [0, 256], sizes = [8, 128], strides = [1, 1]} : vector<8x384xf32> to vector<8x128xf32>
    %214 = arith.mulf %212, %190 : vector<8x128xf32>
    %215 = arith.mulf %211, %210 : vector<8x128xf32>
    %216 = arith.addf %214, %215 : vector<8x128xf32>
    %217 = math.tanh %216 : vector<8x128xf32>
    %218 = arith.mulf %213, %217 : vector<8x128xf32>
    %219 = arith.truncf %218 : vector<8x128xf32> to vector<8x128xbf16>
    %c7_i32 = arith.constant 7 : i32
    %c1_i32_69 = arith.constant 1 : i32
    %220 = arith.addi %c7_i32, %c1_i32_69 : i32
    %c15_i32_70 = arith.constant 15 : i32
    %221 = arith.minsi %220, %c15_i32_70 : i32
    %c0_71 = arith.constant 0 : index
    %c0_72 = arith.constant 0 : index
    %222 = vector.load %arg3[%c0_71, %c0_72] : memref<128x512xbf16, #tpu.memory_space<vmem>>, vector<128x512xbf16>
    %cst_73 = arith.constant dense<0.000000e+00> : vector<8x512xf32>
    %223 = tpu.matmul %219, %222, %cst_73 {dimension_numbers = #tpu.dot_dimension_numbers<[1], [0], [0], [1], [0, 0, 1, 1], [], []>} : vector<8x128xbf16>, vector<128x512xbf16>, vector<8x512xf32> -> vector<8x512xf32>
    %224 = arith.index_cast %221 : i32 to index
    %c0_74 = arith.constant 0 : index
    %c0_75 = arith.constant 0 : index
    %225 = vector.load %arg9[%224, %c0_74, %c0_75] : memref<16x8x512xbf16, #tpu.memory_space<vmem>>, vector<1x8x512xbf16>
    %226 = vector.shape_cast %225 : vector<1x8x512xbf16> to vector<8x512xbf16>
    %227 = arith.extf %226 : vector<8x512xbf16> to vector<8x512xf32>
    %228 = arith.addf %223, %227 : vector<8x512xf32>
    %229 = vector.extract_strided_slice %228 {offsets = [0, 0], sizes = [8, 384], strides = [1, 1]} : vector<8x512xf32> to vector<8x384xf32>
    %230 = arith.negf %229 : vector<8x384xf32>
    %231 = math.exp %230 : vector<8x384xf32>
    %cst_76 = arith.constant 1.000000e+00 : f32
    %232 = vector.broadcast %cst_76 : f32 to vector<8x384xf32>
    %233 = arith.addf %232, %231 : vector<8x384xf32>
    %234 = arith.divf %232, %233 : vector<8x384xf32>
    %235 = vector.extract_strided_slice %228 {offsets = [0, 384], sizes = [8, 128], strides = [1, 1]} : vector<8x512xf32> to vector<8x128xf32>
    %236 = math.tanh %235 : vector<8x128xf32>
    %237 = vector.extract_strided_slice %234 {offsets = [0, 0], sizes = [8, 128], strides = [1, 1]} : vector<8x384xf32> to vector<8x128xf32>
    %238 = vector.extract_strided_slice %234 {offsets = [0, 128], sizes = [8, 128], strides = [1, 1]} : vector<8x384xf32> to vector<8x128xf32>
    %239 = vector.extract_strided_slice %234 {offsets = [0, 256], sizes = [8, 128], strides = [1, 1]} : vector<8x384xf32> to vector<8x128xf32>
    %240 = arith.mulf %238, %216 : vector<8x128xf32>
    %241 = arith.mulf %237, %236 : vector<8x128xf32>
    %242 = arith.addf %240, %241 : vector<8x128xf32>
    %243 = math.tanh %242 : vector<8x128xf32>
    %244 = arith.mulf %239, %243 : vector<8x128xf32>
    %245 = arith.truncf %244 : vector<8x128xf32> to vector<8x128xbf16>
    %c8_i32 = arith.constant 8 : i32
    %c1_i32_77 = arith.constant 1 : i32
    %246 = arith.addi %c8_i32, %c1_i32_77 : i32
    %c15_i32_78 = arith.constant 15 : i32
    %247 = arith.minsi %246, %c15_i32_78 : i32
    %c0_79 = arith.constant 0 : index
    %c0_80 = arith.constant 0 : index
    %248 = vector.load %arg3[%c0_79, %c0_80] : memref<128x512xbf16, #tpu.memory_space<vmem>>, vector<128x512xbf16>
    %cst_81 = arith.constant dense<0.000000e+00> : vector<8x512xf32>
    %249 = tpu.matmul %245, %248, %cst_81 {dimension_numbers = #tpu.dot_dimension_numbers<[1], [0], [0], [1], [0, 0, 1, 1], [], []>} : vector<8x128xbf16>, vector<128x512xbf16>, vector<8x512xf32> -> vector<8x512xf32>
    %250 = arith.index_cast %247 : i32 to index
    %c0_82 = arith.constant 0 : index
    %c0_83 = arith.constant 0 : index
    %251 = vector.load %arg9[%250, %c0_82, %c0_83] : memref<16x8x512xbf16, #tpu.memory_space<vmem>>, vector<1x8x512xbf16>
    %252 = vector.shape_cast %251 : vector<1x8x512xbf16> to vector<8x512xbf16>
    %253 = arith.extf %252 : vector<8x512xbf16> to vector<8x512xf32>
    %254 = arith.addf %249, %253 : vector<8x512xf32>
    %255 = vector.extract_strided_slice %254 {offsets = [0, 0], sizes = [8, 384], strides = [1, 1]} : vector<8x512xf32> to vector<8x384xf32>
    %256 = arith.negf %255 : vector<8x384xf32>
    %257 = math.exp %256 : vector<8x384xf32>
    %cst_84 = arith.constant 1.000000e+00 : f32
    %258 = vector.broadcast %cst_84 : f32 to vector<8x384xf32>
    %259 = arith.addf %258, %257 : vector<8x384xf32>
    %260 = arith.divf %258, %259 : vector<8x384xf32>
    %261 = vector.extract_strided_slice %254 {offsets = [0, 384], sizes = [8, 128], strides = [1, 1]} : vector<8x512xf32> to vector<8x128xf32>
    %262 = math.tanh %261 : vector<8x128xf32>
    %263 = vector.extract_strided_slice %260 {offsets = [0, 0], sizes = [8, 128], strides = [1, 1]} : vector<8x384xf32> to vector<8x128xf32>
    %264 = vector.extract_strided_slice %260 {offsets = [0, 128], sizes = [8, 128], strides = [1, 1]} : vector<8x384xf32> to vector<8x128xf32>
    %265 = vector.extract_strided_slice %260 {offsets = [0, 256], sizes = [8, 128], strides = [1, 1]} : vector<8x384xf32> to vector<8x128xf32>
    %266 = arith.mulf %264, %242 : vector<8x128xf32>
    %267 = arith.mulf %263, %262 : vector<8x128xf32>
    %268 = arith.addf %266, %267 : vector<8x128xf32>
    %269 = math.tanh %268 : vector<8x128xf32>
    %270 = arith.mulf %265, %269 : vector<8x128xf32>
    %271 = arith.truncf %270 : vector<8x128xf32> to vector<8x128xbf16>
    %c9_i32 = arith.constant 9 : i32
    %c1_i32_85 = arith.constant 1 : i32
    %272 = arith.addi %c9_i32, %c1_i32_85 : i32
    %c15_i32_86 = arith.constant 15 : i32
    %273 = arith.minsi %272, %c15_i32_86 : i32
    %c0_87 = arith.constant 0 : index
    %c0_88 = arith.constant 0 : index
    %274 = vector.load %arg3[%c0_87, %c0_88] : memref<128x512xbf16, #tpu.memory_space<vmem>>, vector<128x512xbf16>
    %cst_89 = arith.constant dense<0.000000e+00> : vector<8x512xf32>
    %275 = tpu.matmul %271, %274, %cst_89 {dimension_numbers = #tpu.dot_dimension_numbers<[1], [0], [0], [1], [0, 0, 1, 1], [], []>} : vector<8x128xbf16>, vector<128x512xbf16>, vector<8x512xf32> -> vector<8x512xf32>
    %276 = arith.index_cast %273 : i32 to index
    %c0_90 = arith.constant 0 : index
    %c0_91 = arith.constant 0 : index
    %277 = vector.load %arg9[%276, %c0_90, %c0_91] : memref<16x8x512xbf16, #tpu.memory_space<vmem>>, vector<1x8x512xbf16>
    %278 = vector.shape_cast %277 : vector<1x8x512xbf16> to vector<8x512xbf16>
    %279 = arith.extf %278 : vector<8x512xbf16> to vector<8x512xf32>
    %280 = arith.addf %275, %279 : vector<8x512xf32>
    %281 = vector.extract_strided_slice %280 {offsets = [0, 0], sizes = [8, 384], strides = [1, 1]} : vector<8x512xf32> to vector<8x384xf32>
    %282 = arith.negf %281 : vector<8x384xf32>
    %283 = math.exp %282 : vector<8x384xf32>
    %cst_92 = arith.constant 1.000000e+00 : f32
    %284 = vector.broadcast %cst_92 : f32 to vector<8x384xf32>
    %285 = arith.addf %284, %283 : vector<8x384xf32>
    %286 = arith.divf %284, %285 : vector<8x384xf32>
    %287 = vector.extract_strided_slice %280 {offsets = [0, 384], sizes = [8, 128], strides = [1, 1]} : vector<8x512xf32> to vector<8x128xf32>
    %288 = math.tanh %287 : vector<8x128xf32>
    %289 = vector.extract_strided_slice %286 {offsets = [0, 0], sizes = [8, 128], strides = [1, 1]} : vector<8x384xf32> to vector<8x128xf32>
    %290 = vector.extract_strided_slice %286 {offsets = [0, 128], sizes = [8, 128], strides = [1, 1]} : vector<8x384xf32> to vector<8x128xf32>
    %291 = vector.extract_strided_slice %286 {offsets = [0, 256], sizes = [8, 128], strides = [1, 1]} : vector<8x384xf32> to vector<8x128xf32>
    %292 = arith.mulf %290, %268 : vector<8x128xf32>
    %293 = arith.mulf %289, %288 : vector<8x128xf32>
    %294 = arith.addf %292, %293 : vector<8x128xf32>
    %295 = math.tanh %294 : vector<8x128xf32>
    %296 = arith.mulf %291, %295 : vector<8x128xf32>
    %297 = arith.truncf %296 : vector<8x128xf32> to vector<8x128xbf16>
    %c10_i32 = arith.constant 10 : i32
    %c1_i32_93 = arith.constant 1 : i32
    %298 = arith.addi %c10_i32, %c1_i32_93 : i32
    %c15_i32_94 = arith.constant 15 : i32
    %299 = arith.minsi %298, %c15_i32_94 : i32
    %c0_95 = arith.constant 0 : index
    %c0_96 = arith.constant 0 : index
    %300 = vector.load %arg3[%c0_95, %c0_96] : memref<128x512xbf16, #tpu.memory_space<vmem>>, vector<128x512xbf16>
    %cst_97 = arith.constant dense<0.000000e+00> : vector<8x512xf32>
    %301 = tpu.matmul %297, %300, %cst_97 {dimension_numbers = #tpu.dot_dimension_numbers<[1], [0], [0], [1], [0, 0, 1, 1], [], []>} : vector<8x128xbf16>, vector<128x512xbf16>, vector<8x512xf32> -> vector<8x512xf32>
    %302 = arith.index_cast %299 : i32 to index
    %c0_98 = arith.constant 0 : index
    %c0_99 = arith.constant 0 : index
    %303 = vector.load %arg9[%302, %c0_98, %c0_99] : memref<16x8x512xbf16, #tpu.memory_space<vmem>>, vector<1x8x512xbf16>
    %304 = vector.shape_cast %303 : vector<1x8x512xbf16> to vector<8x512xbf16>
    %305 = arith.extf %304 : vector<8x512xbf16> to vector<8x512xf32>
    %306 = arith.addf %301, %305 : vector<8x512xf32>
    %307 = vector.extract_strided_slice %306 {offsets = [0, 0], sizes = [8, 384], strides = [1, 1]} : vector<8x512xf32> to vector<8x384xf32>
    %308 = arith.negf %307 : vector<8x384xf32>
    %309 = math.exp %308 : vector<8x384xf32>
    %cst_100 = arith.constant 1.000000e+00 : f32
    %310 = vector.broadcast %cst_100 : f32 to vector<8x384xf32>
    %311 = arith.addf %310, %309 : vector<8x384xf32>
    %312 = arith.divf %310, %311 : vector<8x384xf32>
    %313 = vector.extract_strided_slice %306 {offsets = [0, 384], sizes = [8, 128], strides = [1, 1]} : vector<8x512xf32> to vector<8x128xf32>
    %314 = math.tanh %313 : vector<8x128xf32>
    %315 = vector.extract_strided_slice %312 {offsets = [0, 0], sizes = [8, 128], strides = [1, 1]} : vector<8x384xf32> to vector<8x128xf32>
    %316 = vector.extract_strided_slice %312 {offsets = [0, 128], sizes = [8, 128], strides = [1, 1]} : vector<8x384xf32> to vector<8x128xf32>
    %317 = vector.extract_strided_slice %312 {offsets = [0, 256], sizes = [8, 128], strides = [1, 1]} : vector<8x384xf32> to vector<8x128xf32>
    %318 = arith.mulf %316, %294 : vector<8x128xf32>
    %319 = arith.mulf %315, %314 : vector<8x128xf32>
    %320 = arith.addf %318, %319 : vector<8x128xf32>
    %321 = math.tanh %320 : vector<8x128xf32>
    %322 = arith.mulf %317, %321 : vector<8x128xf32>
    %323 = arith.truncf %322 : vector<8x128xf32> to vector<8x128xbf16>
    %c11_i32 = arith.constant 11 : i32
    %c1_i32_101 = arith.constant 1 : i32
    %324 = arith.addi %c11_i32, %c1_i32_101 : i32
    %c15_i32_102 = arith.constant 15 : i32
    %325 = arith.minsi %324, %c15_i32_102 : i32
    %c0_103 = arith.constant 0 : index
    %c0_104 = arith.constant 0 : index
    %326 = vector.load %arg3[%c0_103, %c0_104] : memref<128x512xbf16, #tpu.memory_space<vmem>>, vector<128x512xbf16>
    %cst_105 = arith.constant dense<0.000000e+00> : vector<8x512xf32>
    %327 = tpu.matmul %323, %326, %cst_105 {dimension_numbers = #tpu.dot_dimension_numbers<[1], [0], [0], [1], [0, 0, 1, 1], [], []>} : vector<8x128xbf16>, vector<128x512xbf16>, vector<8x512xf32> -> vector<8x512xf32>
    %328 = arith.index_cast %325 : i32 to index
    %c0_106 = arith.constant 0 : index
    %c0_107 = arith.constant 0 : index
    %329 = vector.load %arg9[%328, %c0_106, %c0_107] : memref<16x8x512xbf16, #tpu.memory_space<vmem>>, vector<1x8x512xbf16>
    %330 = vector.shape_cast %329 : vector<1x8x512xbf16> to vector<8x512xbf16>
    %331 = arith.extf %330 : vector<8x512xbf16> to vector<8x512xf32>
    %332 = arith.addf %327, %331 : vector<8x512xf32>
    %333 = vector.extract_strided_slice %332 {offsets = [0, 0], sizes = [8, 384], strides = [1, 1]} : vector<8x512xf32> to vector<8x384xf32>
    %334 = arith.negf %333 : vector<8x384xf32>
    %335 = math.exp %334 : vector<8x384xf32>
    %cst_108 = arith.constant 1.000000e+00 : f32
    %336 = vector.broadcast %cst_108 : f32 to vector<8x384xf32>
    %337 = arith.addf %336, %335 : vector<8x384xf32>
    %338 = arith.divf %336, %337 : vector<8x384xf32>
    %339 = vector.extract_strided_slice %332 {offsets = [0, 384], sizes = [8, 128], strides = [1, 1]} : vector<8x512xf32> to vector<8x128xf32>
    %340 = math.tanh %339 : vector<8x128xf32>
    %341 = vector.extract_strided_slice %338 {offsets = [0, 0], sizes = [8, 128], strides = [1, 1]} : vector<8x384xf32> to vector<8x128xf32>
    %342 = vector.extract_strided_slice %338 {offsets = [0, 128], sizes = [8, 128], strides = [1, 1]} : vector<8x384xf32> to vector<8x128xf32>
    %343 = vector.extract_strided_slice %338 {offsets = [0, 256], sizes = [8, 128], strides = [1, 1]} : vector<8x384xf32> to vector<8x128xf32>
    %344 = arith.mulf %342, %320 : vector<8x128xf32>
    %345 = arith.mulf %341, %340 : vector<8x128xf32>
    %346 = arith.addf %344, %345 : vector<8x128xf32>
    %347 = math.tanh %346 : vector<8x128xf32>
    %348 = arith.mulf %343, %347 : vector<8x128xf32>
    %349 = arith.truncf %348 : vector<8x128xf32> to vector<8x128xbf16>
    %c12_i32 = arith.constant 12 : i32
    %c1_i32_109 = arith.constant 1 : i32
    %350 = arith.addi %c12_i32, %c1_i32_109 : i32
    %c15_i32_110 = arith.constant 15 : i32
    %351 = arith.minsi %350, %c15_i32_110 : i32
    %c0_111 = arith.constant 0 : index
    %c0_112 = arith.constant 0 : index
    %352 = vector.load %arg3[%c0_111, %c0_112] : memref<128x512xbf16, #tpu.memory_space<vmem>>, vector<128x512xbf16>
    %cst_113 = arith.constant dense<0.000000e+00> : vector<8x512xf32>
    %353 = tpu.matmul %349, %352, %cst_113 {dimension_numbers = #tpu.dot_dimension_numbers<[1], [0], [0], [1], [0, 0, 1, 1], [], []>} : vector<8x128xbf16>, vector<128x512xbf16>, vector<8x512xf32> -> vector<8x512xf32>
    %354 = arith.index_cast %351 : i32 to index
    %c0_114 = arith.constant 0 : index
    %c0_115 = arith.constant 0 : index
    %355 = vector.load %arg9[%354, %c0_114, %c0_115] : memref<16x8x512xbf16, #tpu.memory_space<vmem>>, vector<1x8x512xbf16>
    %356 = vector.shape_cast %355 : vector<1x8x512xbf16> to vector<8x512xbf16>
    %357 = arith.extf %356 : vector<8x512xbf16> to vector<8x512xf32>
    %358 = arith.addf %353, %357 : vector<8x512xf32>
    %359 = vector.extract_strided_slice %358 {offsets = [0, 0], sizes = [8, 384], strides = [1, 1]} : vector<8x512xf32> to vector<8x384xf32>
    %360 = arith.negf %359 : vector<8x384xf32>
    %361 = math.exp %360 : vector<8x384xf32>
    %cst_116 = arith.constant 1.000000e+00 : f32
    %362 = vector.broadcast %cst_116 : f32 to vector<8x384xf32>
    %363 = arith.addf %362, %361 : vector<8x384xf32>
    %364 = arith.divf %362, %363 : vector<8x384xf32>
    %365 = vector.extract_strided_slice %358 {offsets = [0, 384], sizes = [8, 128], strides = [1, 1]} : vector<8x512xf32> to vector<8x128xf32>
    %366 = math.tanh %365 : vector<8x128xf32>
    %367 = vector.extract_strided_slice %364 {offsets = [0, 0], sizes = [8, 128], strides = [1, 1]} : vector<8x384xf32> to vector<8x128xf32>
    %368 = vector.extract_strided_slice %364 {offsets = [0, 128], sizes = [8, 128], strides = [1, 1]} : vector<8x384xf32> to vector<8x128xf32>
    %369 = vector.extract_strided_slice %364 {offsets = [0, 256], sizes = [8, 128], strides = [1, 1]} : vector<8x384xf32> to vector<8x128xf32>
    %370 = arith.mulf %368, %346 : vector<8x128xf32>
    %371 = arith.mulf %367, %366 : vector<8x128xf32>
    %372 = arith.addf %370, %371 : vector<8x128xf32>
    %373 = math.tanh %372 : vector<8x128xf32>
    %374 = arith.mulf %369, %373 : vector<8x128xf32>
    %375 = arith.truncf %374 : vector<8x128xf32> to vector<8x128xbf16>
    %c13_i32 = arith.constant 13 : i32
    %c1_i32_117 = arith.constant 1 : i32
    %376 = arith.addi %c13_i32, %c1_i32_117 : i32
    %c15_i32_118 = arith.constant 15 : i32
    %377 = arith.minsi %376, %c15_i32_118 : i32
    %c0_119 = arith.constant 0 : index
    %c0_120 = arith.constant 0 : index
    %378 = vector.load %arg3[%c0_119, %c0_120] : memref<128x512xbf16, #tpu.memory_space<vmem>>, vector<128x512xbf16>
    %cst_121 = arith.constant dense<0.000000e+00> : vector<8x512xf32>
    %379 = tpu.matmul %375, %378, %cst_121 {dimension_numbers = #tpu.dot_dimension_numbers<[1], [0], [0], [1], [0, 0, 1, 1], [], []>} : vector<8x128xbf16>, vector<128x512xbf16>, vector<8x512xf32> -> vector<8x512xf32>
    %380 = arith.index_cast %377 : i32 to index
    %c0_122 = arith.constant 0 : index
    %c0_123 = arith.constant 0 : index
    %381 = vector.load %arg9[%380, %c0_122, %c0_123] : memref<16x8x512xbf16, #tpu.memory_space<vmem>>, vector<1x8x512xbf16>
    %382 = vector.shape_cast %381 : vector<1x8x512xbf16> to vector<8x512xbf16>
    %383 = arith.extf %382 : vector<8x512xbf16> to vector<8x512xf32>
    %384 = arith.addf %379, %383 : vector<8x512xf32>
    %385 = vector.extract_strided_slice %384 {offsets = [0, 0], sizes = [8, 384], strides = [1, 1]} : vector<8x512xf32> to vector<8x384xf32>
    %386 = arith.negf %385 : vector<8x384xf32>
    %387 = math.exp %386 : vector<8x384xf32>
    %cst_124 = arith.constant 1.000000e+00 : f32
    %388 = vector.broadcast %cst_124 : f32 to vector<8x384xf32>
    %389 = arith.addf %388, %387 : vector<8x384xf32>
    %390 = arith.divf %388, %389 : vector<8x384xf32>
    %391 = vector.extract_strided_slice %384 {offsets = [0, 384], sizes = [8, 128], strides = [1, 1]} : vector<8x512xf32> to vector<8x128xf32>
    %392 = math.tanh %391 : vector<8x128xf32>
    %393 = vector.extract_strided_slice %390 {offsets = [0, 0], sizes = [8, 128], strides = [1, 1]} : vector<8x384xf32> to vector<8x128xf32>
    %394 = vector.extract_strided_slice %390 {offsets = [0, 128], sizes = [8, 128], strides = [1, 1]} : vector<8x384xf32> to vector<8x128xf32>
    %395 = vector.extract_strided_slice %390 {offsets = [0, 256], sizes = [8, 128], strides = [1, 1]} : vector<8x384xf32> to vector<8x128xf32>
    %396 = arith.mulf %394, %372 : vector<8x128xf32>
    %397 = arith.mulf %393, %392 : vector<8x128xf32>
    %398 = arith.addf %396, %397 : vector<8x128xf32>
    %399 = math.tanh %398 : vector<8x128xf32>
    %400 = arith.mulf %395, %399 : vector<8x128xf32>
    %401 = arith.truncf %400 : vector<8x128xf32> to vector<8x128xbf16>
    %c14_i32 = arith.constant 14 : i32
    %c1_i32_125 = arith.constant 1 : i32
    %402 = arith.addi %c14_i32, %c1_i32_125 : i32
    %c15_i32_126 = arith.constant 15 : i32
    %403 = arith.minsi %402, %c15_i32_126 : i32
    %c0_127 = arith.constant 0 : index
    %c0_128 = arith.constant 0 : index
    %404 = vector.load %arg3[%c0_127, %c0_128] : memref<128x512xbf16, #tpu.memory_space<vmem>>, vector<128x512xbf16>
    %cst_129 = arith.constant dense<0.000000e+00> : vector<8x512xf32>
    %405 = tpu.matmul %401, %404, %cst_129 {dimension_numbers = #tpu.dot_dimension_numbers<[1], [0], [0], [1], [0, 0, 1, 1], [], []>} : vector<8x128xbf16>, vector<128x512xbf16>, vector<8x512xf32> -> vector<8x512xf32>
    %406 = arith.index_cast %403 : i32 to index
    %c0_130 = arith.constant 0 : index
    %c0_131 = arith.constant 0 : index
    %407 = vector.load %arg9[%406, %c0_130, %c0_131] : memref<16x8x512xbf16, #tpu.memory_space<vmem>>, vector<1x8x512xbf16>
    %408 = vector.shape_cast %407 : vector<1x8x512xbf16> to vector<8x512xbf16>
    %409 = arith.extf %408 : vector<8x512xbf16> to vector<8x512xf32>
    %410 = arith.addf %405, %409 : vector<8x512xf32>
    %411 = vector.extract_strided_slice %410 {offsets = [0, 0], sizes = [8, 384], strides = [1, 1]} : vector<8x512xf32> to vector<8x384xf32>
    %412 = arith.negf %411 : vector<8x384xf32>
    %413 = math.exp %412 : vector<8x384xf32>
    %cst_132 = arith.constant 1.000000e+00 : f32
    %414 = vector.broadcast %cst_132 : f32 to vector<8x384xf32>
    %415 = arith.addf %414, %413 : vector<8x384xf32>
    %416 = arith.divf %414, %415 : vector<8x384xf32>
    %417 = vector.extract_strided_slice %410 {offsets = [0, 384], sizes = [8, 128], strides = [1, 1]} : vector<8x512xf32> to vector<8x128xf32>
    %418 = math.tanh %417 : vector<8x128xf32>
    %419 = vector.extract_strided_slice %416 {offsets = [0, 0], sizes = [8, 128], strides = [1, 1]} : vector<8x384xf32> to vector<8x128xf32>
    %420 = vector.extract_strided_slice %416 {offsets = [0, 128], sizes = [8, 128], strides = [1, 1]} : vector<8x384xf32> to vector<8x128xf32>
    %421 = vector.extract_strided_slice %416 {offsets = [0, 256], sizes = [8, 128], strides = [1, 1]} : vector<8x384xf32> to vector<8x128xf32>
    %422 = arith.mulf %420, %398 : vector<8x128xf32>
    %423 = arith.mulf %419, %418 : vector<8x128xf32>
    %424 = arith.addf %422, %423 : vector<8x128xf32>
    %425 = math.tanh %424 : vector<8x128xf32>
    %426 = arith.mulf %421, %425 : vector<8x128xf32>
    %427 = arith.truncf %426 : vector<8x128xf32> to vector<8x128xbf16>
    %c15_i32_133 = arith.constant 15 : i32
    %c1_i32_134 = arith.constant 1 : i32
    %428 = arith.addi %c15_i32_133, %c1_i32_134 : i32
    %c15_i32_135 = arith.constant 15 : i32
    %429 = arith.minsi %428, %c15_i32_135 : i32
    %c0_136 = arith.constant 0 : index
    %c0_137 = arith.constant 0 : index
    %430 = vector.load %arg3[%c0_136, %c0_137] : memref<128x512xbf16, #tpu.memory_space<vmem>>, vector<128x512xbf16>
    %cst_138 = arith.constant dense<0.000000e+00> : vector<8x512xf32>
    %431 = tpu.matmul %427, %430, %cst_138 {dimension_numbers = #tpu.dot_dimension_numbers<[1], [0], [0], [1], [0, 0, 1, 1], [], []>} : vector<8x128xbf16>, vector<128x512xbf16>, vector<8x512xf32> -> vector<8x512xf32>
    %432 = arith.index_cast %429 : i32 to index
    %c0_139 = arith.constant 0 : index
    %c0_140 = arith.constant 0 : index
    %433 = vector.load %arg9[%432, %c0_139, %c0_140] : memref<16x8x512xbf16, #tpu.memory_space<vmem>>, vector<1x8x512xbf16>
    %434 = vector.shape_cast %433 : vector<1x8x512xbf16> to vector<8x512xbf16>
    %435 = arith.extf %434 : vector<8x512xbf16> to vector<8x512xf32>
    %436 = arith.addf %431, %435 : vector<8x512xf32>
    %437 = vector.extract_strided_slice %436 {offsets = [0, 0], sizes = [8, 384], strides = [1, 1]} : vector<8x512xf32> to vector<8x384xf32>
    %438 = arith.negf %437 : vector<8x384xf32>
    %439 = math.exp %438 : vector<8x384xf32>
    %cst_141 = arith.constant 1.000000e+00 : f32
    %440 = vector.broadcast %cst_141 : f32 to vector<8x384xf32>
    %441 = arith.addf %440, %439 : vector<8x384xf32>
    %442 = arith.divf %440, %441 : vector<8x384xf32>
    %443 = vector.extract_strided_slice %436 {offsets = [0, 384], sizes = [8, 128], strides = [1, 1]} : vector<8x512xf32> to vector<8x128xf32>
    %444 = math.tanh %443 : vector<8x128xf32>
    %445 = vector.extract_strided_slice %442 {offsets = [0, 0], sizes = [8, 128], strides = [1, 1]} : vector<8x384xf32> to vector<8x128xf32>
    %446 = vector.extract_strided_slice %442 {offsets = [0, 128], sizes = [8, 128], strides = [1, 1]} : vector<8x384xf32> to vector<8x128xf32>
    %447 = vector.extract_strided_slice %442 {offsets = [0, 256], sizes = [8, 128], strides = [1, 1]} : vector<8x384xf32> to vector<8x128xf32>
    %448 = arith.mulf %446, %424 : vector<8x128xf32>
    %449 = arith.mulf %445, %444 : vector<8x128xf32>
    %450 = arith.addf %448, %449 : vector<8x128xf32>
    %451 = math.tanh %450 : vector<8x128xf32>
    %452 = arith.mulf %447, %451 : vector<8x128xf32>
    %453 = arith.truncf %452 : vector<8x128xf32> to vector<8x128xbf16>
    %c16_i32 = arith.constant 16 : i32
    %454 = vector.extract_strided_slice %453 {offsets = [0, 64], sizes = [8, 64], strides = [1, 1]} : vector<8x128xbf16> to vector<8x64xbf16>
    %455 = arith.extf %454 : vector<8x64xbf16> to vector<8x64xf32>
    %c0_142 = arith.constant 0 : index
    %c0_143 = arith.constant 0 : index
    %456 = vector.load %arg4[%c0_142, %c0_143] : memref<64x32xf32, #tpu.memory_space<vmem>>, vector<64x32xf32>
    %cst_144 = arith.constant dense<0.000000e+00> : vector<8x32xf32>
    %457 = tpu.matmul %455, %456, %cst_144 {dimension_numbers = #tpu.dot_dimension_numbers<[1], [0], [0], [1], [0, 0, 1, 1], [], []>} : vector<8x64xf32>, vector<64x32xf32>, vector<8x32xf32> -> vector<8x32xf32>
    %c0_145 = arith.constant 0 : index
    %c0_146 = arith.constant 0 : index
    %458 = vector.load %arg5[%c0_145, %c0_146] : memref<1x32xf32, #tpu.memory_space<vmem>>, vector<1x32xf32>
    %459 = vector.broadcast %458 : vector<1x32xf32> to vector<8x32xf32>
    %460 = arith.addf %457, %459 : vector<8x32xf32>
    %cst_147 = arith.constant 0.000000e+00 : f32
    %461 = vector.broadcast %cst_147 : f32 to vector<8x32xf32>
    %462 = arith.maximumf %460, %461 : vector<8x32xf32>
    %c0_148 = arith.constant 0 : index
    %c0_149 = arith.constant 0 : index
    %463 = vector.load %arg6[%c0_148, %c0_149] : memref<32x1xf32, #tpu.memory_space<vmem>>, vector<32x1xf32>
    %cst_150 = arith.constant dense<0.000000e+00> : vector<8x1xf32>
    %464 = tpu.matmul %462, %463, %cst_150 {dimension_numbers = #tpu.dot_dimension_numbers<[1], [0], [0], [1], [0, 0, 1, 1], [], []>} : vector<8x32xf32>, vector<32x1xf32>, vector<8x1xf32> -> vector<8x1xf32>
    %c0_151 = arith.constant 0 : index
    %c0_152 = arith.constant 0 : index
    %465 = vector.load %arg7[%c0_151, %c0_152] : memref<1x1xf32, #tpu.memory_space<vmem>>, vector<1x1xf32>
    %466 = vector.broadcast %465 : vector<1x1xf32> to vector<8x1xf32>
    %467 = arith.addf %464, %466 : vector<8x1xf32>
    %c0_153 = arith.constant 0 : index
    %c0_154 = arith.constant 0 : index
    %468 = vector.load %arg8[%c0_153, %c0_154] : memref<8x1xf32, #tpu.memory_space<vmem>>, vector<8x1xf32>
    tpu.vector_store %arg8[%c0_153, %c0_154], %467 {strides = array<i32>} : memref<8x1xf32, #tpu.memory_space<vmem>>, vector<8x1xf32>,
    return
  }
}

</mosaic_0001>

<bundles_post_ra>
// kernel: tpu_custom_call.1
= control target key start
LH: loop header
LB: loop body
LE: loop exit
PB: predicated region body
PF: predicated region fallthrough
CT: control target
= control target key end

     0   :  { %s4161_s0 = inlined_call_operand.vmem [shape: f32[16,8,1], index: 0, kind: input, shape index: {}]   ;;  %s4162_s1 = inlined_call_operand.vmem [shape: f32[1,512], index: 1, kind: input, shape index: {}]   ;;  %s4163_s2 = inlined_call_operand.vmem [shape: f32[1,512], index: 2, kind: input, shape index: {}]   ;;  %s4164_s3 = inlined_call_operand.hbm [shape: bf16[128,512], index: 3, kind: input, shape index: {}]   ;;  %s4165_s4 = inlined_call_operand.vmem [shape: f32[64,32], index: 4, kind: input, shape index: {}]   ;;  %s4166_s5 = inlined_call_operand.vmem [shape: f32[1,32], index: 5, kind: input, shape index: {}]   ;;  %s4167_s6 = inlined_call_operand.vmem [shape: f32[32,1], index: 6, kind: input, shape index: {}]   ;;  %s4168_s7 = inlined_call_operand.<no memory space> [shape: f32[1,1], index: 7, kind: input, shape index: {}]   ;;  %s4169_s8 = inlined_call_operand.vmem [shape: f32[8,1], index: 8, kind: output, shape index: {}]  }
   0x1   :  { %v13_v0 = vstv %s4168_s7 }
   0x2   :  { %14 = vst [vmem:[#allocation3] sm:$0x1] %v13_v0 }
   0x3   :  { %15 = vsyncpa [#allocation5], 0  ;;  %s26_s9 = sshll.u32 %s4164_s3, 4  ;;  %s3182_s10 = smov [#allocation4]   ;;  %s27_s9 = int_to_ptr.hbm [resolvable:$true] %s26_s9 }
   0x4   :  { %s28_s11 = sshll.u32 %s3182_s10, 4  ;;  %s3183_s12 = smov 256   ;;  %s29_s11 = int_to_ptr.vmem [resolvable:$true] %s28_s11 }
   0x5   :  { %s3184_s13 = smov 16  }
   0x6   :  { %34 = dma.hbm_to_vmem [thread:$0]  %s27_s9, 4096, %s29_s11, [#allocation5], %s3183_s12, %s3183_s12, %s3184_s13  }
   0x7   :  { %3180 = dma.done.wait [#allocation5], 4096  }
   0x8   :  { %3181 = vsyncadd [#allocation5], 4294963200  ;;  %v3185_v1 = vmov 0   ;;  %v47_v2 = vld [vmem:[%s4161_s0] sm:$0xff]  ;;  %v48_v3 = vld [vmem:[%s4161_s0 + $0x8] sm:$0xff] }
   0x9   :  { %2879 = vset.pattern.permute.xlu0 %v3185_v1  ;;  %2880 = vset.pattern.permute.xlu1 %v3185_v1  ;;  %v53_v4 = vld [vmem:[%s4161_s0 + $0x30] sm:$0xff]  ;;  %v56_v5 = vld [vmem:[%s4161_s0 + $0x48] sm:$0xff]  ;;  %v59_v6 = vld [vmem:[%s4161_s0 + $0x60] sm:$0xff] }
   0xa   :  { %2881 = vset.pattern.permute.xlu2 %v3185_v1  ;;  %66 = vperm.xlu0 %2879, %v47_v2   ;;  %v62_v7 = vld [vmem:[%s4161_s0 + $0x78] sm:$0xff]  ;;  %v63_v8 = vld [vmem:[%s4162_s1] sm:$0xf]  ;;  %v2872_v10 = vld [vmem:[#allocation4 + $0xec] sm:$0xf0] }
   0xb   :  { %v2778_v9 = vld [vmem:[#allocation4 + $0xe0] sm:$0xf]  ;;  %v2870_v11 = vld [vmem:[#allocation4 + $0xe4] sm:$0xf]  ;;  %v2780_v13 = vld [vmem:[#allocation4 + $0xf0] sm:$0xf0] }
   0xc   :  { %v3259_v12 = vor.u32 %v2872_v10, %v2778_v9  ;;  %v2786_v14 = vld [vmem:[#allocation4 + $0xe8] sm:$0xf]  ;;  %v2873_v15 = vld [vmem:[#allocation4 + $0xf4] sm:$0xf0]  ;;  %v3261_v16 = vor.u32 %v2870_v11, %v2780_v13  ;;  %v2871_v18 = vld [vmem:[#allocation4 + $0xec] sm:$0xf] }
   0xd   :  { %v3263_v17 = vor.u32 %v2873_v15, %v2786_v14  ;;  %v2788_v19 = vld [vmem:[#allocation4 + $0xf8] sm:$0xf0]  ;;  %v3265_v20 = vperm.slane %v63_v8, 0  ;;  %v2762_v23 = vld [vmem:[#allocation4 + $0xc0] sm:$0xf]  ;;  %v3278_v30 = vperm.slane %v63_v8, 1 }
   0xe   :  { %v217_v21 = vld [vmem:[%s4163_s2] sm:$0xf]  ;;  %628 = vmatpush.bf16.msra.mxu0 %v3259_v12  ;;  %v3271_v22 = vor.u32 %v2871_v18, %v2788_v19  ;;  %641 = vmatpush.bf16.msra.mxu1 %v3261_v16  ;;  %v2868_v24 = vld [vmem:[#allocation4 + $0xcc] sm:$0xf0]  ;;  %v2866_v25 = vld [vmem:[#allocation4 + $0xc4] sm:$0xf] }
   0xf   :  { %654 = vmatpush.bf16.msra.mxu2 %v3263_v17  ;;  %v3276_v26 = vor.u32 %v2868_v24, %v2762_v23  ;;  %v2764_v27 = vld [vmem:[#allocation4 + $0xd0] sm:$0xf0]  ;;  %v2770_v28 = vld [vmem:[#allocation4 + $0xc8] sm:$0xf]  ;;  %v2869_v29 = vld [vmem:[#allocation4 + $0xd4] sm:$0xf0] }
  0x10   :  { %667 = vmatpush.bf16.msra.mxu3 %v3271_v22  ;;  %v3280_v31 = vperm.slane %v63_v8, 2  ;;  %v3282_v32 = vor.u32 %v2866_v25, %v2764_v27  ;;  %v3284_v33 = vor.u32 %v2869_v29, %v2770_v28  ;;  %v2867_v34 = vld [vmem:[#allocation4 + $0xcc] sm:$0xf]  ;;  %v2772_v35 = vld [vmem:[#allocation4 + $0xd8] sm:$0xf0]  ;;  %v3286_v36 = vperm.slane %v63_v8, 3 }
  0x11   :  { %v3288_v37 = vperm.slane %v217_v21, 0  ;;  %v3290_v38 = vperm.slane %v217_v21, 1  ;;  %v3293_v39 = vor.u32 %v2867_v34, %v2772_v35  ;;  %v2746_v40 = vld [vmem:[#allocation4 + $0xa0] sm:$0xf]  ;;  %v2864_v41 = vld [vmem:[#allocation4 + $0xac] sm:$0xf0] }
  0x12   :  { %71 = vperm.xlu0 %2879, %v48_v3   ;;  %629 = vmatpush.bf16.msra.mxu0 %v3276_v26  ;;  %v2862_v42 = vld [vmem:[#allocation4 + $0xa4] sm:$0xf]  ;;  %v3298_v43 = vor.u32 %v2864_v41, %v2746_v40  ;;  %v2748_v44 = vld [vmem:[#allocation4 + $0xb0] sm:$0xf0]  ;;  %v2754_v45 = vld [vmem:[#allocation4 + $0xa8] sm:$0xf] }
  0x13   :  { %642 = vmatpush.bf16.msra.mxu1 %v3282_v32  ;;  %655 = vmatpush.bf16.msra.mxu2 %v3284_v33  ;;  %v2865_v46 = vld [vmem:[#allocation4 + $0xb4] sm:$0xf0]  ;;  %v3300_v47 = vperm.slane %v217_v21, 2  ;;  %v3302_v48 = vperm.slane %v217_v21, 3  ;;  %v3304_v49 = vor.u32 %v2862_v42, %v2748_v44  ;;  %v2863_v51 = vld [vmem:[#allocation4 + $0xac] sm:$0xf] }
  0x14   :  { %668 = vmatpush.bf16.msra.mxu3 %v3293_v39  ;;  %v3306_v50 = vor.u32 %v2865_v46, %v2754_v45  ;;  %v2756_v52 = vld [vmem:[#allocation4 + $0xb8] sm:$0xf0]  ;;  %v2730_v59 = vld [vmem:[#allocation4 + $0x80] sm:$0xf]  ;;  %v2860_v60 = vld [vmem:[#allocation4 + $0x8c] sm:$0xf0] }
  0x15   :  { %4175 = vst [vmem:[#allocation7_spill] sm:$0xff] %v3300_v47  ;;  %v3309_v54 = vor.u32 %v2863_v51, %v2756_v52  ;;  %v2858_v61 = vld [vmem:[#allocation4 + $0x84] sm:$0xf]  ;;  %v3318_v62 = vor.u32 %v2860_v60, %v2730_v59  ;;  %v2732_v63 = vld [vmem:[#allocation4 + $0x90] sm:$0xf0] }
  0x16   :  { %4176 = vst [vmem:[#allocation8_spill] sm:$0xff] %v3302_v48  ;;  %630 = vmatpush.bf16.msra.mxu0 %v3298_v43  ;;  %v2738_v0 = vld [vmem:[#allocation4 + $0x88] sm:$0xf]  ;;  %v2861_v1 = vld [vmem:[#allocation4 + $0x94] sm:$0xf0]  ;;  %v3325_v8 = vor.u32 %v2858_v61, %v2732_v63 }
  0x17   :  { %643 = vmatpush.bf16.msra.mxu1 %v3304_v49  ;;  %656 = vmatpush.bf16.msra.mxu2 %v3306_v50  ;;  %v3327_v9 = vor.u32 %v2861_v1, %v2738_v0  ;;  %v2714_v14 = vld [vmem:[#allocation4 + $0x60] sm:$0xf]  ;;  %v2856_v15 = vld [vmem:[#allocation4 + $0x6c] sm:$0xf0]  ;;  %v2854_v18 = vld [vmem:[#allocation4 + $0x64] sm:$0xf] }
  0x18   :  { %669 = vmatpush.bf16.msra.mxu3 %v3309_v54  ;;  %v3335_v19 = vor.u32 %v2856_v15, %v2714_v14  ;;  %v2716_v21 = vld [vmem:[#allocation4 + $0x70] sm:$0xf0]  ;;  %v2722_v23 = vld [vmem:[#allocation4 + $0x68] sm:$0xf]  ;;  %v2857_v24 = vld [vmem:[#allocation4 + $0x74] sm:$0xf0] }
  0x19   :  { %v2855_v29 = vld [vmem:[#allocation4 + $0x6c] sm:$0xf]  ;;  %v2724_v34 = vld [vmem:[#allocation4 + $0x78] sm:$0xf0]  ;;  %v3340_v35 = vor.u32 %v2854_v18, %v2716_v21  ;;  %v3342_v40 = vor.u32 %v2857_v24, %v2722_v23  ;;  %v2698_v46 = vld [vmem:[#allocation4 + $0x40] sm:$0xf] }
  0x1a   :  { %96 = vperm.xlu0 %2879, %v53_v4   ;;  %631 = vmatpush.bf16.msra.mxu0 %v3318_v62  ;;  %v3344_v41 = vor.u32 %v2855_v29, %v2724_v34  ;;  %v2852_v51 = vld [vmem:[#allocation4 + $0x4c] sm:$0xf0]  ;;  %v2850_v52 = vld [vmem:[#allocation4 + $0x44] sm:$0xf]  ;;  %v2851_v60 = vld [vmem:[#allocation4 + $0x4c] sm:$0xf] }
  0x1b   :  { %644 = vmatpush.bf16.msra.mxu1 %v3325_v8  ;;  %657 = vmatpush.bf16.msra.mxu2 %v3327_v9  ;;  %v2708_v61 = vld [vmem:[#allocation4 + $0x58] sm:$0xf0]  ;;  %v2682_v63 = vld [vmem:[#allocation4 + $0x20] sm:$0xf]  ;;  %v2848_v1 = vld [vmem:[#allocation4 + $0x2c] sm:$0xf0] }
  0x1c   :  { %v3356_v0 = vor.u32 %v2851_v60, %v2708_v61  ;;  %v2692_v15 = vld [vmem:[#allocation4 + $0x38] sm:$0xf0]  ;;  %v2666_v18 = vld [vmem:[#allocation4] sm:$0xf]  ;;  %v2844_v21 = vld [vmem:[#allocation4 + $0xc] sm:$0xf0] }
  0x1d   :  { %v2842_v24 = vld [vmem:[#allocation4 + $0x4] sm:$0xf]  ;;  %v3370_v29 = vor.u32 %v2844_v21, %v2666_v18  ;;  %v2845_v34 = vld [vmem:[#allocation4 + $0x14] sm:$0xf0] }
  0x1e   :  { %632 = vmatpush.bf16.msra.mxu0 %v3335_v19 }
  0x1f   :  { %645 = vmatpush.bf16.msra.mxu1 %v3340_v35  ;;  %658 = vmatpush.bf16.msra.mxu2 %v3342_v40 }
  0x22   :  { %111 = vperm.xlu0 %2879, %v56_v5  }
  0x2a   :  { %126 = vperm.xlu0 %2879, %v59_v6   ;;  %v2859_v6 = vld [vmem:[#allocation4 + $0x8c] sm:$0xf] }
  0x32   :  { %141 = vperm.xlu0 %2879, %v62_v7   ;;  %v2740_v7 = vld [vmem:[#allocation4 + $0x98] sm:$0xf0] }
  0x33   :  { %v3329_v10 = vor.u32 %v2859_v6, %v2740_v7  ;;  %v2690_v6 = vld [vmem:[#allocation4 + $0x28] sm:$0xf]  ;;  %v2849_v7 = vld [vmem:[#allocation4 + $0x34] sm:$0xf0] }
  0x34   :  { %v3365_v14 = vor.u32 %v2849_v7, %v2690_v6 }
  0x35   :  { %670 = vmatpush.bf16.msra.mxu3 %v3329_v10 }
  0x39   :  { %671 = vmatpush.bf16.msra.mxu3 %v3344_v41 }
  0x3d   :  { %672 = vmatpush.bf16.msra.mxu3 %v3356_v0 }
  0x7c   :  { %v67_v53 = vpop.permute.xlu0 %66 }
  0x7d   :  { %v153_v55 = vmul.f32 %v3265_v20, %v67_v53  ;;  %v154_v56 = vmul.f32 %v3278_v30, %v67_v53  ;;  %v155_v57 = vmul.f32 %v3280_v31, %v67_v53  ;;  %v156_v58 = vmul.f32 %v3286_v36, %v67_v53 }
  0x7e   :  { %v3349_v53 = vor.u32 %v2852_v51, %v2698_v46 }
  0x7f   :  { %v227_v2 = vadd.f32 %v3288_v37, %v153_v55  ;;  %v228_v3 = vadd.f32 %v3290_v38, %v154_v56  ;;  %v229_v4 = vadd.f32 %v3300_v47, %v155_v57  ;;  %v230_v5 = vadd.f32 %v3302_v48, %v156_v58  ;;  %v2700_v55 = vld [vmem:[#allocation4 + $0x50] sm:$0xf0]  ;;  %v2706_v56 = vld [vmem:[#allocation4 + $0x48] sm:$0xf]  ;;  %v2853_v57 = vld [vmem:[#allocation4 + $0x54] sm:$0xf0] }
  0x80   :  { %v3351_v58 = vor.u32 %v2850_v52, %v2700_v55  ;;  %v3353_v59 = vor.u32 %v2853_v57, %v2706_v56  ;;  %633 = vmatpush.bf16.msra.mxu0 %v3349_v53 }
  0x81   :  { %v291_v11 = vpack.c.bf16 %v228_v3, %v227_v2  ;;  %v3331_v13 = vpack.c.bf16 %v230_v5, %v229_v4  ;;  %v2846_v2 = vld [vmem:[#allocation4 + $0x24] sm:$0xf]  ;;  %v2684_v3 = vld [vmem:[#allocation4 + $0x30] sm:$0xf0]  ;;  %v3359_v4 = vor.u32 %v2848_v1, %v2682_v63 }
  0x82   :  { %646 = vmatpush.bf16.msra.mxu1 %v3351_v58  ;;  %v3361_v5 = vor.u32 %v2846_v2, %v2684_v3  ;;  %659 = vmatpush.bf16.msra.mxu2 %v3353_v59 }
  0x83   :  { %v359_v25 = vunpack.c.l.bf16 %v291_v11  ;;  %v360_v27 = vunpack.c.h.bf16 %v291_v11  ;;  %v361_v28 = vunpack.c.l.bf16 %v3331_v13  ;;  %v2847_v11 = vld [vmem:[#allocation4 + $0x2c] sm:$0xf]  ;;  %v362_v63 = vunpack.c.h.bf16 %v3331_v13 }
  0x84   :  { %v3367_v23 = vor.u32 %v2847_v11, %v2692_v15  ;;  %634 = vmatpush.bf16.msra.mxu0 %v3359_v4  ;;  %v355_v11 = vlaneseq }
  0x85   :  { %v2661_v42 = vmul.f32 -1.442695, %v359_v25  ;;  %v2662_v44 = vmul.f32 -1.442695, %v360_v27  ;;  %v2663_v45 = vmul.f32 -1.442695, %v361_v28 }
  0x86   :  { %v2668_v25 = vld [vmem:[#allocation4 + $0x10] sm:$0xf0]  ;;  %v2674_v27 = vld [vmem:[#allocation4 + $0x8] sm:$0xf]  ;;  %647 = vmatpush.bf16.msra.mxu1 %v3361_v5  ;;  %660 = vmatpush.bf16.msra.mxu2 %v3365_v14 }
  0x87   :  { %2884 = vpow2.f32 %v2661_v42  ;;  %v2843_v42 = vld [vmem:[#allocation4 + $0xc] sm:$0xf]  ;;  %v3373_v51 = vor.u32 %v2842_v24, %v2668_v25  ;;  %673 = vmatpush.bf16.msra.mxu3 %v3367_v23  ;;  %v3377_v56 = vor.u32 %v2845_v34, %v2674_v27 }
  0x88   :  { %2886 = vpow2.f32 %v2662_v44  ;;  %v2676_v44 = vld [vmem:[#allocation4 + $0x18] sm:$0xf0]  ;;  %635 = vmatpush.bf16.msra.mxu0 %v3370_v29 }
  0x89   :  { %2888 = vpow2.f32 %v2663_v45  ;;  %v3379_v57 = vor.u32 %v2843_v42, %v2676_v44  ;;  %v356_v44 = vand.u32 127, %v355_v11 }
  0x8a   :  { %648 = vmatpush.bf16.msra.mxu1 %v3373_v51  ;;  %661 = vmatpush.bf16.msra.mxu2 %v3377_v56 }
  0x8b   :  { %674 = vmatpush.bf16.msra.mxu3 %v3379_v57  ;;  %vm363_vm8 = vcmp.lt.s32.totalorder %v356_v44, 64 }
  0x8c   :  { %751 = vmatpush.bf16.msrb.mxu0 %v3259_v12 }
  0x8d   :  { %v2885_v28 = vpop.eup %2884 }
  0x8e   :  { %v2887_v45 = vpop.eup %2886  ;;  %v373_v46 = vadd.f32 1.0, %v2885_v28  ;;  %764 = vmatpush.bf16.msrb.mxu1 %v3261_v16  ;;  %777 = vmatpush.bf16.msrb.mxu2 %v3263_v17 }
  0x8f   :  { %v2889_v52 = vpop.eup %2888  ;;  %v374_v55 = vadd.f32 1.0, %v2887_v45  ;;  %790 = vmatpush.bf16.msrb.mxu3 %v3271_v22 }
  0x90   :  { %v3381_v60 = vadd.f32 1.0, %v2889_v52  ;;  %2890 = vrcp.f32 %v373_v46  ;;  %752 = vmatpush.bf16.msrb.mxu0 %v3276_v26  ;;  %v385_v15 = vand.u32 2147483647, %v373_v46  ;;  %v387_v18 = vand.u32 2147483648, %v373_v46 }
  0x91   :  { %2892 = vrcp.f32 %v374_v55  ;;  %v402_v24 = vand.u32 2147483648, %v374_v55  ;;  %v400_v28 = vand.u32 2147483647, %v374_v55  ;;  %vm381_vm2 = vweird.f32 %v373_v46 }
  0x92   :  { %2894 = vrcp.f32 %v3381_v60  ;;  %765 = vmatpush.bf16.msrb.mxu1 %v3282_v32  ;;  %778 = vmatpush.bf16.msrb.mxu2 %v3284_v33  ;;  %v388_v42 = vor.u32 1.1754944e-38, %v387_v18  ;;  %vm396_vm4 = vweird.f32 %v374_v55  ;;  %vm386_vm5 = vcmp.eq.f32.partialorder %v385_v15, 8.507059e+37 }
  0x93   :  { %791 = vmatpush.bf16.msrb.mxu3 %v3293_v39  ;;  %2896 = vtanh.f32 %v362_v63  ;;  %v403_v63 = vor.u32 1.1754944e-38, %v402_v24  ;;  %vm401_vm7 = vcmp.eq.f32.partialorder %v400_v28, 8.507059e+37  ;;  %vm411_vm10 = vweird.f32 %v3381_v60 }
  0x94   :  { %753 = vmatpush.bf16.msrb.mxu0 %v3298_v43  ;;  %v415_v24 = vand.u32 2147483647, %v3381_v60 }
  0x96   :  { %v2891_v61 = vpop.eup %2890  ;;  %766 = vmatpush.bf16.msrb.mxu1 %v3304_v49  ;;  %779 = vmatpush.bf16.msrb.mxu2 %v3306_v50  ;;  %vm416_vm12 = vcmp.eq.f32.partialorder %v415_v24, 8.507059e+37 }
  0x97   :  { %v2893_v1 = vpop.eup %2892  ;;  %v377_v2 = vmul.f32 %v2891_v61, %v373_v46  ;;  %vm382_vm0 = vweird.f32 %v2891_v61  ;;  %792 = vmatpush.bf16.msrb.mxu3 %v3309_v54 }
  0x98   :  { %v3394_v3 = vpop.eup %2894  ;;  %v392_v6 = vmul.f32 %v2893_v1, %v374_v55  ;;  %vm397_vm1 = vweird.f32 %v2893_v1  ;;  %vm383_vm3 = vmor %vm381_vm2, %vm382_vm0  ;;  %754 = vmatpush.bf16.msrb.mxu0 %v3318_v62 }
  0x99   :  { %v378_v7 = vsub.f32 1.0, %v377_v2  ;;  %v407_v25 = vmul.f32 %v3394_v3, %v3381_v60  ;;  %vm398_vm6 = vmor %vm396_vm4, %vm397_vm1  ;;  %vm412_vm9 = vweird.f32 %v3394_v3 }
  0x9a   :  { %v393_v21 = vsub.f32 1.0, %v392_v6  ;;  %v2897_v6 = vpop.eup %2896  ;;  %767 = vmatpush.bf16.msrb.mxu1 %v3325_v8  ;;  %780 = vmatpush.bf16.msrb.mxu2 %v3327_v9  ;;  %vm413_vm11 = vmor %vm411_vm10, %vm412_vm9 }
  0x9b   :  { %v379_v13 = vmul.f32 %v2891_v61, %v378_v7  ;;  %v408_v2 = vsub.f32 1.0, %v407_v25  ;;  %793 = vmatpush.bf16.msrb.mxu3 %v3329_v10 }
  0x9c   :  { %v394_v27 = vmul.f32 %v2893_v1, %v393_v21  ;;  %755 = vmatpush.bf16.msrb.mxu0 %v3335_v19 }
  0x9d   :  { %v380_v34 = vadd.f32 %v2891_v61, %v379_v13  ;;  %v417_v13 = vand.u32 2147483648, %v3381_v60 }
  0x9e   :  { %v395_v45 = vadd.f32 %v2893_v1, %v394_v27  ;;  %768 = vmatpush.bf16.msrb.mxu1 %v3340_v35  ;;  %781 = vmatpush.bf16.msrb.mxu2 %v3342_v40 }
  0x9f   :  { %v384_v52 = vsel %vm383_vm3, %v2891_v61, %v380_v34  ;;  %v409_v61 = vmul.f32 %v3394_v3, %v408_v2  ;;  %794 = vmatpush.bf16.msrb.mxu3 %v3344_v41  ;;  %v418_v27 = vor.u32 1.1754944e-38, %v417_v13  ;;  %v49_v2 = vld [vmem:[%s4161_s0 + $0x10] sm:$0xff] }
  0xa0   :  { %v389_v7 = vsel %vm386_vm5, %v388_v42, %v384_v52  ;;  %v399_v21 = vsel %vm398_vm6, %v2893_v1, %v395_v45  ;;  %756 = vmatpush.bf16.msrb.mxu0 %v3349_v53  ;;  %76 = vperm.xlu1 %2880, %v49_v2  }
  0xa1   :  { %v423_v46 = vmul.f32 %v2897_v6, %v389_v7  ;;  %v404_v11 = vsel %vm401_vm7, %v403_v63, %v399_v21  ;;  %v410_v18 = vadd.f32 %v3394_v3, %v409_v61 }
  0xa2   :  { %v422_v55 = vmul.f32 0.0, %v404_v11  ;;  %769 = vmatpush.bf16.msrb.mxu1 %v3351_v58  ;;  %782 = vmatpush.bf16.msrb.mxu2 %v3353_v59 }
  0xa3   :  { %795 = vmatpush.bf16.msrb.mxu3 %v3356_v0  ;;  %v414_v25 = vsel %vm413_vm11, %v3394_v3, %v410_v18  ;;  %v72_v3 = vpop.permute.xlu0 %71 }
  0xa4   :  { %v424_v15 = vadd.f32 %v423_v46, %v422_v55  ;;  %757 = vmatpush.bf16.msrb.mxu0 %v3359_v4  ;;  %v419_v34 = vsel %vm416_vm12, %v418_v27, %v414_v25  ;;  %v157_v44 = vmul.f32 %v3265_v20, %v72_v3  ;;  %v158_v45 = vmul.f32 %v3278_v30, %v72_v3 }
  0xa5   :  { %v159_v6 = vmul.f32 %v3280_v31, %v72_v3  ;;  %v160_v7 = vmul.f32 %v3286_v36, %v72_v3 }
  0xa6   :  { %v3415_v1 = vsel %vm363_vm8, %v424_v15, 0.0  ;;  %770 = vmatpush.bf16.msrb.mxu1 %v3361_v5  ;;  %783 = vmatpush.bf16.msrb.mxu2 %v3365_v14  ;;  %v231_v52 = vadd.f32 %v3288_v37, %v157_v44  ;;  %v232_v63 = vadd.f32 %v3290_v38, %v158_v45  ;;  %v50_v15 = vld [vmem:[%s4161_s0 + $0x18] sm:$0xff] }
  0xa7   :  { %2898 = vtanh.f32 %v3415_v1  ;;  %796 = vmatpush.bf16.msrb.mxu3 %v3367_v23  ;;  %v233_v46 = vadd.f32 %v3300_v47, %v159_v6  ;;  %v234_v11 = vadd.f32 %v3302_v48, %v160_v7 }
  0xa8   :  { %758 = vmatpush.bf16.msrb.mxu0 %v3370_v29  ;;  %v293_v21 = vpack.c.bf16 %v232_v63, %v231_v52  ;;  %81 = vperm.xlu1 %2880, %v50_v15  }
  0xa9   :  { %v294_v27 = vpack.c.bf16 %v234_v11, %v233_v46  ;;  %v57_v11 = vld [vmem:[%s4161_s0 + $0x50] sm:$0xff] }
  0xaa   :  { %771 = vmatpush.bf16.msrb.mxu1 %v3373_v51  ;;  %784 = vmatpush.bf16.msrb.mxu2 %v3377_v56  ;;  %v464_v55 = vunpack.c.l.bf16 %v293_v21  ;;  %v465_v61 = vunpack.c.h.bf16 %v293_v21 }
  0xab   :  { %797 = vmatpush.bf16.msrb.mxu3 %v3379_v57 }
  0xad   :  { %v2899_v28 = vpop.eup %2898 }
  0xae   :  { %v427_v60 = vmul.f32 %v2899_v28, %v419_v34 }
  0xb0   :  { %v428_v42 = vpack.c.bf16 %v427_v60, %v427_v60  ;;  %v54_v60 = vld [vmem:[%s4161_s0 + $0x38] sm:$0xff] }
  0xb1   :  { %101 = vperm.xlu1 %2880, %v54_v60   ;;  %v60_v60 = vld [vmem:[%s4161_s0 + $0x68] sm:$0xff] }
  0xb2   :  { %636 = vmatmul.bf16.vlgmr.msra.gmra.mxu0 %v428_v42  ;;  %649 = vmatmul.bf16.vlgmr.msra.gmra.mxu1 %v428_v42 }
  0xb3   :  { %662 = vmatmul.bf16.vlgmr.msra.gmra.mxu2 %v428_v42  ;;  %675 = vmatmul.bf16.vlgmr.msra.gmra.mxu3 %v428_v42  ;;  %v466_v42 = vunpack.c.l.bf16 %v294_v27 }
  0xb4   :  { %874 = vmatpush.bf16.msra.mxu0 %v3259_v12  ;;  %887 = vmatpush.bf16.msra.mxu1 %v3261_v16 }
  0xb5   :  { %900 = vmatpush.bf16.msra.mxu2 %v3263_v17  ;;  %913 = vmatpush.bf16.msra.mxu3 %v3271_v22 }
  0xb8   :  { %875 = vmatpush.bf16.msra.mxu0 %v3276_v26  ;;  %888 = vmatpush.bf16.msra.mxu1 %v3282_v32 }
  0xb9   :  { %901 = vmatpush.bf16.msra.mxu2 %v3284_v33  ;;  %914 = vmatpush.bf16.msra.mxu3 %v3293_v39 }
  0xba   :  { %116 = vperm.xlu1 %2880, %v57_v11  }
  0xbc   :  { %876 = vmatpush.bf16.msra.mxu0 %v3298_v43  ;;  %889 = vmatpush.bf16.msra.mxu1 %v3304_v49 }
  0xbd   :  { %902 = vmatpush.bf16.msra.mxu2 %v3306_v50  ;;  %915 = vmatpush.bf16.msra.mxu3 %v3309_v54 }
  0xc0   :  { %877 = vmatpush.bf16.msra.mxu0 %v3318_v62  ;;  %890 = vmatpush.bf16.msra.mxu1 %v3325_v8 }
  0xc1   :  { %903 = vmatpush.bf16.msra.mxu2 %v3327_v9  ;;  %916 = vmatpush.bf16.msra.mxu3 %v3329_v10 }
  0xc2   :  { %131 = vperm.xlu1 %2880, %v60_v60  }
  0xc4   :  { %878 = vmatpush.bf16.msra.mxu0 %v3335_v19  ;;  %891 = vmatpush.bf16.msra.mxu1 %v3340_v35 }
  0xc5   :  { %904 = vmatpush.bf16.msra.mxu2 %v3342_v40  ;;  %917 = vmatpush.bf16.msra.mxu3 %v3344_v41 }
  0xc8   :  { %879 = vmatpush.bf16.msra.mxu0 %v3349_v53  ;;  %892 = vmatpush.bf16.msra.mxu1 %v3351_v58 }
  0xc9   :  { %905 = vmatpush.bf16.msra.mxu2 %v3353_v59  ;;  %918 = vmatpush.bf16.msra.mxu3 %v3356_v0 }
  0xcc   :  { %880 = vmatpush.bf16.msra.mxu0 %v3359_v4  ;;  %893 = vmatpush.bf16.msra.mxu1 %v3361_v5 }
  0xcd   :  { %906 = vmatpush.bf16.msra.mxu2 %v3365_v14  ;;  %919 = vmatpush.bf16.msra.mxu3 %v3367_v23 }
  0xd0   :  { %881 = vmatpush.bf16.msra.mxu0 %v3370_v29  ;;  %894 = vmatpush.bf16.msra.mxu1 %v3373_v51 }
  0xd1   :  { %907 = vmatpush.bf16.msra.mxu2 %v3377_v56  ;;  %920 = vmatpush.bf16.msra.mxu3 %v3379_v57 }
 0x12f   :  { %v637_v18 = vpop.f32.mrf.mxu0  ;;  %v650_v13 = vpop.f32.mrf.mxu1 }
 0x130   :  { %v638_v24 = vadd.f32 %v637_v18, %v464_v55  ;;  %v651_v25 = vadd.f32 %v650_v13, %v465_v61  ;;  %v467_v18 = vunpack.c.h.bf16 %v294_v27 }
 0x132   :  { %v2792_v28 = vmul.f32 -1.442695, %v638_v24  ;;  %v2793_v34 = vmul.f32 -1.442695, %v651_v25 }
 0x134   :  { %2900 = vpow2.f32 %v2792_v28 }
 0x135   :  { %2902 = vpow2.f32 %v2793_v34 }
 0x136   :  { %v663_v3 = vpop.f32.mrf.mxu2  ;;  %v676_v44 = vpop.f32.mrf.mxu3 }
 0x137   :  { %v664_v45 = vadd.f32 %v663_v3, %v466_v42  ;;  %v639_v52 = vpop.f32.mrf.mxu0  ;;  %v652_v63 = vpop.f32.mrf.mxu1  ;;  %v677_v25 = vadd.f32 %v676_v44, %v467_v18 }
 0x139   :  { %v2794_v2 = vmul.f32 -1.442695, %v664_v45 }
 0x13a   :  { %v2901_v6 = vpop.eup %2900 }
 0x13b   :  { %v2903_v7 = vpop.eup %2902  ;;  %v689_v21 = vadd.f32 1.0, %v2901_v6  ;;  %2904 = vpow2.f32 %v2794_v2 }
 0x13c   :  { %v690_v46 = vadd.f32 1.0, %v2903_v7 }
 0x13d   :  { %2906 = vrcp.f32 %v689_v21  ;;  %v703_v52 = vand.u32 2147483648, %v689_v21  ;;  %v701_v27 = vand.u32 2147483647, %v689_v21  ;;  %vm697_vm15 = vweird.f32 %v689_v21 }
 0x13e   :  { %2908 = vrcp.f32 %v690_v46  ;;  %v665_v55 = vpop.f32.mrf.mxu2  ;;  %v678_v61 = vpop.f32.mrf.mxu3  ;;  %v718_v63 = vand.u32 2147483648, %v690_v46  ;;  %v716_v44 = vand.u32 2147483647, %v690_v46  ;;  %vm712_vm0 = vweird.f32 %v690_v46 }
 0x13f   :  { %v704_v61 = vor.u32 1.1754944e-38, %v703_v52  ;;  %vm702_vm3 = vcmp.eq.f32.partialorder %v701_v27, 8.507059e+37 }
 0x140   :  { %v719_v18 = vor.u32 1.1754944e-38, %v718_v63  ;;  %vm717_vm4 = vcmp.eq.f32.partialorder %v716_v44, 8.507059e+37 }
 0x141   :  { %v2905_v15 = vpop.eup %2904 }
 0x142   :  { %v691_v13 = vadd.f32 1.0, %v2905_v15 }
 0x143   :  { %v2907_v24 = vpop.eup %2906 }
 0x144   :  { %v2909_v28 = vpop.eup %2908  ;;  %v693_v34 = vmul.f32 %v2907_v24, %v689_v21  ;;  %2910 = vrcp.f32 %v691_v13  ;;  %vm698_vm13 = vweird.f32 %v2907_v24  ;;  %v733_v52 = vand.u32 2147483648, %v691_v13 }
 0x145   :  { %v708_v42 = vmul.f32 %v2909_v28, %v690_v46  ;;  %2912 = vtanh.f32 %v677_v25  ;;  %vm713_vm14 = vweird.f32 %v2909_v28  ;;  %vm699_vm1 = vmor %vm697_vm15, %vm698_vm13  ;;  %vm727_vm6 = vweird.f32 %v691_v13 }
 0x146   :  { %v694_v3 = vsub.f32 1.0, %v693_v34  ;;  %vm714_vm2 = vmor %vm712_vm0, %vm713_vm14  ;;  %v734_v27 = vor.u32 1.1754944e-38, %v733_v52 }
 0x147   :  { %v709_v45 = vsub.f32 1.0, %v708_v42 }
 0x148   :  { %v695_v2 = vmul.f32 %v2907_v24, %v694_v3 }
 0x149   :  { %v710_v6 = vmul.f32 %v2909_v28, %v709_v45 }
 0x14a   :  { %v2911_v7 = vpop.eup %2910  ;;  %v696_v11 = vadd.f32 %v2907_v24, %v695_v2 }
 0x14b   :  { %v723_v55 = vmul.f32 %v2911_v7, %v691_v13  ;;  %v711_v15 = vadd.f32 %v2909_v28, %v710_v6  ;;  %v2913_v25 = vpop.eup %2912  ;;  %vm728_vm5 = vweird.f32 %v2911_v7 }
 0x14c   :  { %v700_v34 = vsel %vm699_vm1, %v2907_v24, %v696_v11  ;;  %v731_v24 = vand.u32 2147483647, %v691_v13  ;;  %vm729_vm7 = vmor %vm727_vm6, %vm728_vm5 }
 0x14d   :  { %v724_v60 = vsub.f32 1.0, %v723_v55  ;;  %v705_v42 = vsel %vm702_vm3, %v704_v61, %v700_v34  ;;  %v715_v3 = vsel %vm714_vm2, %v2909_v28, %v711_v15 }
 0x14e   :  { %v720_v45 = vsel %vm717_vm4, %v719_v18, %v715_v3  ;;  %v739_v48 = vmul.f32 %v2913_v25, %v705_v42  ;;  %vm732_vm8 = vcmp.eq.f32.partialorder %v731_v24, 8.507059e+37  ;;  %v4177_v25 = vld [vmem:[#allocation7_spill] sm:$0xff]  ;;  %v4178_v42 = vld [vmem:[#allocation8_spill] sm:$0xff] }
 0x14f   :  { %v738_v47 = vmul.f32 %v720_v45, %v3415_v1  ;;  %v725_v2 = vmul.f32 %v2911_v7, %v724_v60 }
 0x151   :  { %v3492_v21 = vadd.f32 %v739_v48, %v738_v47  ;;  %v726_v46 = vadd.f32 %v2911_v7, %v725_v2  ;;  %v77_v47 = vpop.permute.xlu1 %76 }
 0x152   :  { %v161_v48 = vmul.f32 %v3265_v20, %v77_v47  ;;  %v162_v1 = vmul.f32 %v3278_v30, %v77_v47  ;;  %v163_v61 = vmul.f32 %v3280_v31, %v77_v47  ;;  %v164_v15 = vmul.f32 %v3286_v36, %v77_v47 }
 0x153   :  { %2914 = vtanh.f32 %v3492_v21  ;;  %v730_v63 = vsel %vm729_vm7, %v2911_v7, %v726_v46 }
 0x154   :  { %v735_v6 = vsel %vm732_vm8, %v734_v27, %v730_v63  ;;  %v235_v13 = vadd.f32 %v3288_v37, %v161_v48  ;;  %v236_v7 = vadd.f32 %v3290_v38, %v162_v1  ;;  %v237_v60 = vadd.f32 %v4177_v25, %v163_v61 }
 0x155   :  { %v238_v3 = vadd.f32 %v4178_v42, %v164_v15 }
 0x156   :  { %v295_v55 = vpack.c.bf16 %v236_v7, %v235_v13 }
 0x157   :  { %v296_v24 = vpack.c.bf16 %v238_v3, %v237_v60 }
 0x158   :  { %v747_v18 = vunpack.c.l.bf16 %v295_v55  ;;  %v748_v34 = vunpack.c.h.bf16 %v295_v55 }
 0x159   :  { %v2915_v28 = vpop.eup %2914  ;;  %v750_v60 = vunpack.c.h.bf16 %v296_v24 }
 0x15a   :  { %v742_v44 = vmul.f32 %v2915_v28, %v735_v6  ;;  %v749_v28 = vunpack.c.l.bf16 %v296_v24 }
 0x15c   :  { %v743_v11 = vpack.c.bf16 %v742_v44, %v742_v44 }
 0x15e   :  { %759 = vmatmul.bf16.vlgmr.msrb.gmra.mxu0 %v743_v11  ;;  %772 = vmatmul.bf16.vlgmr.msrb.gmra.mxu1 %v743_v11 }
 0x15f   :  { %785 = vmatmul.bf16.vlgmr.msrb.gmra.mxu2 %v743_v11  ;;  %798 = vmatmul.bf16.vlgmr.msrb.gmra.mxu3 %v743_v11 }
 0x160   :  { %997 = vmatpush.bf16.msrb.mxu0 %v3259_v12  ;;  %1010 = vmatpush.bf16.msrb.mxu1 %v3261_v16 }
 0x161   :  { %1023 = vmatpush.bf16.msrb.mxu2 %v3263_v17  ;;  %1036 = vmatpush.bf16.msrb.mxu3 %v3271_v22 }
 0x164   :  { %998 = vmatpush.bf16.msrb.mxu0 %v3276_v26  ;;  %1011 = vmatpush.bf16.msrb.mxu1 %v3282_v32 }
 0x165   :  { %1024 = vmatpush.bf16.msrb.mxu2 %v3284_v33  ;;  %1037 = vmatpush.bf16.msrb.mxu3 %v3293_v39 }
 0x168   :  { %999 = vmatpush.bf16.msrb.mxu0 %v3298_v43  ;;  %1012 = vmatpush.bf16.msrb.mxu1 %v3304_v49 }
 0x169   :  { %1025 = vmatpush.bf16.msrb.mxu2 %v3306_v50  ;;  %1038 = vmatpush.bf16.msrb.mxu3 %v3309_v54 }
 0x16c   :  { %1000 = vmatpush.bf16.msrb.mxu0 %v3318_v62  ;;  %1013 = vmatpush.bf16.msrb.mxu1 %v3325_v8 }
 0x16d   :  { %1026 = vmatpush.bf16.msrb.mxu2 %v3327_v9  ;;  %1039 = vmatpush.bf16.msrb.mxu3 %v3329_v10 }
 0x170   :  { %1001 = vmatpush.bf16.msrb.mxu0 %v3335_v19  ;;  %1014 = vmatpush.bf16.msrb.mxu1 %v3340_v35 }
 0x171   :  { %1027 = vmatpush.bf16.msrb.mxu2 %v3342_v40  ;;  %1040 = vmatpush.bf16.msrb.mxu3 %v3344_v41 }
 0x174   :  { %1002 = vmatpush.bf16.msrb.mxu0 %v3349_v53  ;;  %1015 = vmatpush.bf16.msrb.mxu1 %v3351_v58 }
 0x175   :  { %1028 = vmatpush.bf16.msrb.mxu2 %v3353_v59  ;;  %1041 = vmatpush.bf16.msrb.mxu3 %v3356_v0 }
 0x178   :  { %1003 = vmatpush.bf16.msrb.mxu0 %v3359_v4  ;;  %1016 = vmatpush.bf16.msrb.mxu1 %v3361_v5 }
 0x179   :  { %1029 = vmatpush.bf16.msrb.mxu2 %v3365_v14  ;;  %1042 = vmatpush.bf16.msrb.mxu3 %v3367_v23 }
 0x17c   :  { %1004 = vmatpush.bf16.msrb.mxu0 %v3370_v29  ;;  %1017 = vmatpush.bf16.msrb.mxu1 %v3373_v51 }
 0x17d   :  { %1030 = vmatpush.bf16.msrb.mxu2 %v3377_v56  ;;  %1043 = vmatpush.bf16.msrb.mxu3 %v3379_v57 }
 0x1db   :  { %v760_v45 = vpop.f32.mrf.mxu0  ;;  %v773_v2 = vpop.f32.mrf.mxu1 }
 0x1dc   :  { %v761_v46 = vadd.f32 %v760_v45, %v747_v18  ;;  %v774_v52 = vadd.f32 %v773_v2, %v748_v34 }
 0x1de   :  { %v2795_v63 = vmul.f32 -1.442695, %v761_v46  ;;  %v2796_v27 = vmul.f32 -1.442695, %v774_v52 }
 0x1e0   :  { %2916 = vpow2.f32 %v2795_v63 }
 0x1e1   :  { %2918 = vpow2.f32 %v2796_v27 }
 0x1e2   :  { %v786_v6 = vpop.f32.mrf.mxu2  ;;  %v799_v44 = vpop.f32.mrf.mxu3 }
 0x1e3   :  { %v787_v11 = vadd.f32 %v786_v6, %v749_v28  ;;  %v762_v47 = vpop.f32.mrf.mxu0  ;;  %v775_v48 = vpop.f32.mrf.mxu1  ;;  %v800_v2 = vadd.f32 %v799_v44, %v750_v60 }
 0x1e5   :  { %v2797_v1 = vmul.f32 -1.442695, %v787_v11 }
 0x1e6   :  { %v2917_v13 = vpop.eup %2916 }
 0x1e7   :  { %v2919_v7 = vpop.eup %2918  ;;  %v812_v55 = vadd.f32 1.0, %v2917_v13  ;;  %2920 = vpow2.f32 %v2797_v1 }
 0x1e8   :  { %v813_v61 = vadd.f32 1.0, %v2919_v7 }
 0x1e9   :  { %2922 = vrcp.f32 %v812_v55  ;;  %v826_v6 = vand.u32 2147483648, %v812_v55  ;;  %v824_v48 = vand.u32 2147483647, %v812_v55  ;;  %vm820_vm11 = vweird.f32 %v812_v55 }
 0x1ea   :  { %2924 = vrcp.f32 %v813_v61  ;;  %v788_v15 = vpop.f32.mrf.mxu2  ;;  %v801_v18 = vpop.f32.mrf.mxu3  ;;  %v841_v11 = vand.u32 2147483648, %v813_v61  ;;  %v839_v13 = vand.u32 2147483647, %v813_v61  ;;  %vm835_vm12 = vweird.f32 %v813_v61 }
 0x1eb   :  { %v827_v15 = vor.u32 1.1754944e-38, %v826_v6  ;;  %vm825_vm15 = vcmp.eq.f32.partialorder %v824_v48, 8.507059e+37 }
 0x1ec   :  { %vm840_vm0 = vcmp.eq.f32.partialorder %v839_v13, 8.507059e+37 }
 0x1ed   :  { %v2921_v34 = vpop.eup %2920 }
 0x1ee   :  { %v814_v3 = vadd.f32 1.0, %v2921_v34  ;;  %v842_v34 = vor.u32 1.1754944e-38, %v841_v11 }
 0x1ef   :  { %v2923_v45 = vpop.eup %2922 }
 0x1f0   :  { %v2925_v46 = vpop.eup %2924  ;;  %v816_v52 = vmul.f32 %v2923_v45, %v812_v55  ;;  %2926 = vrcp.f32 %v814_v3  ;;  %vm821_vm9 = vweird.f32 %v2923_v45  ;;  %v856_v6 = vand.u32 2147483648, %v814_v3 }
 0x1f1   :  { %v831_v63 = vmul.f32 %v2925_v46, %v813_v61  ;;  %2928 = vtanh.f32 %v800_v2  ;;  %vm836_vm10 = vweird.f32 %v2925_v46  ;;  %vm822_vm13 = vmor %vm820_vm11, %vm821_vm9  ;;  %vm850_vm2 = vweird.f32 %v814_v3 }
 0x1f2   :  { %v817_v27 = vsub.f32 1.0, %v816_v52  ;;  %vm837_vm14 = vmor %vm835_vm12, %vm836_vm10  ;;  %v857_v48 = vor.u32 1.1754944e-38, %v856_v6 }
 0x1f3   :  { %v832_v28 = vsub.f32 1.0, %v831_v63 }
 0x1f4   :  { %v818_v47 = vmul.f32 %v2923_v45, %v817_v27 }
 0x1f5   :  { %v833_v1 = vmul.f32 %v2925_v46, %v832_v28 }
 0x1f6   :  { %v2927_v7 = vpop.eup %2926  ;;  %v819_v24 = vadd.f32 %v2923_v45, %v818_v47 }
 0x1f7   :  { %v846_v44 = vmul.f32 %v2927_v7, %v814_v3  ;;  %v834_v18 = vadd.f32 %v2925_v46, %v833_v1  ;;  %v2929_v2 = vpop.eup %2928  ;;  %vm851_vm1 = vweird.f32 %v2927_v7 }
 0x1f8   :  { %v823_v60 = vsel %vm822_vm13, %v2923_v45, %v819_v24  ;;  %v854_v45 = vand.u32 2147483647, %v814_v3  ;;  %vm852_vm3 = vmor %vm850_vm2, %vm851_vm1 }
 0x1f9   :  { %v847_v52 = vsub.f32 1.0, %v846_v44  ;;  %v828_v63 = vsel %vm825_vm15, %v827_v15, %v823_v60  ;;  %v838_v27 = vsel %vm837_vm14, %v2925_v46, %v834_v18 }
 0x1fa   :  { %v843_v28 = vsel %vm840_vm0, %v842_v34, %v838_v27  ;;  %v862_v42 = vmul.f32 %v2929_v2, %v828_v63  ;;  %vm855_vm4 = vcmp.eq.f32.partialorder %v854_v45, 8.507059e+37  ;;  %v4179_v34 = vld [vmem:[#allocation7_spill] sm:$0xff]  ;;  %v4180_v2 = vld [vmem:[#allocation8_spill] sm:$0xff] }
 0x1fb   :  { %v861_v25 = vmul.f32 %v843_v28, %v3492_v21  ;;  %v848_v47 = vmul.f32 %v2927_v7, %v847_v52  ;;  %v82_v21 = vpop.permute.xlu1 %81 }
 0x1fc   :  { %v167_v44 = vmul.f32 %v3280_v31, %v82_v21  ;;  %v168_v15 = vmul.f32 %v3286_v36, %v82_v21 }
 0x1fd   :  { %v3536_v55 = vadd.f32 %v862_v42, %v861_v25  ;;  %v849_v61 = vadd.f32 %v2927_v7, %v848_v47  ;;  %v165_v25 = vmul.f32 %v3265_v20, %v82_v21  ;;  %v166_v42 = vmul.f32 %v3278_v30, %v82_v21 }
 0x1fe   :  { %v241_v60 = vadd.f32 %v4179_v34, %v167_v44  ;;  %v242_v52 = vadd.f32 %v4180_v2, %v168_v15 }
 0x1ff   :  { %2930 = vtanh.f32 %v3536_v55  ;;  %v853_v11 = vsel %vm852_vm3, %v2927_v7, %v849_v61  ;;  %v239_v3 = vadd.f32 %v3288_v37, %v165_v25  ;;  %v240_v7 = vadd.f32 %v3290_v38, %v166_v42 }
 0x200   :  { %v858_v1 = vsel %vm855_vm4, %v857_v48, %v853_v11  ;;  %v298_v45 = vpack.c.bf16 %v242_v52, %v241_v60 }
 0x201   :  { %v297_v18 = vpack.c.bf16 %v240_v7, %v239_v3 }
 0x203   :  { %v870_v63 = vunpack.c.l.bf16 %v297_v18  ;;  %v871_v27 = vunpack.c.h.bf16 %v297_v18 }
 0x205   :  { %v2931_v46 = vpop.eup %2930 }
 0x206   :  { %v865_v13 = vmul.f32 %v2931_v46, %v858_v1  ;;  %v51_v46 = vld [vmem:[%s4161_s0 + $0x20] sm:$0xff]  ;;  %v872_v1 = vunpack.c.l.bf16 %v298_v45 }
 0x207   :  { %86 = vperm.xlu2 %2881, %v51_v46  }
 0x208   :  { %v866_v24 = vpack.c.bf16 %v865_v13, %v865_v13 }
 0x20a   :  { %882 = vmatmul.bf16.vlgmr.msra.gmra.mxu0 %v866_v24  ;;  %895 = vmatmul.bf16.vlgmr.msra.gmra.mxu1 %v866_v24 }
 0x20b   :  { %908 = vmatmul.bf16.vlgmr.msra.gmra.mxu2 %v866_v24  ;;  %921 = vmatmul.bf16.vlgmr.msra.gmra.mxu3 %v866_v24 }
 0x20c   :  { %1120 = vmatpush.bf16.msra.mxu0 %v3259_v12  ;;  %1133 = vmatpush.bf16.msra.mxu1 %v3261_v16 }
 0x20d   :  { %1146 = vmatpush.bf16.msra.mxu2 %v3263_v17  ;;  %1159 = vmatpush.bf16.msra.mxu3 %v3271_v22 }
 0x210   :  { %1121 = vmatpush.bf16.msra.mxu0 %v3276_v26  ;;  %1134 = vmatpush.bf16.msra.mxu1 %v3282_v32 }
 0x211   :  { %1147 = vmatpush.bf16.msra.mxu2 %v3284_v33  ;;  %1160 = vmatpush.bf16.msra.mxu3 %v3293_v39 }
 0x214   :  { %1122 = vmatpush.bf16.msra.mxu0 %v3298_v43  ;;  %1135 = vmatpush.bf16.msra.mxu1 %v3304_v49 }
 0x215   :  { %1148 = vmatpush.bf16.msra.mxu2 %v3306_v50  ;;  %1161 = vmatpush.bf16.msra.mxu3 %v3309_v54 }
 0x218   :  { %1123 = vmatpush.bf16.msra.mxu0 %v3318_v62  ;;  %1136 = vmatpush.bf16.msra.mxu1 %v3325_v8 }
 0x219   :  { %1149 = vmatpush.bf16.msra.mxu2 %v3327_v9  ;;  %1162 = vmatpush.bf16.msra.mxu3 %v3329_v10 }
 0x21c   :  { %1124 = vmatpush.bf16.msra.mxu0 %v3335_v19  ;;  %1137 = vmatpush.bf16.msra.mxu1 %v3340_v35 }
 0x21d   :  { %1150 = vmatpush.bf16.msra.mxu2 %v3342_v40  ;;  %1163 = vmatpush.bf16.msra.mxu3 %v3344_v41 }
 0x220   :  { %1125 = vmatpush.bf16.msra.mxu0 %v3349_v53  ;;  %1138 = vmatpush.bf16.msra.mxu1 %v3351_v58 }
 0x221   :  { %1151 = vmatpush.bf16.msra.mxu2 %v3353_v59  ;;  %1164 = vmatpush.bf16.msra.mxu3 %v3356_v0 }
 0x224   :  { %1126 = vmatpush.bf16.msra.mxu0 %v3359_v4  ;;  %1139 = vmatpush.bf16.msra.mxu1 %v3361_v5 }
 0x225   :  { %1152 = vmatpush.bf16.msra.mxu2 %v3365_v14  ;;  %1165 = vmatpush.bf16.msra.mxu3 %v3367_v23 }
 0x228   :  { %1127 = vmatpush.bf16.msra.mxu0 %v3370_v29  ;;  %1140 = vmatpush.bf16.msra.mxu1 %v3373_v51 }
 0x229   :  { %1153 = vmatpush.bf16.msra.mxu2 %v3377_v56  ;;  %1166 = vmatpush.bf16.msra.mxu3 %v3379_v57 }
 0x287   :  { %v883_v28 = vpop.f32.mrf.mxu0  ;;  %v896_v47 = vpop.f32.mrf.mxu1 }
 0x288   :  { %v884_v61 = vadd.f32 %v883_v28, %v870_v63  ;;  %v897_v6 = vadd.f32 %v896_v47, %v871_v27  ;;  %v52_v63 = vld [vmem:[%s4161_s0 + $0x28] sm:$0xff]  ;;  %v873_v28 = vunpack.c.h.bf16 %v298_v45 }
 0x289   :  { %91 = vperm.xlu2 %2881, %v52_v63  }
 0x28a   :  { %v2798_v11 = vmul.f32 -1.442695, %v884_v61  ;;  %v2799_v48 = vmul.f32 -1.442695, %v897_v6 }
 0x28c   :  { %2932 = vpow2.f32 %v2798_v11 }
 0x28d   :  { %2934 = vpow2.f32 %v2799_v48 }
 0x28e   :  { %v909_v13 = vpop.f32.mrf.mxu2  ;;  %v922_v24 = vpop.f32.mrf.mxu3 }
 0x28f   :  { %v910_v21 = vadd.f32 %v909_v13, %v872_v1  ;;  %v885_v25 = vpop.f32.mrf.mxu0  ;;  %v898_v42 = vpop.f32.mrf.mxu1  ;;  %v923_v6 = vadd.f32 %v922_v24, %v873_v28  ;;  %v55_v1 = vld [vmem:[%s4161_s0 + $0x40] sm:$0xff] }
 0x291   :  { %v2800_v3 = vmul.f32 -1.442695, %v910_v21  ;;  %106 = vperm.xlu2 %2881, %v55_v1   ;;  %v58_v1 = vld [vmem:[%s4161_s0 + $0x58] sm:$0xff] }
 0x292   :  { %v2933_v7 = vpop.eup %2932 }
 0x293   :  { %v2935_v44 = vpop.eup %2934  ;;  %v935_v15 = vadd.f32 1.0, %v2933_v7  ;;  %2936 = vpow2.f32 %v2800_v3 }
 0x294   :  { %v936_v18 = vadd.f32 1.0, %v2935_v44 }
 0x295   :  { %2938 = vrcp.f32 %v935_v15  ;;  %v949_v25 = vand.u32 2147483648, %v935_v15  ;;  %v947_v7 = vand.u32 2147483647, %v935_v15  ;;  %vm943_vm7 = vweird.f32 %v935_v15 }
 0x296   :  { %2940 = vrcp.f32 %v936_v18  ;;  %v911_v60 = vpop.f32.mrf.mxu2  ;;  %v924_v52 = vpop.f32.mrf.mxu3  ;;  %v964_v42 = vand.u32 2147483648, %v936_v18  ;;  %v962_v24 = vand.u32 2147483647, %v936_v18  ;;  %vm958_vm8 = vweird.f32 %v936_v18 }
 0x297   :  { %v950_v63 = vor.u32 1.1754944e-38, %v949_v25  ;;  %vm948_vm11 = vcmp.eq.f32.partialorder %v947_v7, 8.507059e+37  ;;  %v61_v7 = vld [vmem:[%s4161_s0 + $0x70] sm:$0xff] }
 0x298   :  { %v965_v28 = vor.u32 1.1754944e-38, %v964_v42  ;;  %vm963_vm12 = vcmp.eq.f32.partialorder %v962_v24, 8.507059e+37 }
 0x299   :  { %v2937_v27 = vpop.eup %2936  ;;  %121 = vperm.xlu2 %2881, %v58_v1  }
 0x29a   :  { %v937_v47 = vadd.f32 1.0, %v2937_v27 }
 0x29b   :  { %v2939_v61 = vpop.eup %2938 }
 0x29c   :  { %v2941_v11 = vpop.eup %2940  ;;  %v939_v48 = vmul.f32 %v2939_v61, %v935_v15  ;;  %2942 = vrcp.f32 %v937_v47  ;;  %vm944_vm5 = vweird.f32 %v2939_v61  ;;  %vm973_vm14 = vweird.f32 %v937_v47 }
 0x29d   :  { %v954_v46 = vmul.f32 %v2941_v11, %v936_v18  ;;  %2944 = vtanh.f32 %v923_v6  ;;  %vm959_vm6 = vweird.f32 %v2941_v11  ;;  %vm945_vm9 = vmor %vm943_vm7, %vm944_vm5 }
 0x29e   :  { %v940_v13 = vsub.f32 1.0, %v939_v48  ;;  %vm960_vm10 = vmor %vm958_vm8, %vm959_vm6 }
 0x29f   :  { %v955_v21 = vsub.f32 1.0, %v954_v46 }
 0x2a0   :  { %v941_v3 = vmul.f32 %v2939_v61, %v940_v13 }
 0x2a1   :  { %v956_v45 = vmul.f32 %v2941_v11, %v955_v21  ;;  %136 = vperm.xlu2 %2881, %v61_v7  }
 0x2a2   :  { %v2943_v44 = vpop.eup %2942  ;;  %v942_v60 = vadd.f32 %v2939_v61, %v941_v3 }
 0x2a3   :  { %v969_v52 = vmul.f32 %v2943_v44, %v937_v47  ;;  %v957_v27 = vadd.f32 %v2941_v11, %v956_v45  ;;  %v2945_v6 = vpop.eup %2944  ;;  %vm974_vm13 = vweird.f32 %v2943_v44 }
 0x2a4   :  { %v946_v48 = vsel %vm945_vm9, %v2939_v61, %v942_v60  ;;  %v979_v61 = vand.u32 2147483648, %v937_v47  ;;  %vm975_vm15 = vmor %vm973_vm14, %vm974_vm13 }
 0x2a5   :  { %v970_v46 = vsub.f32 1.0, %v969_v52  ;;  %v951_v13 = vsel %vm948_vm11, %v950_v63, %v946_v48  ;;  %v961_v2 = vsel %vm960_vm10, %v2941_v11, %v957_v27  ;;  %v977_v11 = vand.u32 2147483647, %v937_v47  ;;  %v87_v47 = vpop.permute.xlu2 %86 }
 0x2a6   :  { %v966_v21 = vsel %vm963_vm12, %v965_v28, %v961_v2  ;;  %v985_v15 = vmul.f32 %v2945_v6, %v951_v13  ;;  %v980_v45 = vor.u32 1.1754944e-38, %v979_v61  ;;  %v170_v63 = vmul.f32 %v3278_v30, %v87_v47 }
 0x2a7   :  { %v984_v18 = vmul.f32 %v966_v21, %v3536_v55  ;;  %v971_v3 = vmul.f32 %v2943_v44, %v970_v46  ;;  %vm978_vm0 = vcmp.eq.f32.partialorder %v977_v11, 8.507059e+37  ;;  %v171_v6 = vmul.f32 %v3280_v31, %v87_v47 }
 0x2a8   :  { %v244_v28 = vadd.f32 %v3290_v38, %v170_v63  ;;  %v172_v46 = vmul.f32 %v3286_v36, %v87_v47 }
 0x2a9   :  { %v3592_v25 = vadd.f32 %v985_v15, %v984_v18  ;;  %v972_v42 = vadd.f32 %v2943_v44, %v971_v3  ;;  %v245_v21 = vadd.f32 %v4179_v34, %v171_v6  ;;  %v4181_v15 = vld [vmem:[#allocation8_spill] sm:$0xff] }
 0x2aa   :  { %v246_v18 = vadd.f32 %v4181_v15, %v172_v46 }
 0x2ab   :  { %2946 = vtanh.f32 %v3592_v25  ;;  %v976_v2 = vsel %vm975_vm15, %v2943_v44, %v972_v42  ;;  %v169_v44 = vmul.f32 %v3265_v20, %v87_v47 }
 0x2ac   :  { %v981_v24 = vsel %vm978_vm0, %v980_v45, %v976_v2  ;;  %v300_v7 = vpack.c.bf16 %v246_v18, %v245_v21 }
 0x2ad   :  { %v243_v27 = vadd.f32 %v3288_v37, %v169_v44 }
 0x2ae   :  { %v996_v21 = vunpack.c.h.bf16 %v300_v7 }
 0x2af   :  { %v299_v48 = vpack.c.bf16 %v244_v28, %v243_v27 }
 0x2b1   :  { %v2947_v55 = vpop.eup %2946  ;;  %v993_v13 = vunpack.c.l.bf16 %v299_v48  ;;  %v994_v1 = vunpack.c.h.bf16 %v299_v48 }
 0x2b2   :  { %v988_v60 = vmul.f32 %v2947_v55, %v981_v24  ;;  %v995_v55 = vunpack.c.l.bf16 %v300_v7 }
 0x2b4   :  { %v989_v52 = vpack.c.bf16 %v988_v60, %v988_v60 }
 0x2b6   :  { %1005 = vmatmul.bf16.vlgmr.msrb.gmra.mxu0 %v989_v52  ;;  %1018 = vmatmul.bf16.vlgmr.msrb.gmra.mxu1 %v989_v52 }
 0x2b7   :  { %1031 = vmatmul.bf16.vlgmr.msrb.gmra.mxu2 %v989_v52  ;;  %1044 = vmatmul.bf16.vlgmr.msrb.gmra.mxu3 %v989_v52 }
 0x2b8   :  { %1243 = vmatpush.bf16.msrb.mxu0 %v3259_v12  ;;  %1256 = vmatpush.bf16.msrb.mxu1 %v3261_v16 }
 0x2b9   :  { %1269 = vmatpush.bf16.msrb.mxu2 %v3263_v17  ;;  %1282 = vmatpush.bf16.msrb.mxu3 %v3271_v22 }
 0x2bc   :  { %1244 = vmatpush.bf16.msrb.mxu0 %v3276_v26  ;;  %1257 = vmatpush.bf16.msrb.mxu1 %v3282_v32 }
 0x2bd   :  { %1270 = vmatpush.bf16.msrb.mxu2 %v3284_v33  ;;  %1283 = vmatpush.bf16.msrb.mxu3 %v3293_v39 }
 0x2c0   :  { %1245 = vmatpush.bf16.msrb.mxu0 %v3298_v43  ;;  %1258 = vmatpush.bf16.msrb.mxu1 %v3304_v49 }
 0x2c1   :  { %1271 = vmatpush.bf16.msrb.mxu2 %v3306_v50  ;;  %1284 = vmatpush.bf16.msrb.mxu3 %v3309_v54 }
 0x2c4   :  { %1246 = vmatpush.bf16.msrb.mxu0 %v3318_v62  ;;  %1259 = vmatpush.bf16.msrb.mxu1 %v3325_v8 }
 0x2c5   :  { %1272 = vmatpush.bf16.msrb.mxu2 %v3327_v9  ;;  %1285 = vmatpush.bf16.msrb.mxu3 %v3329_v10 }
 0x2c8   :  { %1247 = vmatpush.bf16.msrb.mxu0 %v3335_v19  ;;  %1260 = vmatpush.bf16.msrb.mxu1 %v3340_v35 }
 0x2c9   :  { %1273 = vmatpush.bf16.msrb.mxu2 %v3342_v40  ;;  %1286 = vmatpush.bf16.msrb.mxu3 %v3344_v41 }
 0x2cc   :  { %1248 = vmatpush.bf16.msrb.mxu0 %v3349_v53  ;;  %1261 = vmatpush.bf16.msrb.mxu1 %v3351_v58 }
 0x2cd   :  { %1274 = vmatpush.bf16.msrb.mxu2 %v3353_v59  ;;  %1287 = vmatpush.bf16.msrb.mxu3 %v3356_v0 }
 0x2d0   :  { %1249 = vmatpush.bf16.msrb.mxu0 %v3359_v4  ;;  %1262 = vmatpush.bf16.msrb.mxu1 %v3361_v5 }
 0x2d1   :  { %1275 = vmatpush.bf16.msrb.mxu2 %v3365_v14  ;;  %1288 = vmatpush.bf16.msrb.mxu3 %v3367_v23 }
 0x2d4   :  { %1250 = vmatpush.bf16.msrb.mxu0 %v3370_v29  ;;  %1263 = vmatpush.bf16.msrb.mxu1 %v3373_v51 }
 0x2d5   :  { %1276 = vmatpush.bf16.msrb.mxu2 %v3377_v56  ;;  %1289 = vmatpush.bf16.msrb.mxu3 %v3379_v57 }
 0x333   :  { %v1006_v3 = vpop.f32.mrf.mxu0  ;;  %v1019_v42 = vpop.f32.mrf.mxu1 }
 0x334   :  { %v1007_v61 = vadd.f32 %v1006_v3, %v993_v13  ;;  %v1020_v11 = vadd.f32 %v1019_v42, %v994_v1 }
 0x336   :  { %v2801_v2 = vmul.f32 -1.442695, %v1007_v61  ;;  %v2802_v45 = vmul.f32 -1.442695, %v1020_v11 }
 0x338   :  { %2948 = vpow2.f32 %v2801_v2 }
 0x339   :  { %2950 = vpow2.f32 %v2802_v45 }
 0x33a   :  { %v1032_v24 = vpop.f32.mrf.mxu2  ;;  %v1045_v60 = vpop.f32.mrf.mxu3 }
 0x33b   :  { %v1033_v52 = vadd.f32 %v1032_v24, %v995_v55  ;;  %v1008_v47 = vpop.f32.mrf.mxu0  ;;  %v1021_v44 = vpop.f32.mrf.mxu1  ;;  %v1046_v42 = vadd.f32 %v1045_v60, %v996_v21 }
 0x33d   :  { %v2803_v63 = vmul.f32 -1.442695, %v1033_v52 }
 0x33e   :  { %v2949_v27 = vpop.eup %2948 }
 0x33f   :  { %v2951_v28 = vpop.eup %2950  ;;  %v1058_v48 = vadd.f32 1.0, %v2949_v27  ;;  %2952 = vpow2.f32 %v2803_v63 }
 0x340   :  { %v1059_v6 = vadd.f32 1.0, %v2951_v28 }
 0x341   :  { %2954 = vrcp.f32 %v1058_v48  ;;  %v1072_v24 = vand.u32 2147483648, %v1058_v48  ;;  %v1070_v44 = vand.u32 2147483647, %v1058_v48  ;;  %vm1066_vm3 = vweird.f32 %v1058_v48 }
 0x342   :  { %2956 = vrcp.f32 %v1059_v6  ;;  %v1034_v46 = vpop.f32.mrf.mxu2  ;;  %v1047_v13 = vpop.f32.mrf.mxu3  ;;  %v1087_v52 = vand.u32 2147483648, %v1059_v6  ;;  %v1085_v27 = vand.u32 2147483647, %v1059_v6  ;;  %vm1081_vm4 = vweird.f32 %v1059_v6 }
 0x343   :  { %v1073_v46 = vor.u32 1.1754944e-38, %v1072_v24  ;;  %vm1071_vm7 = vcmp.eq.f32.partialorder %v1070_v44, 8.507059e+37 }
 0x344   :  { %vm1086_vm8 = vcmp.eq.f32.partialorder %v1085_v27, 8.507059e+37 }
 0x345   :  { %v2953_v1 = vpop.eup %2952 }
 0x346   :  { %v1060_v18 = vadd.f32 1.0, %v2953_v1  ;;  %v1088_v1 = vor.u32 1.1754944e-38, %v1087_v52 }
 0x347   :  { %v2955_v3 = vpop.eup %2954 }
 0x348   :  { %v2957_v61 = vpop.eup %2956  ;;  %v1062_v11 = vmul.f32 %v2955_v3, %v1058_v48  ;;  %2958 = vrcp.f32 %v1060_v18  ;;  %vm1067_vm1 = vweird.f32 %v2955_v3  ;;  %v1102_v24 = vand.u32 2147483648, %v1060_v18 }
 0x349   :  { %v1077_v2 = vmul.f32 %v2957_v61, %v1059_v6  ;;  %2960 = vtanh.f32 %v1046_v42  ;;  %vm1082_vm2 = vweird.f32 %v2957_v61  ;;  %vm1068_vm5 = vmor %vm1066_vm3, %vm1067_vm1  ;;  %vm1096_vm10 = vweird.f32 %v1060_v18 }
 0x34a   :  { %v1063_v45 = vsub.f32 1.0, %v1062_v11  ;;  %vm1083_vm6 = vmor %vm1081_vm4, %vm1082_vm2  ;;  %v1103_v44 = vor.u32 1.1754944e-38, %v1102_v24 }
 0x34b   :  { %v1078_v55 = vsub.f32 1.0, %v1077_v2 }
 0x34c   :  { %v1064_v47 = vmul.f32 %v2955_v3, %v1063_v45 }
 0x34d   :  { %v1079_v63 = vmul.f32 %v2957_v61, %v1078_v55 }
 0x34e   :  { %v2959_v28 = vpop.eup %2958  ;;  %v1065_v7 = vadd.f32 %v2955_v3, %v1064_v47 }
 0x34f   :  { %v1092_v60 = vmul.f32 %v2959_v28, %v1060_v18  ;;  %v1080_v13 = vadd.f32 %v2957_v61, %v1079_v63  ;;  %v2961_v42 = vpop.eup %2960  ;;  %vm1097_vm9 = vweird.f32 %v2959_v28 }
 0x350   :  { %v1069_v21 = vsel %vm1068_vm5, %v2955_v3, %v1065_v7  ;;  %v1100_v3 = vand.u32 2147483647, %v1060_v18  ;;  %vm1098_vm11 = vmor %vm1096_vm10, %vm1097_vm9 }
 0x351   :  { %v1093_v11 = vsub.f32 1.0, %v1092_v60  ;;  %v1074_v2 = vsel %vm1071_vm7, %v1073_v46, %v1069_v21  ;;  %v1084_v45 = vsel %vm1083_vm6, %v2957_v61, %v1080_v13 }
 0x352   :  { %v1089_v55 = vsel %vm1086_vm8, %v1088_v1, %v1084_v45  ;;  %v1108_v15 = vmul.f32 %v2961_v42, %v1074_v2  ;;  %vm1101_vm12 = vcmp.eq.f32.partialorder %v1100_v3, 8.507059e+37  ;;  %v4182_v1 = vld [vmem:[#allocation7_spill] sm:$0xff]  ;;  %v4183_v42 = vld [vmem:[#allocation8_spill] sm:$0xff] }
 0x353   :  { %v1107_v34 = vmul.f32 %v1089_v55, %v3592_v25  ;;  %v1094_v47 = vmul.f32 %v2959_v28, %v1093_v11 }
 0x355   :  { %v3639_v48 = vadd.f32 %v1108_v15, %v1107_v34  ;;  %v1095_v6 = vadd.f32 %v2959_v28, %v1094_v47  ;;  %v92_v34 = vpop.permute.xlu2 %91 }
 0x356   :  { %v173_v25 = vmul.f32 %v3265_v20, %v92_v34  ;;  %v174_v15 = vmul.f32 %v3278_v30, %v92_v34  ;;  %v175_v60 = vmul.f32 %v3280_v31, %v92_v34  ;;  %v176_v46 = vmul.f32 %v3286_v36, %v92_v34 }
 0x357   :  { %2962 = vtanh.f32 %v3639_v48  ;;  %v1099_v52 = vsel %vm1098_vm11, %v2959_v28, %v1095_v6 }
 0x358   :  { %v1104_v63 = vsel %vm1101_vm12, %v1103_v44, %v1099_v52  ;;  %v247_v18 = vadd.f32 %v3288_v37, %v173_v25  ;;  %v248_v28 = vadd.f32 %v3290_v38, %v174_v15  ;;  %v249_v21 = vadd.f32 %v4182_v1, %v175_v60 }
 0x359   :  { %v250_v11 = vadd.f32 %v4183_v42, %v176_v46 }
 0x35a   :  { %v301_v13 = vpack.c.bf16 %v248_v28, %v247_v18 }
 0x35b   :  { %v302_v3 = vpack.c.bf16 %v250_v11, %v249_v21 }
 0x35c   :  { %v1116_v2 = vunpack.c.l.bf16 %v301_v13  ;;  %v1117_v45 = vunpack.c.h.bf16 %v301_v13 }
 0x35d   :  { %v2963_v61 = vpop.eup %2962 }
 0x35e   :  { %v1111_v27 = vmul.f32 %v2963_v61, %v1104_v63  ;;  %v1118_v61 = vunpack.c.l.bf16 %v302_v3 }
 0x360   :  { %v1112_v7 = vpack.c.bf16 %v1111_v27, %v1111_v27 }
 0x362   :  { %1128 = vmatmul.bf16.vlgmr.msra.gmra.mxu0 %v1112_v7  ;;  %1141 = vmatmul.bf16.vlgmr.msra.gmra.mxu1 %v1112_v7 }
 0x363   :  { %1154 = vmatmul.bf16.vlgmr.msra.gmra.mxu2 %v1112_v7  ;;  %1167 = vmatmul.bf16.vlgmr.msra.gmra.mxu3 %v1112_v7 }
 0x364   :  { %1366 = vmatpush.bf16.msra.mxu0 %v3259_v12  ;;  %1379 = vmatpush.bf16.msra.mxu1 %v3261_v16 }
 0x365   :  { %1392 = vmatpush.bf16.msra.mxu2 %v3263_v17  ;;  %1405 = vmatpush.bf16.msra.mxu3 %v3271_v22 }
 0x368   :  { %1367 = vmatpush.bf16.msra.mxu0 %v3276_v26  ;;  %1380 = vmatpush.bf16.msra.mxu1 %v3282_v32 }
 0x369   :  { %1393 = vmatpush.bf16.msra.mxu2 %v3284_v33  ;;  %1406 = vmatpush.bf16.msra.mxu3 %v3293_v39 }
 0x36c   :  { %1368 = vmatpush.bf16.msra.mxu0 %v3298_v43  ;;  %1381 = vmatpush.bf16.msra.mxu1 %v3304_v49 }
 0x36d   :  { %1394 = vmatpush.bf16.msra.mxu2 %v3306_v50  ;;  %1407 = vmatpush.bf16.msra.mxu3 %v3309_v54 }
 0x370   :  { %1369 = vmatpush.bf16.msra.mxu0 %v3318_v62  ;;  %1382 = vmatpush.bf16.msra.mxu1 %v3325_v8 }
 0x371   :  { %1395 = vmatpush.bf16.msra.mxu2 %v3327_v9  ;;  %1408 = vmatpush.bf16.msra.mxu3 %v3329_v10 }
 0x374   :  { %1370 = vmatpush.bf16.msra.mxu0 %v3335_v19  ;;  %1383 = vmatpush.bf16.msra.mxu1 %v3340_v35 }
 0x375   :  { %1396 = vmatpush.bf16.msra.mxu2 %v3342_v40  ;;  %1409 = vmatpush.bf16.msra.mxu3 %v3344_v41 }
 0x378   :  { %1371 = vmatpush.bf16.msra.mxu0 %v3349_v53  ;;  %1384 = vmatpush.bf16.msra.mxu1 %v3351_v58 }
 0x379   :  { %1397 = vmatpush.bf16.msra.mxu2 %v3353_v59  ;;  %1410 = vmatpush.bf16.msra.mxu3 %v3356_v0 }
 0x37c   :  { %1372 = vmatpush.bf16.msra.mxu0 %v3359_v4  ;;  %1385 = vmatpush.bf16.msra.mxu1 %v3361_v5 }
 0x37d   :  { %1398 = vmatpush.bf16.msra.mxu2 %v3365_v14  ;;  %1411 = vmatpush.bf16.msra.mxu3 %v3367_v23 }
 0x380   :  { %1373 = vmatpush.bf16.msra.mxu0 %v3370_v29  ;;  %1386 = vmatpush.bf16.msra.mxu1 %v3373_v51 }
 0x381   :  { %1399 = vmatpush.bf16.msra.mxu2 %v3377_v56  ;;  %1412 = vmatpush.bf16.msra.mxu3 %v3379_v57 }
 0x3df   :  { %v1129_v55 = vpop.f32.mrf.mxu0  ;;  %v1142_v47 = vpop.f32.mrf.mxu1 }
 0x3e0   :  { %v1130_v6 = vadd.f32 %v1129_v55, %v1116_v2  ;;  %v1143_v24 = vadd.f32 %v1142_v47, %v1117_v45  ;;  %v1119_v2 = vunpack.c.h.bf16 %v302_v3 }
 0x3e2   :  { %v2804_v52 = vmul.f32 -1.442695, %v1130_v6  ;;  %v2805_v44 = vmul.f32 -1.442695, %v1143_v24 }
 0x3e4   :  { %2964 = vpow2.f32 %v2804_v52 }
 0x3e5   :  { %2966 = vpow2.f32 %v2805_v44 }
 0x3e6   :  { %v1155_v63 = vpop.f32.mrf.mxu2  ;;  %v1168_v27 = vpop.f32.mrf.mxu3 }
 0x3e7   :  { %v1156_v7 = vadd.f32 %v1155_v63, %v1118_v61  ;;  %v1131_v34 = vpop.f32.mrf.mxu0  ;;  %v1144_v25 = vpop.f32.mrf.mxu1  ;;  %v1169_v47 = vadd.f32 %v1168_v27, %v1119_v2 }
 0x3e9   :  { %v2806_v15 = vmul.f32 -1.442695, %v1156_v7 }
 0x3ea   :  { %v2965_v18 = vpop.eup %2964 }
 0x3eb   :  { %v2967_v28 = vpop.eup %2966  ;;  %v1181_v60 = vadd.f32 1.0, %v2965_v18  ;;  %2968 = vpow2.f32 %v2806_v15 }
 0x3ec   :  { %v1182_v46 = vadd.f32 1.0, %v2967_v28 }
 0x3ed   :  { %2970 = vrcp.f32 %v1181_v60  ;;  %v1195_v63 = vand.u32 2147483648, %v1181_v60  ;;  %v1193_v25 = vand.u32 2147483647, %v1181_v60  ;;  %vm1189_vm15 = vweird.f32 %v1181_v60 }
 0x3ee   :  { %2972 = vrcp.f32 %v1182_v46  ;;  %v1157_v13 = vpop.f32.mrf.mxu2  ;;  %v1170_v21 = vpop.f32.mrf.mxu3  ;;  %v1210_v7 = vand.u32 2147483648, %v1182_v46  ;;  %v1208_v18 = vand.u32 2147483647, %v1182_v46  ;;  %vm1204_vm0 = vweird.f32 %v1182_v46 }
 0x3ef   :  { %v1196_v13 = vor.u32 1.1754944e-38, %v1195_v63  ;;  %vm1194_vm2 = vcmp.eq.f32.partialorder %v1193_v25, 8.507059e+37 }
 0x3f0   :  { %v1211_v2 = vor.u32 1.1754944e-38, %v1210_v7  ;;  %vm1209_vm4 = vcmp.eq.f32.partialorder %v1208_v18, 8.507059e+37 }
 0x3f1   :  { %v2969_v11 = vpop.eup %2968 }
 0x3f2   :  { %v1183_v45 = vadd.f32 1.0, %v2969_v11 }
 0x3f3   :  { %v2971_v55 = vpop.eup %2970 }
 0x3f4   :  { %v2973_v6 = vpop.eup %2972  ;;  %v1185_v24 = vmul.f32 %v2971_v55, %v1181_v60  ;;  %2974 = vrcp.f32 %v1183_v45  ;;  %vm1190_vm13 = vweird.f32 %v2971_v55  ;;  %vm1219_vm6 = vweird.f32 %v1183_v45 }
 0x3f5   :  { %v1200_v52 = vmul.f32 %v2973_v6, %v1182_v46  ;;  %2976 = vtanh.f32 %v1169_v47  ;;  %vm1205_vm14 = vweird.f32 %v2973_v6  ;;  %vm1191_vm1 = vmor %vm1189_vm15, %vm1190_vm13  ;;  %v1223_v63 = vand.u32 2147483647, %v1183_v45 }
 0x3f6   :  { %v1186_v44 = vsub.f32 1.0, %v1185_v24  ;;  %vm1206_vm3 = vmor %vm1204_vm0, %vm1205_vm14 }
 0x3f7   :  { %v1201_v61 = vsub.f32 1.0, %v1200_v52  ;;  %vm1224_vm8 = vcmp.eq.f32.partialorder %v1223_v63, 8.507059e+37 }
 0x3f8   :  { %v1187_v34 = vmul.f32 %v2971_v55, %v1186_v44 }
 0x3f9   :  { %v1202_v15 = vmul.f32 %v2973_v6, %v1201_v61 }
 0x3fa   :  { %v2975_v28 = vpop.eup %2974  ;;  %v1188_v3 = vadd.f32 %v2971_v55, %v1187_v34 }
 0x3fb   :  { %v1215_v27 = vmul.f32 %v2975_v28, %v1183_v45  ;;  %v1203_v21 = vadd.f32 %v2973_v6, %v1202_v15  ;;  %v2977_v47 = vpop.eup %2976  ;;  %vm1220_vm5 = vweird.f32 %v2975_v28 }
 0x3fc   :  { %v1192_v11 = vsel %vm1191_vm1, %v2971_v55, %v1188_v3  ;;  %v1225_v55 = vand.u32 2147483648, %v1183_v45  ;;  %vm1221_vm7 = vmor %vm1219_vm6, %vm1220_vm5 }
 0x3fd   :  { %v1216_v24 = vsub.f32 1.0, %v1215_v27  ;;  %v1197_v52 = vsel %vm1194_vm2, %v1196_v13, %v1192_v11  ;;  %v1207_v44 = vsel %vm1206_vm3, %v2973_v6, %v1203_v21  ;;  %v4184_v11 = vld [vmem:[#allocation7_spill] sm:$0xff] }
 0x3fe   :  { %v1212_v61 = vsel %vm1209_vm4, %v1211_v2, %v1207_v44  ;;  %v1231_v42 = vmul.f32 %v2977_v47, %v1197_v52  ;;  %v1226_v25 = vor.u32 1.1754944e-38, %v1225_v55  ;;  %v4185_v47 = vld [vmem:[#allocation8_spill] sm:$0xff] }
 0x3ff   :  { %v1230_v1 = vmul.f32 %v1212_v61, %v3639_v48  ;;  %v1217_v34 = vmul.f32 %v2975_v28, %v1216_v24  ;;  %v97_v48 = vpop.permute.xlu0 %96 }
 0x400   :  { %v179_v27 = vmul.f32 %v3280_v31, %v97_v48  ;;  %v180_v13 = vmul.f32 %v3286_v36, %v97_v48 }
 0x401   :  { %v3683_v60 = vadd.f32 %v1231_v42, %v1230_v1  ;;  %v1218_v46 = vadd.f32 %v2975_v28, %v1217_v34  ;;  %v177_v1 = vmul.f32 %v3265_v20, %v97_v48  ;;  %v178_v42 = vmul.f32 %v3278_v30, %v97_v48 }
 0x402   :  { %v253_v2 = vadd.f32 %v4184_v11, %v179_v27  ;;  %v254_v24 = vadd.f32 %v4185_v47, %v180_v13 }
 0x403   :  { %2978 = vtanh.f32 %v3683_v60  ;;  %v1222_v7 = vsel %vm1221_vm7, %v2975_v28, %v1218_v46  ;;  %v251_v45 = vadd.f32 %v3288_v37, %v177_v1  ;;  %v252_v28 = vadd.f32 %v3290_v38, %v178_v42 }
 0x404   :  { %v1227_v15 = vsel %vm1224_vm8, %v1226_v25, %v1222_v7  ;;  %v304_v63 = vpack.c.bf16 %v254_v24, %v253_v2 }
 0x405   :  { %v303_v21 = vpack.c.bf16 %v252_v28, %v251_v45 }
 0x407   :  { %v1239_v52 = vunpack.c.l.bf16 %v303_v21  ;;  %v1240_v44 = vunpack.c.h.bf16 %v303_v21 }
 0x409   :  { %v2979_v6 = vpop.eup %2978 }
 0x40a   :  { %v1234_v18 = vmul.f32 %v2979_v6, %v1227_v15  ;;  %v1241_v6 = vunpack.c.l.bf16 %v304_v63 }
 0x40c   :  { %v1235_v3 = vpack.c.bf16 %v1234_v18, %v1234_v18 }
 0x40e   :  { %1251 = vmatmul.bf16.vlgmr.msrb.gmra.mxu0 %v1235_v3  ;;  %1264 = vmatmul.bf16.vlgmr.msrb.gmra.mxu1 %v1235_v3 }
 0x40f   :  { %1277 = vmatmul.bf16.vlgmr.msrb.gmra.mxu2 %v1235_v3  ;;  %1290 = vmatmul.bf16.vlgmr.msrb.gmra.mxu3 %v1235_v3 }
 0x410   :  { %1489 = vmatpush.bf16.msrb.mxu0 %v3259_v12  ;;  %1502 = vmatpush.bf16.msrb.mxu1 %v3261_v16 }
 0x411   :  { %1515 = vmatpush.bf16.msrb.mxu2 %v3263_v17  ;;  %1528 = vmatpush.bf16.msrb.mxu3 %v3271_v22 }
 0x414   :  { %1490 = vmatpush.bf16.msrb.mxu0 %v3276_v26  ;;  %1503 = vmatpush.bf16.msrb.mxu1 %v3282_v32 }
 0x415   :  { %1516 = vmatpush.bf16.msrb.mxu2 %v3284_v33  ;;  %1529 = vmatpush.bf16.msrb.mxu3 %v3293_v39 }
 0x418   :  { %1491 = vmatpush.bf16.msrb.mxu0 %v3298_v43  ;;  %1504 = vmatpush.bf16.msrb.mxu1 %v3304_v49 }
 0x419   :  { %1517 = vmatpush.bf16.msrb.mxu2 %v3306_v50  ;;  %1530 = vmatpush.bf16.msrb.mxu3 %v3309_v54 }
 0x41c   :  { %1492 = vmatpush.bf16.msrb.mxu0 %v3318_v62  ;;  %1505 = vmatpush.bf16.msrb.mxu1 %v3325_v8 }
 0x41d   :  { %1518 = vmatpush.bf16.msrb.mxu2 %v3327_v9  ;;  %1531 = vmatpush.bf16.msrb.mxu3 %v3329_v10 }
 0x420   :  { %1493 = vmatpush.bf16.msrb.mxu0 %v3335_v19  ;;  %1506 = vmatpush.bf16.msrb.mxu1 %v3340_v35 }
 0x421   :  { %1519 = vmatpush.bf16.msrb.mxu2 %v3342_v40  ;;  %1532 = vmatpush.bf16.msrb.mxu3 %v3344_v41 }
 0x424   :  { %1494 = vmatpush.bf16.msrb.mxu0 %v3349_v53  ;;  %1507 = vmatpush.bf16.msrb.mxu1 %v3351_v58 }
 0x425   :  { %1520 = vmatpush.bf16.msrb.mxu2 %v3353_v59  ;;  %1533 = vmatpush.bf16.msrb.mxu3 %v3356_v0 }
 0x428   :  { %1495 = vmatpush.bf16.msrb.mxu0 %v3359_v4  ;;  %1508 = vmatpush.bf16.msrb.mxu1 %v3361_v5 }
 0x429   :  { %1521 = vmatpush.bf16.msrb.mxu2 %v3365_v14  ;;  %1534 = vmatpush.bf16.msrb.mxu3 %v3367_v23 }
 0x42c   :  { %1496 = vmatpush.bf16.msrb.mxu0 %v3370_v29  ;;  %1509 = vmatpush.bf16.msrb.mxu1 %v3373_v51 }
 0x42d   :  { %1522 = vmatpush.bf16.msrb.mxu2 %v3377_v56  ;;  %1535 = vmatpush.bf16.msrb.mxu3 %v3379_v57 }
 0x48b   :  { %v1252_v61 = vpop.f32.mrf.mxu0  ;;  %v1265_v34 = vpop.f32.mrf.mxu1 }
 0x48c   :  { %v1253_v46 = vadd.f32 %v1252_v61, %v1239_v52  ;;  %v1266_v55 = vadd.f32 %v1265_v34, %v1240_v44  ;;  %v1242_v52 = vunpack.c.h.bf16 %v304_v63 }
 0x48e   :  { %v2807_v7 = vmul.f32 -1.442695, %v1253_v46  ;;  %v2808_v25 = vmul.f32 -1.442695, %v1266_v55 }
 0x490   :  { %2980 = vpow2.f32 %v2807_v7 }
 0x491   :  { %2982 = vpow2.f32 %v2808_v25 }
 0x492   :  { %v1278_v15 = vpop.f32.mrf.mxu2  ;;  %v1291_v18 = vpop.f32.mrf.mxu3 }
 0x493   :  { %v1279_v3 = vadd.f32 %v1278_v15, %v1241_v6  ;;  %v1254_v48 = vpop.f32.mrf.mxu0  ;;  %v1267_v1 = vpop.f32.mrf.mxu1  ;;  %v1292_v34 = vadd.f32 %v1291_v18, %v1242_v52 }
 0x495   :  { %v2809_v42 = vmul.f32 -1.442695, %v1279_v3 }
 0x496   :  { %v2981_v45 = vpop.eup %2980 }
 0x497   :  { %v2983_v28 = vpop.eup %2982  ;;  %v1304_v27 = vadd.f32 1.0, %v2981_v45  ;;  %2984 = vpow2.f32 %v2809_v42 }
 0x498   :  { %v1305_v13 = vadd.f32 1.0, %v2983_v28 }
 0x499   :  { %2986 = vrcp.f32 %v1304_v27  ;;  %v1318_v15 = vand.u32 2147483648, %v1304_v27  ;;  %v1316_v1 = vand.u32 2147483647, %v1304_v27  ;;  %vm1312_vm11 = vweird.f32 %v1304_v27 }
 0x49a   :  { %2988 = vrcp.f32 %v1305_v13  ;;  %v1280_v21 = vpop.f32.mrf.mxu2  ;;  %v1293_v2 = vpop.f32.mrf.mxu3  ;;  %v1333_v3 = vand.u32 2147483648, %v1305_v13  ;;  %v1331_v45 = vand.u32 2147483647, %v1305_v13  ;;  %vm1327_vm12 = vweird.f32 %v1305_v13 }
 0x49b   :  { %v1319_v21 = vor.u32 1.1754944e-38, %v1318_v15  ;;  %vm1317_vm15 = vcmp.eq.f32.partialorder %v1316_v1, 8.507059e+37 }
 0x49c   :  { %vm1332_vm0 = vcmp.eq.f32.partialorder %v1331_v45, 8.507059e+37 }
 0x49d   :  { %v2985_v24 = vpop.eup %2984 }
 0x49e   :  { %v1306_v44 = vadd.f32 1.0, %v2985_v24  ;;  %v1334_v24 = vor.u32 1.1754944e-38, %v1333_v3 }
 0x49f   :  { %v2987_v61 = vpop.eup %2986 }
 0x4a0   :  { %v2989_v46 = vpop.eup %2988  ;;  %v1308_v55 = vmul.f32 %v2987_v61, %v1304_v27  ;;  %2990 = vrcp.f32 %v1306_v44  ;;  %vm1313_vm9 = vweird.f32 %v2987_v61  ;;  %v1348_v15 = vand.u32 2147483648, %v1306_v44 }
 0x4a1   :  { %v1323_v7 = vmul.f32 %v2989_v46, %v1305_v13  ;;  %2992 = vtanh.f32 %v1292_v34  ;;  %vm1328_vm10 = vweird.f32 %v2989_v46  ;;  %vm1314_vm13 = vmor %vm1312_vm11, %vm1313_vm9  ;;  %vm1342_vm2 = vweird.f32 %v1306_v44 }
 0x4a2   :  { %v1309_v25 = vsub.f32 1.0, %v1308_v55  ;;  %vm1329_vm14 = vmor %vm1327_vm12, %vm1328_vm10  ;;  %v1349_v1 = vor.u32 1.1754944e-38, %v1348_v15 }
 0x4a3   :  { %v1324_v6 = vsub.f32 1.0, %v1323_v7 }
 0x4a4   :  { %v1310_v48 = vmul.f32 %v2987_v61, %v1309_v25 }
 0x4a5   :  { %v1325_v42 = vmul.f32 %v2989_v46, %v1324_v6 }
 0x4a6   :  { %v2991_v28 = vpop.eup %2990  ;;  %v1311_v63 = vadd.f32 %v2987_v61, %v1310_v48 }
 0x4a7   :  { %v1338_v18 = vmul.f32 %v2991_v28, %v1306_v44  ;;  %v1326_v2 = vadd.f32 %v2989_v46, %v1325_v42  ;;  %v2993_v34 = vpop.eup %2992  ;;  %vm1343_vm1 = vweird.f32 %v2991_v28 }
 0x4a8   :  { %v1315_v52 = vsel %vm1314_vm13, %v2987_v61, %v1311_v63  ;;  %v1346_v61 = vand.u32 2147483647, %v1306_v44  ;;  %vm1344_vm3 = vmor %vm1342_vm2, %vm1343_vm1 }
 0x4a9   :  { %v1339_v55 = vsub.f32 1.0, %v1338_v18  ;;  %v1320_v7 = vsel %vm1317_vm15, %v1319_v21, %v1315_v52  ;;  %v1330_v25 = vsel %vm1329_vm14, %v2989_v46, %v1326_v2 }
 0x4aa   :  { %v1335_v6 = vsel %vm1332_vm0, %v1334_v24, %v1330_v25  ;;  %v1354_v47 = vmul.f32 %v2993_v34, %v1320_v7  ;;  %vm1347_vm4 = vcmp.eq.f32.partialorder %v1346_v61, 8.507059e+37  ;;  %v4186_v24 = vld [vmem:[#allocation7_spill] sm:$0xff]  ;;  %v4187_v34 = vld [vmem:[#allocation8_spill] sm:$0xff] }
 0x4ab   :  { %v1353_v11 = vmul.f32 %v1335_v6, %v3683_v60  ;;  %v1340_v48 = vmul.f32 %v2991_v28, %v1339_v55  ;;  %v102_v60 = vpop.permute.xlu1 %101 }
 0x4ac   :  { %v183_v18 = vmul.f32 %v3280_v31, %v102_v60  ;;  %v184_v21 = vmul.f32 %v3286_v36, %v102_v60 }
 0x4ad   :  { %v3727_v27 = vadd.f32 %v1354_v47, %v1353_v11  ;;  %v1341_v13 = vadd.f32 %v2991_v28, %v1340_v48  ;;  %v181_v11 = vmul.f32 %v3265_v20, %v102_v60  ;;  %v182_v47 = vmul.f32 %v3278_v30, %v102_v60 }
 0x4ae   :  { %v257_v52 = vadd.f32 %v4186_v24, %v183_v18  ;;  %v258_v55 = vadd.f32 %v4187_v34, %v184_v21 }
 0x4af   :  { %2994 = vtanh.f32 %v3727_v27  ;;  %v1345_v3 = vsel %vm1344_vm3, %v2991_v28, %v1341_v13  ;;  %v255_v44 = vadd.f32 %v3288_v37, %v181_v11  ;;  %v256_v28 = vadd.f32 %v3290_v38, %v182_v47 }
 0x4b0   :  { %v1350_v42 = vsel %vm1347_vm4, %v1349_v1, %v1345_v3  ;;  %v306_v61 = vpack.c.bf16 %v258_v55, %v257_v52 }
 0x4b1   :  { %v305_v2 = vpack.c.bf16 %v256_v28, %v255_v44 }
 0x4b3   :  { %v1362_v7 = vunpack.c.l.bf16 %v305_v2  ;;  %v1363_v25 = vunpack.c.h.bf16 %v305_v2 }
 0x4b5   :  { %v2995_v46 = vpop.eup %2994 }
 0x4b6   :  { %v1357_v45 = vmul.f32 %v2995_v46, %v1350_v42  ;;  %v1364_v46 = vunpack.c.l.bf16 %v306_v61 }
 0x4b8   :  { %v1358_v63 = vpack.c.bf16 %v1357_v45, %v1357_v45 }
 0x4ba   :  { %1374 = vmatmul.bf16.vlgmr.msra.gmra.mxu0 %v1358_v63  ;;  %1387 = vmatmul.bf16.vlgmr.msra.gmra.mxu1 %v1358_v63 }
 0x4bb   :  { %1400 = vmatmul.bf16.vlgmr.msra.gmra.mxu2 %v1358_v63  ;;  %1413 = vmatmul.bf16.vlgmr.msra.gmra.mxu3 %v1358_v63 }
 0x4bc   :  { %1612 = vmatpush.bf16.msra.mxu0 %v3259_v12  ;;  %1625 = vmatpush.bf16.msra.mxu1 %v3261_v16 }
 0x4bd   :  { %1638 = vmatpush.bf16.msra.mxu2 %v3263_v17  ;;  %1651 = vmatpush.bf16.msra.mxu3 %v3271_v22 }
 0x4c0   :  { %1613 = vmatpush.bf16.msra.mxu0 %v3276_v26  ;;  %1626 = vmatpush.bf16.msra.mxu1 %v3282_v32 }
 0x4c1   :  { %1639 = vmatpush.bf16.msra.mxu2 %v3284_v33  ;;  %1652 = vmatpush.bf16.msra.mxu3 %v3293_v39 }
 0x4c4   :  { %1614 = vmatpush.bf16.msra.mxu0 %v3298_v43  ;;  %1627 = vmatpush.bf16.msra.mxu1 %v3304_v49 }
 0x4c5   :  { %1640 = vmatpush.bf16.msra.mxu2 %v3306_v50  ;;  %1653 = vmatpush.bf16.msra.mxu3 %v3309_v54 }
 0x4c8   :  { %1615 = vmatpush.bf16.msra.mxu0 %v3318_v62  ;;  %1628 = vmatpush.bf16.msra.mxu1 %v3325_v8 }
 0x4c9   :  { %1641 = vmatpush.bf16.msra.mxu2 %v3327_v9  ;;  %1654 = vmatpush.bf16.msra.mxu3 %v3329_v10 }
 0x4cc   :  { %1616 = vmatpush.bf16.msra.mxu0 %v3335_v19  ;;  %1629 = vmatpush.bf16.msra.mxu1 %v3340_v35 }
 0x4cd   :  { %1642 = vmatpush.bf16.msra.mxu2 %v3342_v40  ;;  %1655 = vmatpush.bf16.msra.mxu3 %v3344_v41 }
 0x4d0   :  { %1617 = vmatpush.bf16.msra.mxu0 %v3349_v53  ;;  %1630 = vmatpush.bf16.msra.mxu1 %v3351_v58 }
 0x4d1   :  { %1643 = vmatpush.bf16.msra.mxu2 %v3353_v59  ;;  %1656 = vmatpush.bf16.msra.mxu3 %v3356_v0 }
 0x4d4   :  { %1618 = vmatpush.bf16.msra.mxu0 %v3359_v4  ;;  %1631 = vmatpush.bf16.msra.mxu1 %v3361_v5 }
 0x4d5   :  { %1644 = vmatpush.bf16.msra.mxu2 %v3365_v14  ;;  %1657 = vmatpush.bf16.msra.mxu3 %v3367_v23 }
 0x4d8   :  { %1619 = vmatpush.bf16.msra.mxu0 %v3370_v29  ;;  %1632 = vmatpush.bf16.msra.mxu1 %v3373_v51 }
 0x4d9   :  { %1645 = vmatpush.bf16.msra.mxu2 %v3377_v56  ;;  %1658 = vmatpush.bf16.msra.mxu3 %v3379_v57 }
 0x537   :  { %v1375_v6 = vpop.f32.mrf.mxu0  ;;  %v1388_v48 = vpop.f32.mrf.mxu1 }
 0x538   :  { %v1376_v13 = vadd.f32 %v1375_v6, %v1362_v7  ;;  %v1389_v15 = vadd.f32 %v1388_v48, %v1363_v25  ;;  %v1365_v7 = vunpack.c.h.bf16 %v306_v61 }
 0x53a   :  { %v2810_v3 = vmul.f32 -1.442695, %v1376_v13  ;;  %v2811_v1 = vmul.f32 -1.442695, %v1389_v15 }
 0x53c   :  { %2996 = vpow2.f32 %v2810_v3 }
 0x53d   :  { %2998 = vpow2.f32 %v2811_v1 }
 0x53e   :  { %v1401_v42 = vpop.f32.mrf.mxu2  ;;  %v1414_v45 = vpop.f32.mrf.mxu3 }
 0x53f   :  { %v1402_v63 = vadd.f32 %v1401_v42, %v1364_v46  ;;  %v1377_v60 = vpop.f32.mrf.mxu0  ;;  %v1390_v11 = vpop.f32.mrf.mxu1  ;;  %v1415_v48 = vadd.f32 %v1414_v45, %v1365_v7 }
 0x541   :  { %v2812_v47 = vmul.f32 -1.442695, %v1402_v63 }
 0x542   :  { %v2997_v44 = vpop.eup %2996 }
 0x543   :  { %v2999_v28 = vpop.eup %2998  ;;  %v1427_v18 = vadd.f32 1.0, %v2997_v44  ;;  %3000 = vpow2.f32 %v2812_v47 }
 0x544   :  { %v1428_v21 = vadd.f32 1.0, %v2999_v28 }
 0x545   :  { %3002 = vrcp.f32 %v1427_v18  ;;  %v1441_v42 = vand.u32 2147483648, %v1427_v18  ;;  %v1439_v11 = vand.u32 2147483647, %v1427_v18  ;;  %vm1435_vm7 = vweird.f32 %v1427_v18 }
 0x546   :  { %3004 = vrcp.f32 %v1428_v21  ;;  %v1403_v2 = vpop.f32.mrf.mxu2  ;;  %v1416_v52 = vpop.f32.mrf.mxu3  ;;  %v1456_v63 = vand.u32 2147483648, %v1428_v21  ;;  %v1454_v44 = vand.u32 2147483647, %v1428_v21  ;;  %vm1450_vm8 = vweird.f32 %v1428_v21 }
 0x547   :  { %v1442_v2 = vor.u32 1.1754944e-38, %v1441_v42  ;;  %vm1440_vm11 = vcmp.eq.f32.partialorder %v1439_v11, 8.507059e+37 }
 0x548   :  { %vm1455_vm12 = vcmp.eq.f32.partialorder %v1454_v44, 8.507059e+37 }
 0x549   :  { %v3001_v55 = vpop.eup %3000 }
 0x54a   :  { %v1429_v25 = vadd.f32 1.0, %v3001_v55  ;;  %v1457_v55 = vor.u32 1.1754944e-38, %v1456_v63 }
 0x54b   :  { %v3003_v6 = vpop.eup %3002 }
 0x54c   :  { %v3005_v13 = vpop.eup %3004  ;;  %v1431_v15 = vmul.f32 %v3003_v6, %v1427_v18  ;;  %3006 = vrcp.f32 %v1429_v25  ;;  %vm1436_vm5 = vweird.f32 %v3003_v6  ;;  %v1471_v42 = vand.u32 2147483648, %v1429_v25 }
 0x54d   :  { %v1446_v3 = vmul.f32 %v3005_v13, %v1428_v21  ;;  %3008 = vtanh.f32 %v1415_v48  ;;  %vm1451_vm6 = vweird.f32 %v3005_v13  ;;  %vm1437_vm9 = vmor %vm1435_vm7, %vm1436_vm5  ;;  %vm1465_vm14 = vweird.f32 %v1429_v25 }
 0x54e   :  { %v1432_v1 = vsub.f32 1.0, %v1431_v15  ;;  %vm1452_vm10 = vmor %vm1450_vm8, %vm1451_vm6  ;;  %v1472_v11 = vor.u32 1.1754944e-38, %v1471_v42 }
 0x54f   :  { %v1447_v46 = vsub.f32 1.0, %v1446_v3 }
 0x550   :  { %v1433_v60 = vmul.f32 %v3003_v6, %v1432_v1 }
 0x551   :  { %v1448_v47 = vmul.f32 %v3005_v13, %v1447_v46 }
 0x552   :  { %v3007_v28 = vpop.eup %3006  ;;  %v1434_v61 = vadd.f32 %v3003_v6, %v1433_v60 }
 0x553   :  { %v1461_v45 = vmul.f32 %v3007_v28, %v1429_v25  ;;  %v1449_v52 = vadd.f32 %v3005_v13, %v1448_v47  ;;  %v3009_v48 = vpop.eup %3008  ;;  %vm1466_vm13 = vweird.f32 %v3007_v28 }
 0x554   :  { %v1438_v7 = vsel %vm1437_vm9, %v3003_v6, %v1434_v61  ;;  %v1469_v6 = vand.u32 2147483647, %v1429_v25  ;;  %vm1467_vm15 = vmor %vm1465_vm14, %vm1466_vm13 }
 0x555   :  { %v1462_v15 = vsub.f32 1.0, %v1461_v45  ;;  %v1443_v3 = vsel %vm1440_vm11, %v1442_v2, %v1438_v7  ;;  %v1453_v1 = vsel %vm1452_vm10, %v3005_v13, %v1449_v52 }
 0x556   :  { %v1458_v46 = vsel %vm1455_vm12, %v1457_v55, %v1453_v1  ;;  %v1477_v34 = vmul.f32 %v3009_v48, %v1443_v3  ;;  %vm1470_vm0 = vcmp.eq.f32.partialorder %v1469_v6, 8.507059e+37  ;;  %v4188_v55 = vld [vmem:[#allocation7_spill] sm:$0xff]  ;;  %v4189_v48 = vld [vmem:[#allocation8_spill] sm:$0xff] }
 0x557   :  { %v1476_v24 = vmul.f32 %v1458_v46, %v3727_v27  ;;  %v1463_v60 = vmul.f32 %v3007_v28, %v1462_v15  ;;  %v107_v27 = vpop.permute.xlu2 %106 }
 0x558   :  { %v187_v45 = vmul.f32 %v3280_v31, %v107_v27  ;;  %v188_v2 = vmul.f32 %v3286_v36, %v107_v27 }
 0x559   :  { %v3771_v18 = vadd.f32 %v1477_v34, %v1476_v24  ;;  %v1464_v21 = vadd.f32 %v3007_v28, %v1463_v60  ;;  %v185_v24 = vmul.f32 %v3265_v20, %v107_v27  ;;  %v186_v34 = vmul.f32 %v3278_v30, %v107_v27 }
 0x55a   :  { %v261_v7 = vadd.f32 %v4188_v55, %v187_v45  ;;  %v262_v15 = vadd.f32 %v4189_v48, %v188_v2 }
 0x55b   :  { %3010 = vtanh.f32 %v3771_v18  ;;  %v1468_v63 = vsel %vm1467_vm15, %v3007_v28, %v1464_v21  ;;  %v259_v25 = vadd.f32 %v3288_v37, %v185_v24  ;;  %v260_v28 = vadd.f32 %v3290_v38, %v186_v34 }
 0x55c   :  { %v1473_v47 = vsel %vm1470_vm0, %v1472_v11, %v1468_v63  ;;  %v308_v6 = vpack.c.bf16 %v262_v15, %v261_v7 }
 0x55d   :  { %v307_v52 = vpack.c.bf16 %v260_v28, %v259_v25 }
 0x55f   :  { %v1485_v3 = vunpack.c.l.bf16 %v307_v52  ;;  %v1486_v1 = vunpack.c.h.bf16 %v307_v52 }
 0x561   :  { %v3011_v13 = vpop.eup %3010 }
 0x562   :  { %v1480_v44 = vmul.f32 %v3011_v13, %v1473_v47  ;;  %v1487_v13 = vunpack.c.l.bf16 %v308_v6 }
 0x564   :  { %v1481_v61 = vpack.c.bf16 %v1480_v44, %v1480_v44 }
 0x566   :  { %1497 = vmatmul.bf16.vlgmr.msrb.gmra.mxu0 %v1481_v61  ;;  %1510 = vmatmul.bf16.vlgmr.msrb.gmra.mxu1 %v1481_v61 }
 0x567   :  { %1523 = vmatmul.bf16.vlgmr.msrb.gmra.mxu2 %v1481_v61  ;;  %1536 = vmatmul.bf16.vlgmr.msrb.gmra.mxu3 %v1481_v61 }
 0x568   :  { %1735 = vmatpush.bf16.msrb.mxu0 %v3259_v12  ;;  %1748 = vmatpush.bf16.msrb.mxu1 %v3261_v16 }
 0x569   :  { %1761 = vmatpush.bf16.msrb.mxu2 %v3263_v17  ;;  %1774 = vmatpush.bf16.msrb.mxu3 %v3271_v22 }
 0x56c   :  { %1736 = vmatpush.bf16.msrb.mxu0 %v3276_v26  ;;  %1749 = vmatpush.bf16.msrb.mxu1 %v3282_v32 }
 0x56d   :  { %1762 = vmatpush.bf16.msrb.mxu2 %v3284_v33  ;;  %1775 = vmatpush.bf16.msrb.mxu3 %v3293_v39 }
 0x570   :  { %1737 = vmatpush.bf16.msrb.mxu0 %v3298_v43  ;;  %1750 = vmatpush.bf16.msrb.mxu1 %v3304_v49 }
 0x571   :  { %1763 = vmatpush.bf16.msrb.mxu2 %v3306_v50  ;;  %1776 = vmatpush.bf16.msrb.mxu3 %v3309_v54 }
 0x574   :  { %1738 = vmatpush.bf16.msrb.mxu0 %v3318_v62  ;;  %1751 = vmatpush.bf16.msrb.mxu1 %v3325_v8 }
 0x575   :  { %1764 = vmatpush.bf16.msrb.mxu2 %v3327_v9  ;;  %1777 = vmatpush.bf16.msrb.mxu3 %v3329_v10 }
 0x578   :  { %1739 = vmatpush.bf16.msrb.mxu0 %v3335_v19  ;;  %1752 = vmatpush.bf16.msrb.mxu1 %v3340_v35 }
 0x579   :  { %1765 = vmatpush.bf16.msrb.mxu2 %v3342_v40  ;;  %1778 = vmatpush.bf16.msrb.mxu3 %v3344_v41 }
 0x57c   :  { %1740 = vmatpush.bf16.msrb.mxu0 %v3349_v53  ;;  %1753 = vmatpush.bf16.msrb.mxu1 %v3351_v58 }
 0x57d   :  { %1766 = vmatpush.bf16.msrb.mxu2 %v3353_v59  ;;  %1779 = vmatpush.bf16.msrb.mxu3 %v3356_v0 }
 0x580   :  { %1741 = vmatpush.bf16.msrb.mxu0 %v3359_v4  ;;  %1754 = vmatpush.bf16.msrb.mxu1 %v3361_v5 }
 0x581   :  { %1767 = vmatpush.bf16.msrb.mxu2 %v3365_v14  ;;  %1780 = vmatpush.bf16.msrb.mxu3 %v3367_v23 }
 0x584   :  { %1742 = vmatpush.bf16.msrb.mxu0 %v3370_v29  ;;  %1755 = vmatpush.bf16.msrb.mxu1 %v3373_v51 }
 0x585   :  { %1768 = vmatpush.bf16.msrb.mxu2 %v3377_v56  ;;  %1781 = vmatpush.bf16.msrb.mxu3 %v3379_v57 }
 0x5e3   :  { %v1498_v46 = vpop.f32.mrf.mxu0  ;;  %v1511_v60 = vpop.f32.mrf.mxu1 }
 0x5e4   :  { %v1499_v21 = vadd.f32 %v1498_v46, %v1485_v3  ;;  %v1512_v42 = vadd.f32 %v1511_v60, %v1486_v1  ;;  %v1488_v3 = vunpack.c.h.bf16 %v308_v6 }
 0x5e6   :  { %v2813_v63 = vmul.f32 -1.442695, %v1499_v21  ;;  %v2814_v11 = vmul.f32 -1.442695, %v1512_v42 }
 0x5e8   :  { %3012 = vpow2.f32 %v2813_v63 }
 0x5e9   :  { %3014 = vpow2.f32 %v2814_v11 }
 0x5ea   :  { %v1524_v47 = vpop.f32.mrf.mxu2  ;;  %v1537_v44 = vpop.f32.mrf.mxu3 }
 0x5eb   :  { %v1525_v61 = vadd.f32 %v1524_v47, %v1487_v13  ;;  %v1500_v27 = vpop.f32.mrf.mxu0  ;;  %v1513_v24 = vpop.f32.mrf.mxu1  ;;  %v1538_v60 = vadd.f32 %v1537_v44, %v1488_v3 }
 0x5ed   :  { %v2815_v34 = vmul.f32 -1.442695, %v1525_v61 }
 0x5ee   :  { %v3013_v25 = vpop.eup %3012 }
 0x5ef   :  { %v3015_v28 = vpop.eup %3014  ;;  %v1550_v45 = vadd.f32 1.0, %v3013_v25  ;;  %3016 = vpow2.f32 %v2815_v34 }
 0x5f0   :  { %v1551_v2 = vadd.f32 1.0, %v3015_v28 }
 0x5f1   :  { %3018 = vrcp.f32 %v1550_v45  ;;  %v1564_v47 = vand.u32 2147483648, %v1550_v45  ;;  %v1562_v24 = vand.u32 2147483647, %v1550_v45  ;;  %vm1558_vm3 = vweird.f32 %v1550_v45 }
 0x5f2   :  { %3020 = vrcp.f32 %v1551_v2  ;;  %v1526_v52 = vpop.f32.mrf.mxu2  ;;  %v1539_v7 = vpop.f32.mrf.mxu3  ;;  %v1579_v61 = vand.u32 2147483648, %v1551_v2  ;;  %v1577_v25 = vand.u32 2147483647, %v1551_v2  ;;  %vm1573_vm4 = vweird.f32 %v1551_v2 }
 0x5f3   :  { %v1565_v52 = vor.u32 1.1754944e-38, %v1564_v47  ;;  %vm1563_vm7 = vcmp.eq.f32.partialorder %v1562_v24, 8.507059e+37 }
 0x5f4   :  { %vm1578_vm8 = vcmp.eq.f32.partialorder %v1577_v25, 8.507059e+37 }
 0x5f5   :  { %v3017_v15 = vpop.eup %3016 }
 0x5f6   :  { %v1552_v1 = vadd.f32 1.0, %v3017_v15  ;;  %v1580_v15 = vor.u32 1.1754944e-38, %v1579_v61 }
 0x5f7   :  { %v3019_v46 = vpop.eup %3018 }
 0x5f8   :  { %v3021_v21 = vpop.eup %3020  ;;  %v1554_v42 = vmul.f32 %v3019_v46, %v1550_v45  ;;  %3022 = vrcp.f32 %v1552_v1  ;;  %vm1559_vm1 = vweird.f32 %v3019_v46  ;;  %v1594_v47 = vand.u32 2147483648, %v1552_v1 }
 0x5f9   :  { %v1569_v63 = vmul.f32 %v3021_v21, %v1551_v2  ;;  %3024 = vtanh.f32 %v1538_v60  ;;  %vm1574_vm2 = vweird.f32 %v3021_v21  ;;  %vm1560_vm5 = vmor %vm1558_vm3, %vm1559_vm1  ;;  %vm1588_vm10 = vweird.f32 %v1552_v1 }
 0x5fa   :  { %v1555_v11 = vsub.f32 1.0, %v1554_v42  ;;  %vm1575_vm6 = vmor %vm1573_vm4, %vm1574_vm2  ;;  %v1595_v24 = vor.u32 1.1754944e-38, %v1594_v47 }
 0x5fb   :  { %v1570_v13 = vsub.f32 1.0, %v1569_v63 }
 0x5fc   :  { %v1556_v27 = vmul.f32 %v3019_v46, %v1555_v11 }
 0x5fd   :  { %v1571_v34 = vmul.f32 %v3021_v21, %v1570_v13 }
 0x5fe   :  { %v3023_v28 = vpop.eup %3022  ;;  %v1557_v6 = vadd.f32 %v3019_v46, %v1556_v27 }
 0x5ff   :  { %v1584_v44 = vmul.f32 %v3023_v28, %v1552_v1  ;;  %v1572_v7 = vadd.f32 %v3021_v21, %v1571_v34  ;;  %v3025_v60 = vpop.eup %3024  ;;  %vm1589_vm9 = vweird.f32 %v3023_v28 }
 0x600   :  { %v1561_v3 = vsel %vm1560_vm5, %v3019_v46, %v1557_v6  ;;  %v1592_v46 = vand.u32 2147483647, %v1552_v1  ;;  %vm1590_vm11 = vmor %vm1588_vm10, %vm1589_vm9 }
 0x601   :  { %v1585_v42 = vsub.f32 1.0, %v1584_v44  ;;  %v1566_v63 = vsel %vm1563_vm7, %v1565_v52, %v1561_v3  ;;  %v1576_v11 = vsel %vm1575_vm6, %v3021_v21, %v1572_v7 }
 0x602   :  { %v1581_v13 = vsel %vm1578_vm8, %v1580_v15, %v1576_v11  ;;  %v1600_v48 = vmul.f32 %v3025_v60, %v1566_v63  ;;  %vm1593_vm12 = vcmp.eq.f32.partialorder %v1592_v46, 8.507059e+37  ;;  %v4190_v15 = vld [vmem:[#allocation7_spill] sm:$0xff]  ;;  %v4191_v60 = vld [vmem:[#allocation8_spill] sm:$0xff] }
 0x603   :  { %v1599_v55 = vmul.f32 %v1581_v13, %v3771_v18  ;;  %v1586_v27 = vmul.f32 %v3023_v28, %v1585_v42  ;;  %v112_v18 = vpop.permute.xlu0 %111 }
 0x604   :  { %v191_v44 = vmul.f32 %v3280_v31, %v112_v18  ;;  %v192_v52 = vmul.f32 %v3286_v36, %v112_v18 }
 0x605   :  { %v3815_v45 = vadd.f32 %v1600_v48, %v1599_v55  ;;  %v1587_v2 = vadd.f32 %v3023_v28, %v1586_v27  ;;  %v189_v55 = vmul.f32 %v3265_v20, %v112_v18  ;;  %v190_v48 = vmul.f32 %v3278_v30, %v112_v18 }
 0x606   :  { %v265_v3 = vadd.f32 %v4190_v15, %v191_v44  ;;  %v266_v42 = vadd.f32 %v4191_v60, %v192_v52 }
 0x607   :  { %3026 = vtanh.f32 %v3815_v45  ;;  %v1591_v61 = vsel %vm1590_vm11, %v3023_v28, %v1587_v2  ;;  %v263_v1 = vadd.f32 %v3288_v37, %v189_v55  ;;  %v264_v28 = vadd.f32 %v3290_v38, %v190_v48 }
 0x608   :  { %v1596_v34 = vsel %vm1593_vm12, %v1595_v24, %v1591_v61  ;;  %v310_v46 = vpack.c.bf16 %v266_v42, %v265_v3 }
 0x609   :  { %v309_v7 = vpack.c.bf16 %v264_v28, %v263_v1 }
 0x60b   :  { %v1608_v63 = vunpack.c.l.bf16 %v309_v7  ;;  %v1609_v11 = vunpack.c.h.bf16 %v309_v7 }
 0x60d   :  { %v3027_v21 = vpop.eup %3026 }
 0x60e   :  { %v1603_v25 = vmul.f32 %v3027_v21, %v1596_v34  ;;  %v1610_v21 = vunpack.c.l.bf16 %v310_v46 }
 0x610   :  { %v1604_v6 = vpack.c.bf16 %v1603_v25, %v1603_v25 }
 0x612   :  { %1620 = vmatmul.bf16.vlgmr.msra.gmra.mxu0 %v1604_v6  ;;  %1633 = vmatmul.bf16.vlgmr.msra.gmra.mxu1 %v1604_v6 }
 0x613   :  { %1646 = vmatmul.bf16.vlgmr.msra.gmra.mxu2 %v1604_v6  ;;  %1659 = vmatmul.bf16.vlgmr.msra.gmra.mxu3 %v1604_v6 }
 0x614   :  { %1858 = vmatpush.bf16.msra.mxu0 %v3259_v12  ;;  %1871 = vmatpush.bf16.msra.mxu1 %v3261_v16 }
 0x615   :  { %1884 = vmatpush.bf16.msra.mxu2 %v3263_v17  ;;  %1897 = vmatpush.bf16.msra.mxu3 %v3271_v22 }
 0x618   :  { %1859 = vmatpush.bf16.msra.mxu0 %v3276_v26  ;;  %1872 = vmatpush.bf16.msra.mxu1 %v3282_v32 }
 0x619   :  { %1885 = vmatpush.bf16.msra.mxu2 %v3284_v33  ;;  %1898 = vmatpush.bf16.msra.mxu3 %v3293_v39 }
 0x61c   :  { %1860 = vmatpush.bf16.msra.mxu0 %v3298_v43  ;;  %1873 = vmatpush.bf16.msra.mxu1 %v3304_v49 }
 0x61d   :  { %1886 = vmatpush.bf16.msra.mxu2 %v3306_v50  ;;  %1899 = vmatpush.bf16.msra.mxu3 %v3309_v54 }
 0x620   :  { %1861 = vmatpush.bf16.msra.mxu0 %v3318_v62  ;;  %1874 = vmatpush.bf16.msra.mxu1 %v3325_v8 }
 0x621   :  { %1887 = vmatpush.bf16.msra.mxu2 %v3327_v9  ;;  %1900 = vmatpush.bf16.msra.mxu3 %v3329_v10 }
 0x624   :  { %1862 = vmatpush.bf16.msra.mxu0 %v3335_v19  ;;  %1875 = vmatpush.bf16.msra.mxu1 %v3340_v35 }
 0x625   :  { %1888 = vmatpush.bf16.msra.mxu2 %v3342_v40  ;;  %1901 = vmatpush.bf16.msra.mxu3 %v3344_v41 }
 0x628   :  { %1863 = vmatpush.bf16.msra.mxu0 %v3349_v53  ;;  %1876 = vmatpush.bf16.msra.mxu1 %v3351_v58 }
 0x629   :  { %1889 = vmatpush.bf16.msra.mxu2 %v3353_v59  ;;  %1902 = vmatpush.bf16.msra.mxu3 %v3356_v0 }
 0x62c   :  { %1864 = vmatpush.bf16.msra.mxu0 %v3359_v4  ;;  %1877 = vmatpush.bf16.msra.mxu1 %v3361_v5 }
 0x62d   :  { %1890 = vmatpush.bf16.msra.mxu2 %v3365_v14  ;;  %1903 = vmatpush.bf16.msra.mxu3 %v3367_v23 }
 0x630   :  { %1865 = vmatpush.bf16.msra.mxu0 %v3370_v29  ;;  %1878 = vmatpush.bf16.msra.mxu1 %v3373_v51 }
 0x631   :  { %1891 = vmatpush.bf16.msra.mxu2 %v3377_v56  ;;  %1904 = vmatpush.bf16.msra.mxu3 %v3379_v57 }
 0x68f   :  { %v1621_v13 = vpop.f32.mrf.mxu0  ;;  %v1634_v27 = vpop.f32.mrf.mxu1 }
 0x690   :  { %v1622_v2 = vadd.f32 %v1621_v13, %v1608_v63  ;;  %v1635_v47 = vadd.f32 %v1634_v27, %v1609_v11  ;;  %v1611_v63 = vunpack.c.h.bf16 %v310_v46 }
 0x692   :  { %v2816_v61 = vmul.f32 -1.442695, %v1622_v2  ;;  %v2817_v24 = vmul.f32 -1.442695, %v1635_v47 }
 0x694   :  { %3028 = vpow2.f32 %v2816_v61 }
 0x695   :  { %3030 = vpow2.f32 %v2817_v24 }
 0x696   :  { %v1647_v34 = vpop.f32.mrf.mxu2  ;;  %v1660_v25 = vpop.f32.mrf.mxu3 }
 0x697   :  { %v1648_v6 = vadd.f32 %v1647_v34, %v1610_v21  ;;  %v1623_v18 = vpop.f32.mrf.mxu0  ;;  %v1636_v55 = vpop.f32.mrf.mxu1  ;;  %v1661_v27 = vadd.f32 %v1660_v25, %v1611_v63 }
 0x699   :  { %v2818_v48 = vmul.f32 -1.442695, %v1648_v6 }
 0x69a   :  { %v3029_v1 = vpop.eup %3028 }
 0x69b   :  { %v3031_v28 = vpop.eup %3030  ;;  %v1673_v44 = vadd.f32 1.0, %v3029_v1  ;;  %3032 = vpow2.f32 %v2818_v48 }
 0x69c   :  { %v1674_v52 = vadd.f32 1.0, %v3031_v28 }
 0x69d   :  { %3034 = vrcp.f32 %v1673_v44  ;;  %v1687_v34 = vand.u32 2147483648, %v1673_v44  ;;  %v1685_v55 = vand.u32 2147483647, %v1673_v44  ;;  %vm1681_vm15 = vweird.f32 %v1673_v44 }
 0x69e   :  { %3036 = vrcp.f32 %v1674_v52  ;;  %v1649_v7 = vpop.f32.mrf.mxu2  ;;  %v1662_v3 = vpop.f32.mrf.mxu3  ;;  %v1702_v6 = vand.u32 2147483648, %v1674_v52  ;;  %v1700_v1 = vand.u32 2147483647, %v1674_v52  ;;  %vm1696_vm0 = vweird.f32 %v1674_v52 }
 0x69f   :  { %v1688_v7 = vor.u32 1.1754944e-38, %v1687_v34  ;;  %vm1686_vm3 = vcmp.eq.f32.partialorder %v1685_v55, 8.507059e+37 }
 0x6a0   :  { %vm1701_vm4 = vcmp.eq.f32.partialorder %v1700_v1, 8.507059e+37 }
 0x6a1   :  { %v3033_v42 = vpop.eup %3032 }
 0x6a2   :  { %v1675_v11 = vadd.f32 1.0, %v3033_v42  ;;  %v1703_v42 = vor.u32 1.1754944e-38, %v1702_v6 }
 0x6a3   :  { %v3035_v13 = vpop.eup %3034 }
 0x6a4   :  { %v3037_v2 = vpop.eup %3036  ;;  %v1677_v47 = vmul.f32 %v3035_v13, %v1673_v44  ;;  %3038 = vrcp.f32 %v1675_v11  ;;  %vm1682_vm13 = vweird.f32 %v3035_v13  ;;  %v1717_v34 = vand.u32 2147483648, %v1675_v11 }
 0x6a5   :  { %v1692_v61 = vmul.f32 %v3037_v2, %v1674_v52  ;;  %3040 = vtanh.f32 %v1661_v27  ;;  %vm1697_vm14 = vweird.f32 %v3037_v2  ;;  %vm1683_vm1 = vmor %vm1681_vm15, %vm1682_vm13  ;;  %vm1711_vm6 = vweird.f32 %v1675_v11 }
 0x6a6   :  { %v1678_v24 = vsub.f32 1.0, %v1677_v47  ;;  %vm1698_vm2 = vmor %vm1696_vm0, %vm1697_vm14  ;;  %v1718_v55 = vor.u32 1.1754944e-38, %v1717_v34 }
 0x6a7   :  { %v1693_v21 = vsub.f32 1.0, %v1692_v61 }
 0x6a8   :  { %v1679_v18 = vmul.f32 %v3035_v13, %v1678_v24 }
 0x6a9   :  { %v1694_v48 = vmul.f32 %v3037_v2, %v1693_v21 }
 0x6aa   :  { %v3039_v28 = vpop.eup %3038  ;;  %v1680_v46 = vadd.f32 %v3035_v13, %v1679_v18 }
 0x6ab   :  { %v1707_v25 = vmul.f32 %v3039_v28, %v1675_v11  ;;  %v1695_v3 = vadd.f32 %v3037_v2, %v1694_v48  ;;  %v3041_v27 = vpop.eup %3040  ;;  %vm1712_vm5 = vweird.f32 %v3039_v28 }
 0x6ac   :  { %v1684_v63 = vsel %vm1683_vm1, %v3035_v13, %v1680_v46  ;;  %v1715_v13 = vand.u32 2147483647, %v1675_v11  ;;  %vm1713_vm7 = vmor %vm1711_vm6, %vm1712_vm5 }
 0x6ad   :  { %v1708_v47 = vsub.f32 1.0, %v1707_v25  ;;  %v1689_v61 = vsel %vm1686_vm3, %v1688_v7, %v1684_v63  ;;  %v1699_v24 = vsel %vm1698_vm2, %v3037_v2, %v1695_v3 }
 0x6ae   :  { %v1704_v21 = vsel %vm1701_vm4, %v1703_v42, %v1699_v24  ;;  %v1723_v60 = vmul.f32 %v3041_v27, %v1689_v61  ;;  %vm1716_vm8 = vcmp.eq.f32.partialorder %v1715_v13, 8.507059e+37  ;;  %v4192_v42 = vld [vmem:[#allocation7_spill] sm:$0xff]  ;;  %v4193_v27 = vld [vmem:[#allocation8_spill] sm:$0xff] }
 0x6af   :  { %v1722_v15 = vmul.f32 %v1704_v21, %v3815_v45  ;;  %v1709_v18 = vmul.f32 %v3039_v28, %v1708_v47  ;;  %v117_v45 = vpop.permute.xlu1 %116 }
 0x6b0   :  { %v195_v25 = vmul.f32 %v3280_v31, %v117_v45  ;;  %v196_v7 = vmul.f32 %v3286_v36, %v117_v45 }
 0x6b1   :  { %v3859_v44 = vadd.f32 %v1723_v60, %v1722_v15  ;;  %v1710_v52 = vadd.f32 %v3039_v28, %v1709_v18  ;;  %v193_v15 = vmul.f32 %v3265_v20, %v117_v45  ;;  %v194_v60 = vmul.f32 %v3278_v30, %v117_v45 }
 0x6b2   :  { %v269_v63 = vadd.f32 %v4192_v42, %v195_v25  ;;  %v270_v47 = vadd.f32 %v4193_v27, %v196_v7 }
 0x6b3   :  { %3042 = vtanh.f32 %v3859_v44  ;;  %v1714_v6 = vsel %vm1713_vm7, %v3039_v28, %v1710_v52  ;;  %v267_v11 = vadd.f32 %v3288_v37, %v193_v15  ;;  %v268_v28 = vadd.f32 %v3290_v38, %v194_v60 }
 0x6b4   :  { %v1719_v48 = vsel %vm1716_vm8, %v1718_v55, %v1714_v6  ;;  %v312_v13 = vpack.c.bf16 %v270_v47, %v269_v63 }
 0x6b5   :  { %v311_v3 = vpack.c.bf16 %v268_v28, %v267_v11 }
 0x6b7   :  { %v1731_v61 = vunpack.c.l.bf16 %v311_v3  ;;  %v1732_v24 = vunpack.c.h.bf16 %v311_v3 }
 0x6b9   :  { %v3043_v2 = vpop.eup %3042 }
 0x6ba   :  { %v1726_v1 = vmul.f32 %v3043_v2, %v1719_v48  ;;  %v1733_v2 = vunpack.c.l.bf16 %v312_v13 }
 0x6bc   :  { %v1727_v46 = vpack.c.bf16 %v1726_v1, %v1726_v1 }
 0x6be   :  { %1743 = vmatmul.bf16.vlgmr.msrb.gmra.mxu0 %v1727_v46  ;;  %1756 = vmatmul.bf16.vlgmr.msrb.gmra.mxu1 %v1727_v46 }
 0x6bf   :  { %1769 = vmatmul.bf16.vlgmr.msrb.gmra.mxu2 %v1727_v46  ;;  %1782 = vmatmul.bf16.vlgmr.msrb.gmra.mxu3 %v1727_v46 }
 0x6c0   :  { %1981 = vmatpush.bf16.msrb.mxu0 %v3259_v12  ;;  %1994 = vmatpush.bf16.msrb.mxu1 %v3261_v16 }
 0x6c1   :  { %2007 = vmatpush.bf16.msrb.mxu2 %v3263_v17  ;;  %2020 = vmatpush.bf16.msrb.mxu3 %v3271_v22 }
 0x6c4   :  { %1982 = vmatpush.bf16.msrb.mxu0 %v3276_v26  ;;  %1995 = vmatpush.bf16.msrb.mxu1 %v3282_v32 }
 0x6c5   :  { %2008 = vmatpush.bf16.msrb.mxu2 %v3284_v33  ;;  %2021 = vmatpush.bf16.msrb.mxu3 %v3293_v39 }
 0x6c8   :  { %1983 = vmatpush.bf16.msrb.mxu0 %v3298_v43  ;;  %1996 = vmatpush.bf16.msrb.mxu1 %v3304_v49 }
 0x6c9   :  { %2009 = vmatpush.bf16.msrb.mxu2 %v3306_v50  ;;  %2022 = vmatpush.bf16.msrb.mxu3 %v3309_v54 }
 0x6cc   :  { %1984 = vmatpush.bf16.msrb.mxu0 %v3318_v62  ;;  %1997 = vmatpush.bf16.msrb.mxu1 %v3325_v8 }
 0x6cd   :  { %2010 = vmatpush.bf16.msrb.mxu2 %v3327_v9  ;;  %2023 = vmatpush.bf16.msrb.mxu3 %v3329_v10 }
 0x6d0   :  { %1985 = vmatpush.bf16.msrb.mxu0 %v3335_v19  ;;  %1998 = vmatpush.bf16.msrb.mxu1 %v3340_v35 }
 0x6d1   :  { %2011 = vmatpush.bf16.msrb.mxu2 %v3342_v40  ;;  %2024 = vmatpush.bf16.msrb.mxu3 %v3344_v41 }
 0x6d4   :  { %1986 = vmatpush.bf16.msrb.mxu0 %v3349_v53  ;;  %1999 = vmatpush.bf16.msrb.mxu1 %v3351_v58 }
 0x6d5   :  { %2012 = vmatpush.bf16.msrb.mxu2 %v3353_v59  ;;  %2025 = vmatpush.bf16.msrb.mxu3 %v3356_v0 }
 0x6d8   :  { %1987 = vmatpush.bf16.msrb.mxu0 %v3359_v4  ;;  %2000 = vmatpush.bf16.msrb.mxu1 %v3361_v5 }
 0x6d9   :  { %2013 = vmatpush.bf16.msrb.mxu2 %v3365_v14  ;;  %2026 = vmatpush.bf16.msrb.mxu3 %v3367_v23 }
 0x6dc   :  { %1988 = vmatpush.bf16.msrb.mxu0 %v3370_v29  ;;  %2001 = vmatpush.bf16.msrb.mxu1 %v3373_v51 }
 0x6dd   :  { %2014 = vmatpush.bf16.msrb.mxu2 %v3377_v56  ;;  %2027 = vmatpush.bf16.msrb.mxu3 %v3379_v57 }
 0x73b   :  { %v1744_v21 = vpop.f32.mrf.mxu0  ;;  %v1757_v18 = vpop.f32.mrf.mxu1 }
 0x73c   :  { %v1745_v52 = vadd.f32 %v1744_v21, %v1731_v61  ;;  %v1758_v34 = vadd.f32 %v1757_v18, %v1732_v24  ;;  %v1734_v61 = vunpack.c.h.bf16 %v312_v13 }
 0x73e   :  { %v2819_v6 = vmul.f32 -1.442695, %v1745_v52  ;;  %v2820_v55 = vmul.f32 -1.442695, %v1758_v34 }
 0x740   :  { %3044 = vpow2.f32 %v2819_v6 }
 0x741   :  { %3046 = vpow2.f32 %v2820_v55 }
 0x742   :  { %v1770_v48 = vpop.f32.mrf.mxu2  ;;  %v1783_v1 = vpop.f32.mrf.mxu3 }
 0x743   :  { %v1771_v46 = vadd.f32 %v1770_v48, %v1733_v2  ;;  %v1746_v45 = vpop.f32.mrf.mxu0  ;;  %v1759_v15 = vpop.f32.mrf.mxu1  ;;  %v1784_v18 = vadd.f32 %v1783_v1, %v1734_v61 }
 0x745   :  { %v2821_v60 = vmul.f32 -1.442695, %v1771_v46 }
 0x746   :  { %v3045_v11 = vpop.eup %3044 }
 0x747   :  { %v3047_v28 = vpop.eup %3046  ;;  %v1796_v25 = vadd.f32 1.0, %v3045_v11  ;;  %3048 = vpow2.f32 %v2821_v60 }
 0x748   :  { %v1797_v7 = vadd.f32 1.0, %v3047_v28 }
 0x749   :  { %3050 = vrcp.f32 %v1796_v25  ;;  %v1810_v48 = vand.u32 2147483648, %v1796_v25  ;;  %v1808_v15 = vand.u32 2147483647, %v1796_v25  ;;  %vm1804_vm11 = vweird.f32 %v1796_v25 }
 0x74a   :  { %3052 = vrcp.f32 %v1797_v7  ;;  %v1772_v3 = vpop.f32.mrf.mxu2  ;;  %v1785_v63 = vpop.f32.mrf.mxu3  ;;  %v1825_v46 = vand.u32 2147483648, %v1797_v7  ;;  %v1823_v11 = vand.u32 2147483647, %v1797_v7  ;;  %vm1819_vm12 = vweird.f32 %v1797_v7 }
 0x74b   :  { %v1811_v3 = vor.u32 1.1754944e-38, %v1810_v48  ;;  %vm1809_vm15 = vcmp.eq.f32.partialorder %v1808_v15, 8.507059e+37 }
 0x74c   :  { %vm1824_vm0 = vcmp.eq.f32.partialorder %v1823_v11, 8.507059e+37 }
 0x74d   :  { %v3049_v47 = vpop.eup %3048 }
 0x74e   :  { %v1798_v24 = vadd.f32 1.0, %v3049_v47  ;;  %v1826_v47 = vor.u32 1.1754944e-38, %v1825_v46 }
 0x74f   :  { %v3051_v21 = vpop.eup %3050 }
 0x750   :  { %v3053_v52 = vpop.eup %3052  ;;  %v1800_v34 = vmul.f32 %v3051_v21, %v1796_v25  ;;  %3054 = vrcp.f32 %v1798_v24  ;;  %vm1805_vm9 = vweird.f32 %v3051_v21  ;;  %v1840_v48 = vand.u32 2147483648, %v1798_v24 }
 0x751   :  { %v1815_v6 = vmul.f32 %v3053_v52, %v1797_v7  ;;  %3056 = vtanh.f32 %v1784_v18  ;;  %vm1820_vm10 = vweird.f32 %v3053_v52  ;;  %vm1806_vm13 = vmor %vm1804_vm11, %vm1805_vm9  ;;  %vm1834_vm2 = vweird.f32 %v1798_v24 }
 0x752   :  { %v1801_v55 = vsub.f32 1.0, %v1800_v34  ;;  %vm1821_vm14 = vmor %vm1819_vm12, %vm1820_vm10  ;;  %v1841_v15 = vor.u32 1.1754944e-38, %v1840_v48 }
 0x753   :  { %v1816_v2 = vsub.f32 1.0, %v1815_v6 }
 0x754   :  { %v1802_v45 = vmul.f32 %v3051_v21, %v1801_v55 }
 0x755   :  { %v1817_v60 = vmul.f32 %v3053_v52, %v1816_v2 }
 0x756   :  { %v3055_v28 = vpop.eup %3054  ;;  %v1803_v13 = vadd.f32 %v3051_v21, %v1802_v45 }
 0x757   :  { %v1830_v1 = vmul.f32 %v3055_v28, %v1798_v24  ;;  %v1818_v63 = vadd.f32 %v3053_v52, %v1817_v60  ;;  %v3057_v18 = vpop.eup %3056  ;;  %vm1835_vm1 = vweird.f32 %v3055_v28 }
 0x758   :  { %v1807_v61 = vsel %vm1806_vm13, %v3051_v21, %v1803_v13  ;;  %v1838_v21 = vand.u32 2147483647, %v1798_v24  ;;  %vm1836_vm3 = vmor %vm1834_vm2, %vm1835_vm1 }
 0x759   :  { %v1831_v34 = vsub.f32 1.0, %v1830_v1  ;;  %v1812_v6 = vsel %vm1809_vm15, %v1811_v3, %v1807_v61  ;;  %v1822_v55 = vsel %vm1821_vm14, %v3053_v52, %v1818_v63 }
 0x75a   :  { %v1827_v2 = vsel %vm1824_vm0, %v1826_v47, %v1822_v55  ;;  %v1846_v27 = vmul.f32 %v3057_v18, %v1812_v6  ;;  %vm1839_vm4 = vcmp.eq.f32.partialorder %v1838_v21, 8.507059e+37  ;;  %v4194_v47 = vld [vmem:[#allocation7_spill] sm:$0xff]  ;;  %v4195_v18 = vld [vmem:[#allocation8_spill] sm:$0xff] }
 0x75b   :  { %v1845_v42 = vmul.f32 %v1827_v2, %v3859_v44  ;;  %v1832_v45 = vmul.f32 %v3055_v28, %v1831_v34  ;;  %v122_v44 = vpop.permute.xlu2 %121 }
 0x75c   :  { %v199_v1 = vmul.f32 %v3280_v31, %v122_v44  ;;  %v200_v3 = vmul.f32 %v3286_v36, %v122_v44 }
 0x75d   :  { %v3903_v25 = vadd.f32 %v1846_v27, %v1845_v42  ;;  %v1833_v7 = vadd.f32 %v3055_v28, %v1832_v45  ;;  %v197_v42 = vmul.f32 %v3265_v20, %v122_v44  ;;  %v198_v27 = vmul.f32 %v3278_v30, %v122_v44 }
 0x75e   :  { %v273_v61 = vadd.f32 %v4194_v47, %v199_v1  ;;  %v274_v34 = vadd.f32 %v4195_v18, %v200_v3 }
 0x75f   :  { %3058 = vtanh.f32 %v3903_v25  ;;  %v1837_v46 = vsel %vm1836_vm3, %v3055_v28, %v1833_v7  ;;  %v271_v24 = vadd.f32 %v3288_v37, %v197_v42  ;;  %v272_v28 = vadd.f32 %v3290_v38, %v198_v27 }
 0x760   :  { %v1842_v60 = vsel %vm1839_vm4, %v1841_v15, %v1837_v46  ;;  %v314_v21 = vpack.c.bf16 %v274_v34, %v273_v61 }
 0x761   :  { %v313_v63 = vpack.c.bf16 %v272_v28, %v271_v24 }
 0x763   :  { %v1854_v6 = vunpack.c.l.bf16 %v313_v63  ;;  %v1855_v55 = vunpack.c.h.bf16 %v313_v63 }
 0x765   :  { %v3059_v52 = vpop.eup %3058 }
 0x766   :  { %v1849_v11 = vmul.f32 %v3059_v52, %v1842_v60  ;;  %v1856_v52 = vunpack.c.l.bf16 %v314_v21 }
 0x768   :  { %v1850_v13 = vpack.c.bf16 %v1849_v11, %v1849_v11 }
 0x76a   :  { %1866 = vmatmul.bf16.vlgmr.msra.gmra.mxu0 %v1850_v13  ;;  %1879 = vmatmul.bf16.vlgmr.msra.gmra.mxu1 %v1850_v13 }
 0x76b   :  { %1892 = vmatmul.bf16.vlgmr.msra.gmra.mxu2 %v1850_v13  ;;  %1905 = vmatmul.bf16.vlgmr.msra.gmra.mxu3 %v1850_v13 }
 0x76c   :  { %2104 = vmatpush.bf16.msra.mxu0 %v3259_v12  ;;  %2117 = vmatpush.bf16.msra.mxu1 %v3261_v16 }
 0x76d   :  { %2130 = vmatpush.bf16.msra.mxu2 %v3263_v17  ;;  %2143 = vmatpush.bf16.msra.mxu3 %v3271_v22 }
 0x770   :  { %2105 = vmatpush.bf16.msra.mxu0 %v3276_v26  ;;  %2118 = vmatpush.bf16.msra.mxu1 %v3282_v32 }
 0x771   :  { %2131 = vmatpush.bf16.msra.mxu2 %v3284_v33  ;;  %2144 = vmatpush.bf16.msra.mxu3 %v3293_v39 }
 0x774   :  { %2106 = vmatpush.bf16.msra.mxu0 %v3298_v43  ;;  %2119 = vmatpush.bf16.msra.mxu1 %v3304_v49 }
 0x775   :  { %2132 = vmatpush.bf16.msra.mxu2 %v3306_v50  ;;  %2145 = vmatpush.bf16.msra.mxu3 %v3309_v54 }
 0x778   :  { %2107 = vmatpush.bf16.msra.mxu0 %v3318_v62  ;;  %2120 = vmatpush.bf16.msra.mxu1 %v3325_v8 }
 0x779   :  { %2133 = vmatpush.bf16.msra.mxu2 %v3327_v9  ;;  %2146 = vmatpush.bf16.msra.mxu3 %v3329_v10 }
 0x77c   :  { %2108 = vmatpush.bf16.msra.mxu0 %v3335_v19  ;;  %2121 = vmatpush.bf16.msra.mxu1 %v3340_v35 }
 0x77d   :  { %2134 = vmatpush.bf16.msra.mxu2 %v3342_v40  ;;  %2147 = vmatpush.bf16.msra.mxu3 %v3344_v41 }
 0x780   :  { %2109 = vmatpush.bf16.msra.mxu0 %v3349_v53  ;;  %2122 = vmatpush.bf16.msra.mxu1 %v3351_v58 }
 0x781   :  { %2135 = vmatpush.bf16.msra.mxu2 %v3353_v59  ;;  %2148 = vmatpush.bf16.msra.mxu3 %v3356_v0 }
 0x784   :  { %2110 = vmatpush.bf16.msra.mxu0 %v3359_v4  ;;  %2123 = vmatpush.bf16.msra.mxu1 %v3361_v5 }
 0x785   :  { %2136 = vmatpush.bf16.msra.mxu2 %v3365_v14  ;;  %2149 = vmatpush.bf16.msra.mxu3 %v3367_v23 }
 0x788   :  { %2111 = vmatpush.bf16.msra.mxu0 %v3370_v29  ;;  %2124 = vmatpush.bf16.msra.mxu1 %v3373_v51 }
 0x789   :  { %2137 = vmatpush.bf16.msra.mxu2 %v3377_v56  ;;  %2150 = vmatpush.bf16.msra.mxu3 %v3379_v57 }
 0x7e7   :  { %v1867_v2 = vpop.f32.mrf.mxu0  ;;  %v1880_v45 = vpop.f32.mrf.mxu1 }
 0x7e8   :  { %v1868_v7 = vadd.f32 %v1867_v2, %v1854_v6  ;;  %v1881_v48 = vadd.f32 %v1880_v45, %v1855_v55  ;;  %v1857_v6 = vunpack.c.h.bf16 %v314_v21 }
 0x7ea   :  { %v2822_v46 = vmul.f32 -1.442695, %v1868_v7  ;;  %v2823_v15 = vmul.f32 -1.442695, %v1881_v48 }
 0x7ec   :  { %3060 = vpow2.f32 %v2822_v46 }
 0x7ed   :  { %3062 = vpow2.f32 %v2823_v15 }
 0x7ee   :  { %v1893_v60 = vpop.f32.mrf.mxu2  ;;  %v1906_v11 = vpop.f32.mrf.mxu3 }
 0x7ef   :  { %v1894_v13 = vadd.f32 %v1893_v60, %v1856_v52  ;;  %v1869_v44 = vpop.f32.mrf.mxu0  ;;  %v1882_v42 = vpop.f32.mrf.mxu1  ;;  %v1907_v45 = vadd.f32 %v1906_v11, %v1857_v6 }
 0x7f1   :  { %v2824_v27 = vmul.f32 -1.442695, %v1894_v13 }
 0x7f2   :  { %v3061_v24 = vpop.eup %3060 }
 0x7f3   :  { %v3063_v28 = vpop.eup %3062  ;;  %v1919_v1 = vadd.f32 1.0, %v3061_v24  ;;  %3064 = vpow2.f32 %v2824_v27 }
 0x7f4   :  { %v1920_v3 = vadd.f32 1.0, %v3063_v28 }
 0x7f5   :  { %3066 = vrcp.f32 %v1919_v1  ;;  %v1933_v60 = vand.u32 2147483648, %v1919_v1  ;;  %v1931_v42 = vand.u32 2147483647, %v1919_v1  ;;  %vm1927_vm7 = vweird.f32 %v1919_v1 }
 0x7f6   :  { %3068 = vrcp.f32 %v1920_v3  ;;  %v1895_v63 = vpop.f32.mrf.mxu2  ;;  %v1908_v61 = vpop.f32.mrf.mxu3  ;;  %v1948_v13 = vand.u32 2147483648, %v1920_v3  ;;  %v1946_v24 = vand.u32 2147483647, %v1920_v3  ;;  %vm1942_vm8 = vweird.f32 %v1920_v3 }
 0x7f7   :  { %v1934_v63 = vor.u32 1.1754944e-38, %v1933_v60  ;;  %vm1932_vm11 = vcmp.eq.f32.partialorder %v1931_v42, 8.507059e+37 }
 0x7f8   :  { %vm1947_vm12 = vcmp.eq.f32.partialorder %v1946_v24, 8.507059e+37 }
 0x7f9   :  { %v3065_v34 = vpop.eup %3064 }
 0x7fa   :  { %v1921_v55 = vadd.f32 1.0, %v3065_v34  ;;  %v1949_v34 = vor.u32 1.1754944e-38, %v1948_v13 }
 0x7fb   :  { %v3067_v2 = vpop.eup %3066 }
 0x7fc   :  { %v3069_v7 = vpop.eup %3068  ;;  %v1923_v48 = vmul.f32 %v3067_v2, %v1919_v1  ;;  %3070 = vrcp.f32 %v1921_v55  ;;  %vm1928_vm5 = vweird.f32 %v3067_v2  ;;  %v1963_v60 = vand.u32 2147483648, %v1921_v55 }
 0x7fd   :  { %v1938_v46 = vmul.f32 %v3069_v7, %v1920_v3  ;;  %3072 = vtanh.f32 %v1907_v45  ;;  %vm1943_vm6 = vweird.f32 %v3069_v7  ;;  %vm1929_vm9 = vmor %vm1927_vm7, %vm1928_vm5  ;;  %vm1957_vm14 = vweird.f32 %v1921_v55 }
 0x7fe   :  { %v1924_v15 = vsub.f32 1.0, %v1923_v48  ;;  %vm1944_vm10 = vmor %vm1942_vm8, %vm1943_vm6  ;;  %v1964_v42 = vor.u32 1.1754944e-38, %v1963_v60 }
 0x7ff   :  { %v1939_v52 = vsub.f32 1.0, %v1938_v46 }
 0x800   :  { %v1925_v44 = vmul.f32 %v3067_v2, %v1924_v15 }
 0x801   :  { %v1940_v27 = vmul.f32 %v3069_v7, %v1939_v52 }
 0x802   :  { %v3071_v28 = vpop.eup %3070  ;;  %v1926_v21 = vadd.f32 %v3067_v2, %v1925_v44 }
 0x803   :  { %v1953_v11 = vmul.f32 %v3071_v28, %v1921_v55  ;;  %v1941_v61 = vadd.f32 %v3069_v7, %v1940_v27  ;;  %v3073_v45 = vpop.eup %3072  ;;  %vm1958_vm13 = vweird.f32 %v3071_v28 }
 0x804   :  { %v1930_v6 = vsel %vm1929_vm9, %v3067_v2, %v1926_v21  ;;  %v1961_v2 = vand.u32 2147483647, %v1921_v55  ;;  %vm1959_vm15 = vmor %vm1957_vm14, %vm1958_vm13 }
 0x805   :  { %v1954_v48 = vsub.f32 1.0, %v1953_v11  ;;  %v1935_v46 = vsel %vm1932_vm11, %v1934_v63, %v1930_v6  ;;  %v1945_v15 = vsel %vm1944_vm10, %v3069_v7, %v1941_v61 }
 0x806   :  { %v1950_v52 = vsel %vm1947_vm12, %v1949_v34, %v1945_v15  ;;  %v1969_v18 = vmul.f32 %v3073_v45, %v1935_v46  ;;  %vm1962_vm0 = vcmp.eq.f32.partialorder %v1961_v2, 8.507059e+37  ;;  %v4196_v34 = vld [vmem:[#allocation7_spill] sm:$0xff]  ;;  %v4197_v45 = vld [vmem:[#allocation8_spill] sm:$0xff] }
 0x807   :  { %v1968_v47 = vmul.f32 %v1950_v52, %v3903_v25  ;;  %v1955_v44 = vmul.f32 %v3071_v28, %v1954_v48  ;;  %v127_v25 = vpop.permute.xlu0 %126 }
 0x808   :  { %v203_v11 = vmul.f32 %v3280_v31, %v127_v25  ;;  %v204_v63 = vmul.f32 %v3286_v36, %v127_v25 }
 0x809   :  { %v3947_v1 = vadd.f32 %v1969_v18, %v1968_v47  ;;  %v1956_v3 = vadd.f32 %v3071_v28, %v1955_v44  ;;  %v201_v47 = vmul.f32 %v3265_v20, %v127_v25  ;;  %v202_v18 = vmul.f32 %v3278_v30, %v127_v25 }
 0x80a   :  { %v277_v6 = vadd.f32 %v4196_v34, %v203_v11  ;;  %v278_v48 = vadd.f32 %v4197_v45, %v204_v63 }
 0x80b   :  { %3074 = vtanh.f32 %v3947_v1  ;;  %v1960_v13 = vsel %vm1959_vm15, %v3071_v28, %v1956_v3  ;;  %v275_v55 = vadd.f32 %v3288_v37, %v201_v47  ;;  %v276_v28 = vadd.f32 %v3290_v38, %v202_v18 }
 0x80c   :  { %v1965_v27 = vsel %vm1962_vm0, %v1964_v42, %v1960_v13  ;;  %v316_v2 = vpack.c.bf16 %v278_v48, %v277_v6 }
 0x80d   :  { %v315_v61 = vpack.c.bf16 %v276_v28, %v275_v55 }
 0x80f   :  { %v1977_v46 = vunpack.c.l.bf16 %v315_v61  ;;  %v1978_v15 = vunpack.c.h.bf16 %v315_v61 }
 0x811   :  { %v3075_v7 = vpop.eup %3074 }
 0x812   :  { %v1972_v24 = vmul.f32 %v3075_v7, %v1965_v27  ;;  %v1979_v7 = vunpack.c.l.bf16 %v316_v2 }
 0x814   :  { %v1973_v21 = vpack.c.bf16 %v1972_v24, %v1972_v24 }
 0x816   :  { %1989 = vmatmul.bf16.vlgmr.msrb.gmra.mxu0 %v1973_v21  ;;  %2002 = vmatmul.bf16.vlgmr.msrb.gmra.mxu1 %v1973_v21 }
 0x817   :  { %2015 = vmatmul.bf16.vlgmr.msrb.gmra.mxu2 %v1973_v21  ;;  %2028 = vmatmul.bf16.vlgmr.msrb.gmra.mxu3 %v1973_v21 }
 0x818   :  { %2227 = vmatpush.bf16.msrb.mxu0 %v3259_v12  ;;  %2240 = vmatpush.bf16.msrb.mxu1 %v3261_v16 }
 0x819   :  { %2253 = vmatpush.bf16.msrb.mxu2 %v3263_v17  ;;  %2266 = vmatpush.bf16.msrb.mxu3 %v3271_v22 }
 0x81c   :  { %2228 = vmatpush.bf16.msrb.mxu0 %v3276_v26  ;;  %2241 = vmatpush.bf16.msrb.mxu1 %v3282_v32 }
 0x81d   :  { %2254 = vmatpush.bf16.msrb.mxu2 %v3284_v33  ;;  %2267 = vmatpush.bf16.msrb.mxu3 %v3293_v39 }
 0x820   :  { %2229 = vmatpush.bf16.msrb.mxu0 %v3298_v43  ;;  %2242 = vmatpush.bf16.msrb.mxu1 %v3304_v49 }
 0x821   :  { %2255 = vmatpush.bf16.msrb.mxu2 %v3306_v50  ;;  %2268 = vmatpush.bf16.msrb.mxu3 %v3309_v54 }
 0x824   :  { %2230 = vmatpush.bf16.msrb.mxu0 %v3318_v62  ;;  %2243 = vmatpush.bf16.msrb.mxu1 %v3325_v8 }
 0x825   :  { %2256 = vmatpush.bf16.msrb.mxu2 %v3327_v9  ;;  %2269 = vmatpush.bf16.msrb.mxu3 %v3329_v10 }
 0x828   :  { %2231 = vmatpush.bf16.msrb.mxu0 %v3335_v19  ;;  %2244 = vmatpush.bf16.msrb.mxu1 %v3340_v35 }
 0x829   :  { %2257 = vmatpush.bf16.msrb.mxu2 %v3342_v40  ;;  %2270 = vmatpush.bf16.msrb.mxu3 %v3344_v41 }
 0x82c   :  { %2232 = vmatpush.bf16.msrb.mxu0 %v3349_v53  ;;  %2245 = vmatpush.bf16.msrb.mxu1 %v3351_v58 }
 0x82d   :  { %2258 = vmatpush.bf16.msrb.mxu2 %v3353_v59  ;;  %2271 = vmatpush.bf16.msrb.mxu3 %v3356_v0 }
 0x830   :  { %2233 = vmatpush.bf16.msrb.mxu0 %v3359_v4  ;;  %2246 = vmatpush.bf16.msrb.mxu1 %v3361_v5 }
 0x831   :  { %2259 = vmatpush.bf16.msrb.mxu2 %v3365_v14  ;;  %2272 = vmatpush.bf16.msrb.mxu3 %v3367_v23 }
 0x834   :  { %2234 = vmatpush.bf16.msrb.mxu0 %v3370_v29  ;;  %2247 = vmatpush.bf16.msrb.mxu1 %v3373_v51 }
 0x835   :  { %2260 = vmatpush.bf16.msrb.mxu2 %v3377_v56  ;;  %2273 = vmatpush.bf16.msrb.mxu3 %v3379_v57 }
 0x893   :  { %v1990_v52 = vpop.f32.mrf.mxu0  ;;  %v2003_v44 = vpop.f32.mrf.mxu1 }
 0x894   :  { %v1991_v3 = vadd.f32 %v1990_v52, %v1977_v46  ;;  %v2004_v60 = vadd.f32 %v2003_v44, %v1978_v15  ;;  %v1980_v46 = vunpack.c.h.bf16 %v316_v2 }
 0x896   :  { %v2825_v13 = vmul.f32 -1.442695, %v1991_v3  ;;  %v2826_v42 = vmul.f32 -1.442695, %v2004_v60 }
 0x898   :  { %3076 = vpow2.f32 %v2825_v13 }
 0x899   :  { %3078 = vpow2.f32 %v2826_v42 }
 0x89a   :  { %v2016_v27 = vpop.f32.mrf.mxu2  ;;  %v2029_v24 = vpop.f32.mrf.mxu3 }
 0x89b   :  { %v2017_v21 = vadd.f32 %v2016_v27, %v1979_v7  ;;  %v1992_v25 = vpop.f32.mrf.mxu0  ;;  %v2005_v47 = vpop.f32.mrf.mxu1  ;;  %v2030_v44 = vadd.f32 %v2029_v24, %v1980_v46 }
 0x89d   :  { %v2827_v18 = vmul.f32 -1.442695, %v2017_v21 }
 0x89e   :  { %v3077_v55 = vpop.eup %3076 }
 0x89f   :  { %v3079_v28 = vpop.eup %3078  ;;  %v2042_v11 = vadd.f32 1.0, %v3077_v55  ;;  %3080 = vpow2.f32 %v2827_v18 }
 0x8a0   :  { %v2043_v63 = vadd.f32 1.0, %v3079_v28 }
 0x8a1   :  { %3082 = vrcp.f32 %v2042_v11  ;;  %v2056_v27 = vand.u32 2147483648, %v2042_v11  ;;  %v2054_v47 = vand.u32 2147483647, %v2042_v11  ;;  %vm2050_vm3 = vweird.f32 %v2042_v11 }
 0x8a2   :  { %3084 = vrcp.f32 %v2043_v63  ;;  %v2018_v61 = vpop.f32.mrf.mxu2  ;;  %v2031_v6 = vpop.f32.mrf.mxu3  ;;  %v2071_v21 = vand.u32 2147483648, %v2043_v63  ;;  %v2069_v55 = vand.u32 2147483647, %v2043_v63  ;;  %vm2065_vm4 = vweird.f32 %v2043_v63 }
 0x8a3   :  { %v2057_v61 = vor.u32 1.1754944e-38, %v2056_v27  ;;  %vm2055_vm7 = vcmp.eq.f32.partialorder %v2054_v47, 8.507059e+37 }
 0x8a4   :  { %vm2070_vm8 = vcmp.eq.f32.partialorder %v2069_v55, 8.507059e+37 }
 0x8a5   :  { %v3081_v48 = vpop.eup %3080 }
 0x8a6   :  { %v2044_v15 = vadd.f32 1.0, %v3081_v48  ;;  %v2072_v48 = vor.u32 1.1754944e-38, %v2071_v21 }
 0x8a7   :  { %v3083_v52 = vpop.eup %3082 }
 0x8a8   :  { %v3085_v3 = vpop.eup %3084  ;;  %v2046_v60 = vmul.f32 %v3083_v52, %v2042_v11  ;;  %3086 = vrcp.f32 %v2044_v15  ;;  %vm2051_vm1 = vweird.f32 %v3083_v52  ;;  %v2086_v27 = vand.u32 2147483648, %v2044_v15 }
 0x8a9   :  { %v2061_v13 = vmul.f32 %v3085_v3, %v2043_v63  ;;  %3088 = vtanh.f32 %v2030_v44  ;;  %vm2066_vm2 = vweird.f32 %v3085_v3  ;;  %vm2052_vm5 = vmor %vm2050_vm3, %vm2051_vm1  ;;  %vm2080_vm10 = vweird.f32 %v2044_v15 }
 0x8aa   :  { %v2047_v42 = vsub.f32 1.0, %v2046_v60  ;;  %vm2067_vm6 = vmor %vm2065_vm4, %vm2066_vm2  ;;  %v2087_v47 = vor.u32 1.1754944e-38, %v2086_v27 }
 0x8ab   :  { %v2062_v7 = vsub.f32 1.0, %v2061_v13 }
 0x8ac   :  { %v2048_v25 = vmul.f32 %v3083_v52, %v2047_v42 }
 0x8ad   :  { %v2063_v18 = vmul.f32 %v3085_v3, %v2062_v7 }
 0x8ae   :  { %v3087_v28 = vpop.eup %3086  ;;  %v2049_v2 = vadd.f32 %v3083_v52, %v2048_v25 }
 0x8af   :  { %v2076_v24 = vmul.f32 %v3087_v28, %v2044_v15  ;;  %v2064_v6 = vadd.f32 %v3085_v3, %v2063_v18  ;;  %v3089_v44 = vpop.eup %3088  ;;  %vm2081_vm9 = vweird.f32 %v3087_v28 }
 0x8b0   :  { %v2053_v46 = vsel %vm2052_vm5, %v3083_v52, %v2049_v2  ;;  %v2084_v52 = vand.u32 2147483647, %v2044_v15  ;;  %vm2082_vm11 = vmor %vm2080_vm10, %vm2081_vm9 }
 0x8b1   :  { %v2077_v60 = vsub.f32 1.0, %v2076_v24  ;;  %v2058_v13 = vsel %vm2055_vm7, %v2057_v61, %v2053_v46  ;;  %v2068_v42 = vsel %vm2067_vm6, %v3085_v3, %v2064_v6 }
 0x8b2   :  { %v2073_v7 = vsel %vm2070_vm8, %v2072_v48, %v2068_v42  ;;  %v2092_v45 = vmul.f32 %v3089_v44, %v2058_v13  ;;  %vm2085_vm12 = vcmp.eq.f32.partialorder %v2084_v52, 8.507059e+37  ;;  %v4198_v48 = vld [vmem:[#allocation7_spill] sm:$0xff]  ;;  %v4199_v44 = vld [vmem:[#allocation8_spill] sm:$0xff] }
 0x8b3   :  { %v2078_v34 = vmul.f32 %v3087_v28, %v2077_v60  ;;  %v2091_v25 = vmul.f32 %v2073_v7, %v3947_v1  ;;  %v132_v1 = vpop.permute.xlu1 %131 }
 0x8b4   :  { %v207_v24 = vmul.f32 %v3280_v31, %v132_v1  ;;  %v208_v61 = vmul.f32 %v3286_v36, %v132_v1 }
 0x8b5   :  { %v3991_v11 = vadd.f32 %v2092_v45, %v2091_v25  ;;  %v2079_v63 = vadd.f32 %v3087_v28, %v2078_v34  ;;  %v205_v34 = vmul.f32 %v3265_v20, %v132_v1  ;;  %v206_v45 = vmul.f32 %v3278_v30, %v132_v1 }
 0x8b6   :  { %v281_v46 = vadd.f32 %v4198_v48, %v207_v24  ;;  %v282_v60 = vadd.f32 %v4199_v44, %v208_v61 }
 0x8b7   :  { %3090 = vtanh.f32 %v3991_v11  ;;  %v2083_v21 = vsel %vm2082_vm11, %v3087_v28, %v2079_v63  ;;  %v279_v15 = vadd.f32 %v3288_v37, %v205_v34  ;;  %v280_v28 = vadd.f32 %v3290_v38, %v206_v45 }
 0x8b8   :  { %v2088_v18 = vsel %vm2085_vm12, %v2087_v47, %v2083_v21  ;;  %v318_v52 = vpack.c.bf16 %v282_v60, %v281_v46 }
 0x8b9   :  { %v317_v6 = vpack.c.bf16 %v280_v28, %v279_v15 }
 0x8bb   :  { %v2100_v13 = vunpack.c.l.bf16 %v317_v6  ;;  %v2101_v42 = vunpack.c.h.bf16 %v317_v6 }
 0x8bd   :  { %v3091_v3 = vpop.eup %3090 }
 0x8be   :  { %v2095_v55 = vmul.f32 %v3091_v3, %v2088_v18  ;;  %v2102_v3 = vunpack.c.l.bf16 %v318_v52 }
 0x8c0   :  { %v2096_v2 = vpack.c.bf16 %v2095_v55, %v2095_v55 }
 0x8c2   :  { %2112 = vmatmul.bf16.vlgmr.msra.gmra.mxu0 %v2096_v2  ;;  %2125 = vmatmul.bf16.vlgmr.msra.gmra.mxu1 %v2096_v2 }
 0x8c3   :  { %2138 = vmatmul.bf16.vlgmr.msra.gmra.mxu2 %v2096_v2  ;;  %2151 = vmatmul.bf16.vlgmr.msra.gmra.mxu3 %v2096_v2 }
 0x8c4   :  { %2350 = vmatpush.bf16.msra.mxu0 %v3259_v12  ;;  %2363 = vmatpush.bf16.msra.mxu1 %v3261_v16 }
 0x8c5   :  { %2376 = vmatpush.bf16.msra.mxu2 %v3263_v17  ;;  %2389 = vmatpush.bf16.msra.mxu3 %v3271_v22 }
 0x8c8   :  { %2351 = vmatpush.bf16.msra.mxu0 %v3276_v26  ;;  %2364 = vmatpush.bf16.msra.mxu1 %v3282_v32 }
 0x8c9   :  { %2377 = vmatpush.bf16.msra.mxu2 %v3284_v33  ;;  %2390 = vmatpush.bf16.msra.mxu3 %v3293_v39 }
 0x8cc   :  { %2352 = vmatpush.bf16.msra.mxu0 %v3298_v43  ;;  %2365 = vmatpush.bf16.msra.mxu1 %v3304_v49 }
 0x8cd   :  { %2378 = vmatpush.bf16.msra.mxu2 %v3306_v50  ;;  %2391 = vmatpush.bf16.msra.mxu3 %v3309_v54 }
 0x8d0   :  { %2353 = vmatpush.bf16.msra.mxu0 %v3318_v62  ;;  %2366 = vmatpush.bf16.msra.mxu1 %v3325_v8 }
 0x8d1   :  { %2379 = vmatpush.bf16.msra.mxu2 %v3327_v9  ;;  %2392 = vmatpush.bf16.msra.mxu3 %v3329_v10 }
 0x8d4   :  { %2354 = vmatpush.bf16.msra.mxu0 %v3335_v19  ;;  %2367 = vmatpush.bf16.msra.mxu1 %v3340_v35 }
 0x8d5   :  { %2380 = vmatpush.bf16.msra.mxu2 %v3342_v40  ;;  %2393 = vmatpush.bf16.msra.mxu3 %v3344_v41 }
 0x8d8   :  { %2355 = vmatpush.bf16.msra.mxu0 %v3349_v53  ;;  %2368 = vmatpush.bf16.msra.mxu1 %v3351_v58 }
 0x8d9   :  { %2381 = vmatpush.bf16.msra.mxu2 %v3353_v59  ;;  %2394 = vmatpush.bf16.msra.mxu3 %v3356_v0 }
 0x8dc   :  { %2356 = vmatpush.bf16.msra.mxu0 %v3359_v4  ;;  %2369 = vmatpush.bf16.msra.mxu1 %v3361_v5 }
 0x8dd   :  { %2382 = vmatpush.bf16.msra.mxu2 %v3365_v14  ;;  %2395 = vmatpush.bf16.msra.mxu3 %v3367_v23 }
 0x8e0   :  { %2357 = vmatpush.bf16.msra.mxu0 %v3370_v29  ;;  %2370 = vmatpush.bf16.msra.mxu1 %v3373_v51 }
 0x8e1   :  { %2383 = vmatpush.bf16.msra.mxu2 %v3377_v56  ;;  %2396 = vmatpush.bf16.msra.mxu3 %v3379_v57 }
 0x93f   :  { %v2113_v7 = vpop.f32.mrf.mxu0  ;;  %v2126_v25 = vpop.f32.mrf.mxu1 }
 0x940   :  { %v2114_v63 = vadd.f32 %v2113_v7, %v2100_v13  ;;  %v2127_v27 = vadd.f32 %v2126_v25, %v2101_v42  ;;  %v2103_v13 = vunpack.c.h.bf16 %v318_v52 }
 0x942   :  { %v2828_v21 = vmul.f32 -1.442695, %v2114_v63  ;;  %v2829_v47 = vmul.f32 -1.442695, %v2127_v27 }
 0x944   :  { %3092 = vpow2.f32 %v2828_v21 }
 0x945   :  { %3094 = vpow2.f32 %v2829_v47 }
 0x946   :  { %v2139_v18 = vpop.f32.mrf.mxu2  ;;  %v2152_v55 = vpop.f32.mrf.mxu3 }
 0x947   :  { %v2140_v2 = vadd.f32 %v2139_v18, %v2102_v3  ;;  %v2115_v1 = vpop.f32.mrf.mxu0  ;;  %v2128_v34 = vpop.f32.mrf.mxu1  ;;  %v2153_v25 = vadd.f32 %v2152_v55, %v2103_v13 }
 0x949   :  { %v2830_v45 = vmul.f32 -1.442695, %v2140_v2 }
 0x94a   :  { %v3093_v15 = vpop.eup %3092 }
 0x94b   :  { %v3095_v28 = vpop.eup %3094  ;;  %v2165_v24 = vadd.f32 1.0, %v3093_v15  ;;  %3096 = vpow2.f32 %v2830_v45 }
 0x94c   :  { %v2166_v61 = vadd.f32 1.0, %v3095_v28 }
 0x94d   :  { %3098 = vrcp.f32 %v2165_v24  ;;  %v2179_v18 = vand.u32 2147483648, %v2165_v24  ;;  %v2177_v34 = vand.u32 2147483647, %v2165_v24  ;;  %vm2173_vm15 = vweird.f32 %v2165_v24 }
 0x94e   :  { %3100 = vrcp.f32 %v2166_v61  ;;  %v2141_v6 = vpop.f32.mrf.mxu2  ;;  %v2154_v46 = vpop.f32.mrf.mxu3  ;;  %v2194_v2 = vand.u32 2147483648, %v2166_v61  ;;  %v2192_v15 = vand.u32 2147483647, %v2166_v61  ;;  %vm2188_vm0 = vweird.f32 %v2166_v61 }
 0x94f   :  { %v2180_v6 = vor.u32 1.1754944e-38, %v2179_v18  ;;  %vm2178_vm3 = vcmp.eq.f32.partialorder %v2177_v34, 8.507059e+37 }
 0x950   :  { %vm2193_vm4 = vcmp.eq.f32.partialorder %v2192_v15, 8.507059e+37 }
 0x951   :  { %v3097_v60 = vpop.eup %3096 }
 0x952   :  { %v2167_v42 = vadd.f32 1.0, %v3097_v60  ;;  %v2195_v60 = vor.u32 1.1754944e-38, %v2194_v2 }
 0x953   :  { %v3099_v7 = vpop.eup %3098 }
 0x954   :  { %v3101_v63 = vpop.eup %3100  ;;  %v2169_v27 = vmul.f32 %v3099_v7, %v2165_v24  ;;  %3102 = vrcp.f32 %v2167_v42  ;;  %vm2174_vm13 = vweird.f32 %v3099_v7  ;;  %v2209_v18 = vand.u32 2147483648, %v2167_v42 }
 0x955   :  { %v2184_v21 = vmul.f32 %v3101_v63, %v2166_v61  ;;  %3104 = vtanh.f32 %v2153_v25  ;;  %vm2189_vm14 = vweird.f32 %v3101_v63  ;;  %vm2175_vm1 = vmor %vm2173_vm15, %vm2174_vm13  ;;  %vm2203_vm6 = vweird.f32 %v2167_v42 }
 0x956   :  { %v2170_v47 = vsub.f32 1.0, %v2169_v27  ;;  %vm2190_vm2 = vmor %vm2188_vm0, %vm2189_vm14  ;;  %v2210_v34 = vor.u32 1.1754944e-38, %v2209_v18 }
 0x957   :  { %v2185_v3 = vsub.f32 1.0, %v2184_v21 }
 0x958   :  { %v2171_v1 = vmul.f32 %v3099_v7, %v2170_v47 }
 0x959   :  { %v2186_v45 = vmul.f32 %v3101_v63, %v2185_v3 }
 0x95a   :  { %v3103_v28 = vpop.eup %3102  ;;  %v2172_v52 = vadd.f32 %v3099_v7, %v2171_v1 }
 0x95b   :  { %v2199_v55 = vmul.f32 %v3103_v28, %v2167_v42  ;;  %v2187_v46 = vadd.f32 %v3101_v63, %v2186_v45  ;;  %v3105_v25 = vpop.eup %3104  ;;  %vm2204_vm5 = vweird.f32 %v3103_v28 }
 0x95c   :  { %v2176_v13 = vsel %vm2175_vm1, %v3099_v7, %v2172_v52  ;;  %v2207_v7 = vand.u32 2147483647, %v2167_v42  ;;  %vm2205_vm7 = vmor %vm2203_vm6, %vm2204_vm5 }
 0x95d   :  { %v2200_v27 = vsub.f32 1.0, %v2199_v55  ;;  %v2181_v21 = vsel %vm2178_vm3, %v2180_v6, %v2176_v13  ;;  %v2191_v47 = vsel %vm2190_vm2, %v3101_v63, %v2187_v46 }
 0x95e   :  { %v2196_v3 = vsel %vm2193_vm4, %v2195_v60, %v2191_v47  ;;  %v2215_v44 = vmul.f32 %v3105_v25, %v2181_v21  ;;  %vm2208_vm8 = vcmp.eq.f32.partialorder %v2207_v7, 8.507059e+37 }
 0x95f   :  { %v2201_v48 = vmul.f32 %v3103_v28, %v2200_v27  ;;  %v2214_v1 = vmul.f32 %v2196_v3, %v3991_v11 }
 0x961   :  { %v4035_v24 = vadd.f32 %v2215_v44, %v2214_v1  ;;  %v2202_v61 = vadd.f32 %v3103_v28, %v2201_v48 }
 0x963   :  { %3106 = vtanh.f32 %v4035_v24  ;;  %v2206_v2 = vsel %vm2205_vm7, %v3103_v28, %v2202_v61 }
 0x964   :  { %v2211_v45 = vsel %vm2208_vm8, %v2210_v34, %v2206_v2 }
 0x969   :  { %v3107_v63 = vpop.eup %3106 }
 0x96a   :  { %v2218_v15 = vmul.f32 %v3107_v63, %v2211_v45 }
 0x96c   :  { %v2219_v52 = vpack.c.bf16 %v2218_v15, %v2218_v15 }
 0x96e   :  { %2235 = vmatmul.bf16.vlgmr.msrb.gmra.mxu0 %v2219_v52  ;;  %2248 = vmatmul.bf16.vlgmr.msrb.gmra.mxu1 %v2219_v52 }
 0x96f   :  { %2261 = vmatmul.bf16.vlgmr.msrb.gmra.mxu2 %v2219_v52  ;;  %2274 = vmatmul.bf16.vlgmr.msrb.gmra.mxu3 %v2219_v52 }
 0x970   :  { %2466 = vmatpush.bf16.msrb.mxu0 %v3259_v12  ;;  %2479 = vmatpush.bf16.msrb.mxu1 %v3261_v16  ;;  %v137_v12 = vpop.permute.xlu2 %136 }
 0x971   :  { %2492 = vmatpush.bf16.msrb.mxu2 %v3263_v17  ;;  %2505 = vmatpush.bf16.msrb.mxu3 %v3271_v22  ;;  %v209_v16 = vmul.f32 %v3265_v20, %v137_v12  ;;  %v210_v17 = vmul.f32 %v3278_v30, %v137_v12 }
 0x973   :  { %v283_v22 = vadd.f32 %v3288_v37, %v209_v16 }
 0x974   :  { %2467 = vmatpush.bf16.msrb.mxu0 %v3276_v26  ;;  %2480 = vmatpush.bf16.msrb.mxu1 %v3282_v32  ;;  %v284_v26 = vadd.f32 %v3290_v38, %v210_v17  ;;  %v211_v32 = vmul.f32 %v3280_v31, %v137_v12 }
 0x975   :  { %2493 = vmatpush.bf16.msrb.mxu2 %v3284_v33  ;;  %2506 = vmatpush.bf16.msrb.mxu3 %v3293_v39  ;;  %v212_v33 = vmul.f32 %v3286_v36, %v137_v12 }
 0x976   :  { %v319_v39 = vpack.c.bf16 %v284_v26, %v283_v22 }
 0x978   :  { %2468 = vmatpush.bf16.msrb.mxu0 %v3298_v43  ;;  %2481 = vmatpush.bf16.msrb.mxu1 %v3304_v49  ;;  %v4200_v43 = vld [vmem:[#allocation7_spill] sm:$0xff] }
 0x979   :  { %2494 = vmatpush.bf16.msrb.mxu2 %v3306_v50  ;;  %2507 = vmatpush.bf16.msrb.mxu3 %v3309_v54  ;;  %v285_v49 = vadd.f32 %v4200_v43, %v211_v32  ;;  %v4201_v50 = vld [vmem:[#allocation8_spill] sm:$0xff] }
 0x97a   :  { %v286_v54 = vadd.f32 %v4201_v50, %v212_v33 }
 0x97c   :  { %2469 = vmatpush.bf16.msrb.mxu0 %v3318_v62  ;;  %2482 = vmatpush.bf16.msrb.mxu1 %v3325_v8  ;;  %v2223_v62 = vunpack.c.l.bf16 %v319_v39  ;;  %v2224_v8 = vunpack.c.h.bf16 %v319_v39 }
 0x97d   :  { %2495 = vmatpush.bf16.msrb.mxu2 %v3327_v9  ;;  %2508 = vmatpush.bf16.msrb.mxu3 %v3329_v10 }
 0x980   :  { %2470 = vmatpush.bf16.msrb.mxu0 %v3335_v19  ;;  %2483 = vmatpush.bf16.msrb.mxu1 %v3340_v35 }
 0x981   :  { %2496 = vmatpush.bf16.msrb.mxu2 %v3342_v40  ;;  %2509 = vmatpush.bf16.msrb.mxu3 %v3344_v41  ;;  %v320_v40 = vpack.c.bf16 %v286_v54, %v285_v49 }
 0x983   :  { %v2226_v42 = vunpack.c.h.bf16 %v320_v40 }
 0x984   :  { %2471 = vmatpush.bf16.msrb.mxu0 %v3349_v53  ;;  %2484 = vmatpush.bf16.msrb.mxu1 %v3351_v58  ;;  %v2225_v58 = vunpack.c.l.bf16 %v320_v40 }
 0x985   :  { %2497 = vmatpush.bf16.msrb.mxu2 %v3353_v59  ;;  %2510 = vmatpush.bf16.msrb.mxu3 %v3356_v0 }
 0x988   :  { %2472 = vmatpush.bf16.msrb.mxu0 %v3359_v4  ;;  %2485 = vmatpush.bf16.msrb.mxu1 %v3361_v5 }
 0x989   :  { %2498 = vmatpush.bf16.msrb.mxu2 %v3365_v14  ;;  %2511 = vmatpush.bf16.msrb.mxu3 %v3367_v23 }
 0x98c   :  { %2473 = vmatpush.bf16.msrb.mxu0 %v3370_v29  ;;  %2486 = vmatpush.bf16.msrb.mxu1 %v3373_v51 }
 0x98d   :  { %2499 = vmatpush.bf16.msrb.mxu2 %v3377_v56  ;;  %2512 = vmatpush.bf16.msrb.mxu3 %v3379_v57 }
 0x9eb   :  { %v2236_v9 = vpop.f32.mrf.mxu0  ;;  %v2249_v10 = vpop.f32.mrf.mxu1 }
 0x9ec   :  { %v2237_v19 = vadd.f32 %v2236_v9, %v2223_v62  ;;  %v2250_v35 = vadd.f32 %v2249_v10, %v2224_v8 }
 0x9ee   :  { %v2831_v41 = vmul.f32 -1.442695, %v2237_v19  ;;  %v2832_v53 = vmul.f32 -1.442695, %v2250_v35 }
 0x9f0   :  { %3108 = vpow2.f32 %v2831_v41 }
 0x9f1   :  { %3110 = vpow2.f32 %v2832_v53 }
 0x9f2   :  { %v2262_v59 = vpop.f32.mrf.mxu2  ;;  %v2275_v0 = vpop.f32.mrf.mxu3 }
 0x9f3   :  { %v2263_v4 = vadd.f32 %v2262_v59, %v2225_v58  ;;  %v2238_v5 = vpop.f32.mrf.mxu0  ;;  %v2251_v14 = vpop.f32.mrf.mxu1  ;;  %v2276_v6 = vadd.f32 %v2275_v0, %v2226_v42 }
 0x9f5   :  { %v2833_v23 = vmul.f32 -1.442695, %v2263_v4 }
 0x9f6   :  { %v3109_v29 = vpop.eup %3108 }
 0x9f7   :  { %v3111_v51 = vpop.eup %3110  ;;  %v2288_v56 = vadd.f32 1.0, %v3109_v29  ;;  %3112 = vpow2.f32 %v2833_v23 }
 0x9f8   :  { %v2289_v57 = vadd.f32 1.0, %v3111_v51 }
 0x9f9   :  { %3114 = vrcp.f32 %v2288_v56  ;;  %v2302_v21 = vand.u32 2147483648, %v2288_v56  ;;  %v2300_v1 = vand.u32 2147483647, %v2288_v56  ;;  %vm2296_vm11 = vweird.f32 %v2288_v56 }
 0x9fa   :  { %3116 = vrcp.f32 %v2289_v57  ;;  %v2264_v11 = vpop.f32.mrf.mxu2  ;;  %v2277_v48 = vpop.f32.mrf.mxu3  ;;  %v2317_v47 = vand.u32 2147483648, %v2289_v57  ;;  %v2315_v18 = vand.u32 2147483647, %v2289_v57  ;;  %vm2311_vm12 = vweird.f32 %v2289_v57 }
 0x9fb   :  { %v2303_v63 = vor.u32 1.1754944e-38, %v2302_v21  ;;  %vm2301_vm15 = vcmp.eq.f32.partialorder %v2300_v1, 8.507059e+37 }
 0x9fc   :  { %v2318_v15 = vor.u32 1.1754944e-38, %v2317_v47  ;;  %vm2316_vm0 = vcmp.eq.f32.partialorder %v2315_v18, 8.507059e+37 }
 0x9fd   :  { %v3113_v44 = vpop.eup %3112 }
 0x9fe   :  { %v2290_v28 = vadd.f32 1.0, %v3113_v44 }
 0x9ff   :  { %v3115_v55 = vpop.eup %3114 }
 0xa00   :  { %v3117_v46 = vpop.eup %3116  ;;  %v2292_v60 = vmul.f32 %v3115_v55, %v2288_v56  ;;  %3118 = vrcp.f32 %v2290_v28  ;;  %vm2297_vm9 = vweird.f32 %v3115_v55  ;;  %v2332_v62 = vand.u32 2147483648, %v2290_v28 }
 0xa01   :  { %v2307_v13 = vmul.f32 %v3117_v46, %v2289_v57  ;;  %3120 = vtanh.f32 %v2276_v6  ;;  %vm2312_vm10 = vweird.f32 %v3117_v46  ;;  %vm2298_vm13 = vmor %vm2296_vm11, %vm2297_vm9  ;;  %vm2326_vm2 = vweird.f32 %v2290_v28 }
 0xa02   :  { %v2293_v25 = vsub.f32 1.0, %v2292_v60  ;;  %vm2313_vm14 = vmor %vm2311_vm12, %vm2312_vm10  ;;  %v2330_v8 = vand.u32 2147483647, %v2290_v28  ;;  %v2333_v10 = vor.u32 1.1754944e-38, %v2332_v62 }
 0xa03   :  { %v2308_v27 = vsub.f32 1.0, %v2307_v13 }
 0xa04   :  { %v2294_v3 = vmul.f32 %v3115_v55, %v2293_v25  ;;  %vm2331_vm4 = vcmp.eq.f32.partialorder %v2330_v8, 8.507059e+37 }
 0xa05   :  { %v2309_v61 = vmul.f32 %v3117_v46, %v2308_v27 }
 0xa06   :  { %v3119_v7 = vpop.eup %3118  ;;  %v2295_v2 = vadd.f32 %v3115_v55, %v2294_v3 }
 0xa07   :  { %v2322_v34 = vmul.f32 %v3119_v7, %v2290_v28  ;;  %v2310_v45 = vadd.f32 %v3117_v46, %v2309_v61  ;;  %v3121_v12 = vpop.eup %3120  ;;  %vm2327_vm1 = vweird.f32 %v3119_v7 }
 0xa08   :  { %v2299_v52 = vsel %vm2298_vm13, %v3115_v55, %v2295_v2  ;;  %vm2328_vm3 = vmor %vm2326_vm2, %vm2327_vm1 }
 0xa09   :  { %v2323_v16 = vsub.f32 1.0, %v2322_v34  ;;  %v2304_v17 = vsel %vm2301_vm15, %v2303_v63, %v2299_v52  ;;  %v2314_v22 = vsel %vm2313_vm14, %v3117_v46, %v2310_v45 }
 0xa0a   :  { %v2319_v26 = vsel %vm2316_vm0, %v2318_v15, %v2314_v22  ;;  %v2338_v32 = vmul.f32 %v3121_v12, %v2304_v17 }
 0xa0b   :  { %v2324_v33 = vmul.f32 %v3119_v7, %v2323_v16  ;;  %v2337_v39 = vmul.f32 %v2319_v26, %v4035_v24  ;;  %v142_v24 = vpop.permute.xlu0 %141 }
 0xa0c   :  { %v213_v53 = vmul.f32 %v3265_v20, %v142_v24  ;;  %v214_v58 = vmul.f32 %v3278_v30, %v142_v24  ;;  %v215_v4 = vmul.f32 %v3280_v31, %v142_v24  ;;  %v216_v5 = vmul.f32 %v3286_v36, %v142_v24 }
 0xa0d   :  { %v4079_v49 = vadd.f32 %v2338_v32, %v2337_v39  ;;  %v2325_v54 = vadd.f32 %v3119_v7, %v2324_v33 }
 0xa0e   :  { %v287_v59 = vadd.f32 %v3288_v37, %v213_v53  ;;  %v288_v0 = vadd.f32 %v3290_v38, %v214_v58  ;;  %v289_v23 = vadd.f32 %v4200_v43, %v215_v4  ;;  %v290_v29 = vadd.f32 %v4201_v50, %v216_v5 }
 0xa0f   :  { %3122 = vtanh.f32 %v4079_v49  ;;  %v2329_v9 = vsel %vm2328_vm3, %v3119_v7, %v2325_v54 }
 0xa10   :  { %v2334_v35 = vsel %vm2331_vm4, %v2333_v10, %v2329_v9  ;;  %v4088_v14 = vpack.c.bf16 %v288_v0, %v287_v59  ;;  %v4098_v38 = vpack.c.bf16 %v290_v29, %v289_v23 }
 0xa12   :  { %v2346_v51 = vunpack.c.l.bf16 %v4088_v14  ;;  %v2347_v20 = vunpack.c.h.bf16 %v4088_v14  ;;  %v2348_v43 = vunpack.c.l.bf16 %v4098_v38  ;;  %v2349_v21 = vunpack.c.h.bf16 %v4098_v38 }
 0xa15   :  { %v3123_v19 = vpop.eup %3122 }
 0xa16   :  { %v2341_v40 = vmul.f32 %v3123_v19, %v2334_v35 }
 0xa18   :  { %v2342_v41 = vpack.c.bf16 %v2341_v40, %v2341_v40 }
 0xa1a   :  { %2358 = vmatmul.bf16.vlgmr.msra.gmra.mxu0 %v2342_v41  ;;  %2371 = vmatmul.bf16.vlgmr.msra.gmra.mxu1 %v2342_v41 }
 0xa1b   :  { %2384 = vmatmul.bf16.vlgmr.msra.gmra.mxu2 %v2342_v41  ;;  %2397 = vmatmul.bf16.vlgmr.msra.gmra.mxu3 %v2342_v41 }
 0xa97   :  { %v2359_v56 = vpop.f32.mrf.mxu0  ;;  %v2372_v30 = vpop.f32.mrf.mxu1 }
 0xa98   :  { %v2360_v37 = vadd.f32 %v2359_v56, %v2346_v51  ;;  %v2373_v31 = vadd.f32 %v2372_v30, %v2347_v20 }
 0xa9a   :  { %v2834_v36 = vmul.f32 -1.442695, %v2360_v37  ;;  %v2835_v57 = vmul.f32 -1.442695, %v2373_v31 }
 0xa9c   :  { %3124 = vpow2.f32 %v2834_v36 }
 0xa9d   :  { %3126 = vpow2.f32 %v2835_v57 }
 0xa9e   :  { %v2385_v50 = vpop.f32.mrf.mxu2  ;;  %v2398_v11 = vpop.f32.mrf.mxu3 }
 0xa9f   :  { %v2386_v48 = vadd.f32 %v2385_v50, %v2348_v43  ;;  %v2361_v44 = vpop.f32.mrf.mxu0  ;;  %v2374_v42 = vpop.f32.mrf.mxu1  ;;  %v2399_v1 = vadd.f32 %v2398_v11, %v2349_v21 }
 0xaa1   :  { %v2836_v28 = vmul.f32 -1.442695, %v2386_v48 }
 0xaa2   :  { %v3125_v55 = vpop.eup %3124 }
 0xaa3   :  { %v3127_v6 = vpop.eup %3126  ;;  %v2411_v46 = vadd.f32 1.0, %v3125_v55  ;;  %3128 = vpow2.f32 %v2836_v28 }
 0xaa4   :  { %v2412_v60 = vadd.f32 1.0, %v3127_v6 }
 0xaa5   :  { %3130 = vrcp.f32 %v2411_v46  ;;  %v2425_v63 = vand.u32 2147483648, %v2411_v46  ;;  %v2423_v52 = vand.u32 2147483647, %v2411_v46  ;;  %vm2419_vm7 = vweird.f32 %v2411_v46 }
 0xaa6   :  { %3132 = vrcp.f32 %v2412_v60  ;;  %v2387_v13 = vpop.f32.mrf.mxu2  ;;  %v2400_v25 = vpop.f32.mrf.mxu3  ;;  %v2440_v45 = vand.u32 2147483648, %v2412_v60  ;;  %v2438_v16 = vand.u32 2147483647, %v2412_v60  ;;  %vm2434_vm8 = vweird.f32 %v2412_v60 }
 0xaa7   :  { %v2426_v32 = vor.u32 1.1754944e-38, %v2425_v63  ;;  %vm2424_vm11 = vcmp.eq.f32.partialorder %v2423_v52, 8.507059e+37  ;;  %v2585_v52 = vld [vmem:[%s4165_s4 + $0x10] sm:$0xff] }
 0xaa8   :  { %v2441_v39 = vor.u32 1.1754944e-38, %v2440_v45  ;;  %vm2439_vm12 = vcmp.eq.f32.partialorder %v2438_v16, 8.507059e+37 }
 0xaa9   :  { %v3129_v27 = vpop.eup %3128 }
 0xaaa   :  { %v2413_v47 = vadd.f32 1.0, %v3129_v27  ;;  %v2588_v27 = vld [vmem:[%s4165_s4 + $0x28] sm:$0xff] }
 0xaab   :  { %v3131_v3 = vpop.eup %3130 }
 0xaac   :  { %v3133_v61 = vpop.eup %3132  ;;  %v2415_v18 = vmul.f32 %v3131_v3, %v2411_v46  ;;  %3134 = vrcp.f32 %v2413_v47  ;;  %vm2420_vm5 = vweird.f32 %v3131_v3  ;;  %v2455_v58 = vand.u32 2147483648, %v2413_v47 }
 0xaad   :  { %v2430_v7 = vmul.f32 %v3133_v61, %v2412_v60  ;;  %3136 = vtanh.f32 %v2399_v1  ;;  %vm2435_vm6 = vweird.f32 %v3133_v61  ;;  %vm2421_vm9 = vmor %vm2419_vm7, %vm2420_vm5  ;;  %vm2449_vm14 = vweird.f32 %v2413_v47  ;;  %v2590_v60 = vld [vmem:[%s4165_s4 + $0x38] sm:$0xff] }
 0xaae   :  { %v2416_v2 = vsub.f32 1.0, %v2415_v18  ;;  %vm2436_vm10 = vmor %vm2434_vm8, %vm2435_vm6  ;;  %v2453_v59 = vand.u32 2147483647, %v2413_v47  ;;  %v2456_v4 = vor.u32 1.1754944e-38, %v2455_v58  ;;  %2609 = vmatpush.msra.mxu0 %v2590_v60  ;;  %v2587_v18 = vld [vmem:[%s4165_s4 + $0x20] sm:$0xff] }
 0xaaf   :  { %v2431_v34 = vsub.f32 1.0, %v2430_v7 }
 0xab0   :  { %v2417_v15 = vmul.f32 %v3131_v3, %v2416_v2  ;;  %vm2454_vm0 = vcmp.eq.f32.partialorder %v2453_v59, 8.507059e+37 }
 0xab1   :  { %v2432_v12 = vmul.f32 %v3133_v61, %v2431_v34  ;;  %v2586_v34 = vld [vmem:[%s4165_s4 + $0x18] sm:$0xff] }
 0xab2   :  { %v3135_v17 = vpop.eup %3134  ;;  %v2418_v22 = vadd.f32 %v3131_v3, %v2417_v15 }
 0xab3   :  { %v2445_v26 = vmul.f32 %v3135_v17, %v2413_v47  ;;  %v2433_v33 = vadd.f32 %v3133_v61, %v2432_v12  ;;  %v3137_v62 = vpop.eup %3136  ;;  %vm2450_vm13 = vweird.f32 %v3135_v17 }
 0xab4   :  { %v2422_v54 = vsel %vm2421_vm9, %v3131_v3, %v2418_v22  ;;  %vm2451_vm15 = vmor %vm2449_vm14, %vm2450_vm13  ;;  %vm2598_vm13 = vcmask 523264   ;;  %vm2630_vm14 = vcmask 261120  }
 0xab5   :  { %v2446_v8 = vsub.f32 1.0, %v2445_v26  ;;  %v2427_v9 = vsel %vm2424_vm11, %v2426_v32, %v2422_v54  ;;  %v2437_v10 = vsel %vm2436_vm10, %v3133_v61, %v2433_v33  ;;  %v2584_v26 = vld [vmem:[%s4165_s4 + $0x8] sm:$0xff] }
 0xab6   :  { %v2442_v19 = vsel %vm2439_vm12, %v2441_v39, %v2437_v10  ;;  %v2461_v35 = vmul.f32 %v3137_v62, %v2427_v9 }
 0xab7   :  { %v2447_v40 = vmul.f32 %v3135_v17, %v2446_v8  ;;  %v2460_v41 = vmul.f32 %v2442_v19, %v4079_v49  ;;  %v2583_v8 = vld [vmem:[%s4165_s4] sm:$0xff] }
 0xab9   :  { %v4107_v24 = vadd.f32 %v2461_v35, %v2460_v41  ;;  %v2448_v53 = vadd.f32 %v3135_v17, %v2447_v40 }
 0xabb   :  { %3138 = vtanh.f32 %v4107_v24  ;;  %v2452_v0 = vsel %vm2451_vm15, %v3135_v17, %v2448_v53  ;;  %vm2654_vm15 = vcmask 7168  }
 0xabc   :  { %v2457_v23 = vsel %vm2454_vm0, %v2456_v4, %v2452_v0 }
 0xac1   :  { %v3139_v5 = vpop.eup %3138 }
 0xac2   :  { %v2464_v29 = vmul.f32 %v3139_v5, %v2457_v23 }
 0xac4   :  { %v2465_v56 = vpack.c.bf16 %v2464_v29, %v2464_v29 }
 0xac6   :  { %2474 = vmatmul.bf16.vlgmr.msrb.gmra.mxu0 %v2465_v56  ;;  %2487 = vmatmul.bf16.vlgmr.msrb.gmra.mxu1 %v2465_v56 }
 0xac7   :  { %2500 = vmatmul.bf16.vlgmr.msrb.gmra.mxu2 %v2465_v56  ;;  %2513 = vmatmul.bf16.vlgmr.msrb.gmra.mxu3 %v2465_v56 }
 0xb43   :  { %v2475_v49 = vpop.f32.mrf.mxu0  ;;  %v2488_v30 = vpop.f32.mrf.mxu1 }
 0xb44   :  { %v2476_v37 = vadd.f32 %v2475_v49, %v2346_v51  ;;  %v2489_v31 = vadd.f32 %v2488_v30, %v2347_v20 }
 0xb46   :  { %v2837_v36 = vmul.f32 -1.442695, %v2476_v37  ;;  %v2838_v57 = vmul.f32 -1.442695, %v2489_v31 }
 0xb48   :  { %3140 = vpow2.f32 %v2837_v36  ;;  %v2624_v36 = vld [vmem:[%s4167_s6 + $0x10] sm:$0xff] }
 0xb49   :  { %3142 = vpow2.f32 %v2838_v57  ;;  %v2623_v57 = vld [vmem:[%s4167_s6 + $0x8] sm:$0xff] }
 0xb4a   :  { %v2501_v50 = vpop.f32.mrf.mxu2  ;;  %v2514_v11 = vpop.f32.mrf.mxu3 }
 0xb4b   :  { %v2502_v48 = vadd.f32 %v2501_v50, %v2348_v43  ;;  %v2477_v44 = vpop.f32.mrf.mxu0  ;;  %v2490_v42 = vpop.f32.mrf.mxu1  ;;  %v2589_v43 = vld [vmem:[%s4165_s4 + $0x30] sm:$0xff]  ;;  %v2515_v3 = vadd.f32 %v2514_v11, %v2349_v21  ;;  %s3186_s4 = smov 64   ;;  %v2622_v11 = vld [vmem:[%s4167_s6] sm:$0xff] }
 0xb4c   :  { %2610 = vmatpush.msra.mxu0 %v2589_v43 }
 0xb4d   :  { %v2839_v28 = vmul.f32 -1.442695, %v2502_v48  ;;  %v2882_v48 = vld [vmem:[%s4166_s5] ss:$0 sm:$0xff] }
 0xb4e   :  { %v3141_v55 = vpop.eup %3140  ;;  %2611 = vmatpush.msra.mxu0 %v2588_v27 }
 0xb4f   :  { %v3143_v6 = vpop.eup %3142  ;;  %v2527_v46 = vadd.f32 1.0, %v3141_v55  ;;  %3144 = vpow2.f32 %v2839_v28  ;;  %v2883_v55 = vld [vmem:[#allocation3] ss:$0 sm:$0xff] }
 0xb50   :  { %v2528_v51 = vadd.f32 1.0, %v3143_v6  ;;  %2612 = vmatpush.msra.mxu0 %v2587_v18 }
 0xb51   :  { %3146 = vrcp.f32 %v2527_v46  ;;  %v2541_v45 = vand.u32 2147483648, %v2527_v46  ;;  %v2539_v15 = vand.u32 2147483647, %v2527_v46  ;;  %vm2535_vm3 = vweird.f32 %v2527_v46 }
 0xb52   :  { %3148 = vrcp.f32 %v2528_v51  ;;  %v2503_v14 = vpop.f32.mrf.mxu2  ;;  %v2516_v20 = vpop.f32.mrf.mxu3  ;;  %v2556_v38 = vand.u32 2147483648, %v2528_v51  ;;  %v2554_v16 = vand.u32 2147483647, %v2528_v51  ;;  %2613 = vmatpush.msra.mxu0 %v2586_v34  ;;  %vm2550_vm4 = vweird.f32 %v2528_v51 }
 0xb53   :  { %v2542_v33 = vor.u32 1.1754944e-38, %v2541_v45  ;;  %vm2540_vm7 = vcmp.eq.f32.partialorder %v2539_v15, 8.507059e+37 }
 0xb54   :  { %2614 = vmatpush.msra.mxu0 %v2585_v52  ;;  %v2557_v54 = vor.u32 1.1754944e-38, %v2556_v38  ;;  %vm2555_vm8 = vcmp.eq.f32.partialorder %v2554_v16, 8.507059e+37 }
 0xb55   :  { %v3145_v13 = vpop.eup %3144 }
 0xb56   :  { %v2529_v25 = vadd.f32 1.0, %v3145_v13  ;;  %2615 = vmatpush.msra.mxu0 %v2584_v26 }
 0xb57   :  { %v3147_v47 = vpop.eup %3146 }
 0xb58   :  { %v3149_v1 = vpop.eup %3148  ;;  %v2531_v61 = vmul.f32 %v3147_v47, %v2527_v46  ;;  %3150 = vrcp.f32 %v2529_v25  ;;  %vm2536_vm1 = vweird.f32 %v3147_v47  ;;  %2616 = vmatpush.msra.mxu0 %v2583_v8  ;;  %v2571_v4 = vand.u32 2147483648, %v2529_v25 }
 0xb59   :  { %v2546_v7 = vmul.f32 %v3149_v1, %v2528_v51  ;;  %3152 = vtanh.f32 %v2515_v3  ;;  %vm2551_vm2 = vweird.f32 %v3149_v1  ;;  %vm2537_vm5 = vmor %vm2535_vm3, %vm2536_vm1  ;;  %vm2565_vm10 = vweird.f32 %v2529_v25 }
 0xb5a   :  { %v2532_v2 = vsub.f32 1.0, %v2531_v61  ;;  %vm2552_vm6 = vmor %vm2550_vm4, %vm2551_vm2  ;;  %v2569_v5 = vand.u32 2147483647, %v2529_v25  ;;  %v2572_v29 = vor.u32 1.1754944e-38, %v2571_v4 }
 0xb5b   :  { %v2547_v63 = vsub.f32 1.0, %v2546_v7 }
 0xb5c   :  { %v2533_v21 = vmul.f32 %v3147_v47, %v2532_v2  ;;  %vm2570_vm12 = vcmp.eq.f32.partialorder %v2569_v5, 8.507059e+37 }
 0xb5d   :  { %v2548_v12 = vmul.f32 %v3149_v1, %v2547_v63 }
 0xb5e   :  { %v3151_v17 = vpop.eup %3150  ;;  %v2534_v22 = vadd.f32 %v3147_v47, %v2533_v21 }
 0xb5f   :  { %v2561_v32 = vmul.f32 %v3151_v17, %v2529_v25  ;;  %v2549_v39 = vadd.f32 %v3149_v1, %v2548_v12  ;;  %v3153_v9 = vpop.eup %3152  ;;  %vm2566_vm9 = vweird.f32 %v3151_v17 }
 0xb60   :  { %v2538_v62 = vsel %vm2537_vm5, %v3147_v47, %v2534_v22  ;;  %vm2567_vm11 = vmor %vm2565_vm10, %vm2566_vm9 }
 0xb61   :  { %v2562_v10 = vsub.f32 1.0, %v2561_v32  ;;  %v2543_v19 = vsel %vm2540_vm7, %v2542_v33, %v2538_v62  ;;  %v2553_v35 = vsel %vm2552_vm6, %v3149_v1, %v2549_v39 }
 0xb62   :  { %v2558_v40 = vsel %vm2555_vm8, %v2557_v54, %v2553_v35  ;;  %v2577_v41 = vmul.f32 %v3153_v9, %v2543_v19 }
 0xb63   :  { %v2576_v53 = vmul.f32 %v2558_v40, %v4107_v24  ;;  %v2563_v58 = vmul.f32 %v3151_v17, %v2562_v10  ;;  %v2625_v24 = vld [vmem:[%s4167_s6 + $0x18] sm:$0xff] }
 0xb64   :  { %2646 = vmatpush.msra.mxu1 %v2625_v24 }
 0xb65   :  { %v2578_v59 = vadd.f32 %v2577_v41, %v2576_v53  ;;  %v2564_v0 = vadd.f32 %v3151_v17, %v2563_v58 }
 0xb66   :  { %2647 = vmatpush.msra.mxu1 %v2624_v36 }
 0xb67   :  { %3154 = vtanh.f32 %v2578_v59  ;;  %v2568_v23 = vsel %vm2567_vm11, %v3151_v17, %v2564_v0 }
 0xb68   :  { %v2573_v49 = vsel %vm2570_vm12, %v2572_v29, %v2568_v23  ;;  %2648 = vmatpush.msra.mxu1 %v2623_v57 }
 0xb6a   :  { %2649 = vmatpush.msra.mxu1 %v2622_v11 }
 0xb6d   :  { %v3155_v56 = vpop.eup %3154 }
 0xb6e   :  { %v2580_v30 = vmul.f32 %v3155_v56, %v2573_v49 }
 0xb70   :  { %v2581_v37 = vpack.c.bf16 %v2580_v30, %v2580_v30 }
 0xb72   :  { %v2582_v31 = vunpack.c.l.bf16 %v2581_v37 }
 0xb74   :  { %2596 = vrot.lane.b32.xlu1 %v2582_v31, %s3186_s4 }
 0xbe6   :  { %v2597_v50 = vpop.permute.xlu1 %2596 }
 0xbe7   :  { %2840 = vmatmul.msk.f32.vlgmr.msra.gmra.mxu0 %vm2598_vm13, %v2597_v50 }
 0xc64   :  { %v2618_v44 = vpop.f32.mrf.mxu0 }
 0xc65   :  { %v2619_v42 = vadd.f32 %v2882_v48, %v2618_v44 }
 0xc67   :  { %v2621_v28 = vmax.f32 %v2619_v42, 0.0 }
 0xc69   :  { %2841 = vmatmul.msk.f32.vlgmr.msra.gmra.mxu1 %vm2630_vm14, %v2621_v28 }
 0xce6   :  { %v2651_v6 = vpop.f32.mrf.mxu1 }
 0xce7   :  { %v2652_v46 = vadd.f32 %v2883_v55, %v2651_v6 }
 0xce9   :  { %2655 = vst.msk [vmem:[%s4169_s8] sm:$0xff] %vm2654_vm15, %v2652_v46 }
 0xcea   :  { %2660 = vsyncpa [#allocation5], 1 }

</bundles_post_ra>
